<compile_context>
chip_gen: v6e
topology: v6e:2x2x1
jax: 0.10.0
libtpu: 0.0.40
codegen_flags: <defaults>
</compile_context>

<pallas_src>
import jax
import jax.numpy as jnp
from jax.experimental import pallas as pl
from jax.experimental.pallas import tpu as pltpu


def bottleneck_kernel(x_ref, w1_ref, b1_ref, w2_ref, b2_ref, w3_ref, b3_ref,
                      out_ref, hpad_ref):
    # x_ref   : (H, W, Cin) f32        one full image (batch dim squeezed)
    # w*_ref  : bf16 conv weights with the BN scale folded in
    # b*_ref  : (1, C) f32 BN shifts
    # out_ref : (H, W, Cout) f32
    # hpad_ref: ((H+2)*W, P) bf16 scratch -- conv1 output with conv2's zero-pad rows
    H, W, Cin = x_ref.shape
    P = w1_ref.shape[1]
    Cout = w3_ref.shape[1]
    HW = H * W

    # conv2's zero-padding rows (top/bottom of the image).  The scratch persists
    # across grid steps and nothing else touches these rows -> write them once.
    @pl.when(pl.program_id(0) == 0)
    def _():
        zrow = jnp.zeros((W, P), jnp.bfloat16)
        hpad_ref[pl.ds(0, W)] = zrow
        hpad_ref[pl.ds((H + 1) * W, W)] = zrow

    # ---- conv1 (1x1) + bn1 shift + relu ----------------------------------
    x_all = x_ref[...].reshape(HW, Cin)                       # f32 (also the residual)
    h1 = jnp.dot(x_all.astype(jnp.bfloat16), w1_ref[...],
                 preferred_element_type=jnp.float32)
    h1 = jnp.maximum(h1 + b1_ref[...], 0.0)
    hpad_ref[pl.ds(W, HW)] = h1.astype(jnp.bfloat16)

    # ---- conv2 (3x3, stride 1, pad 1) + bn2 shift + relu ------------------
    # out[h, w] = sum_{dy,dx} h1[h+dy-1, w+dx-1] @ w2[dy, dx]
    # u[dx] accumulates the three dy terms; the row (dy) shift is a free
    # leading-dim offset into the padded scratch, the column (dx) shift is
    # applied to the matmul OUTPUT with an XLU roll + border mask.
    u = [None, None, None]
    for dy in range(3):
        slab = hpad_ref[pl.ds(dy * W, HW)]                    # (HW, P) bf16 view
        for dx in range(3):
            t = jnp.dot(slab, w2_ref[dy, dx], preferred_element_type=jnp.float32)
            u[dx] = t if u[dx] is None else u[dx] + t

    col = jax.lax.broadcasted_iota(jnp.int32, (HW, 1), 0) % W
    keep_l = (col != 0).astype(jnp.float32)                   # dx=0 term invalid at w == 0
    keep_r = (col != W - 1).astype(jnp.float32)                # dx=2 term invalid at w == W-1
    conv2 = (u[1]
             + keep_l * pltpu.roll(u[0], shift=1, axis=0)
             + keep_r * pltpu.roll(u[2], shift=HW - 1, axis=0))
    h2 = jnp.maximum(conv2 + b2_ref[...], 0.0).astype(jnp.bfloat16)

    # ---- conv3 (1x1) + bn3 shift + identity residual + relu --------------
    h3 = jnp.dot(h2, w3_ref[...], preferred_element_type=jnp.float32) + b3_ref[...]
    out_ref[...] = jnp.maximum(h3 + x_all, 0.0).reshape(H, W, Cout)


def bottleneck_pallas(x_nhwc, p):
    N, H, W, Cin = x_nhwc.shape
    P = p["w1"].shape[1]
    Cout = 4 * P
    assert Cin == Cout, "identity residual requires inplanes == planes * 4"
    assert W % 8 == 0, "W should be a multiple of 8 (sublane alignment)"

    # Fold the BN scale into the conv weights (free plain-JAX preprocessing) and
    # store the weights in bf16; only the additive shift stays in-kernel (f32).
    w1 = (p["w1"] * p["s1"]).astype(jnp.bfloat16)                       # (Cin, P)
    w2 = (p["w2"] * p["s2"].reshape(1, 1, 1, P)).astype(jnp.bfloat16)   # (3,3,P,P) HWIO
    w3 = (p["w3"] * p["s3"]).astype(jnp.bfloat16)                       # (P, Cout)
    b1, b2, b3 = p["b1"], p["b2"], p["b3"]                              # (1, C) f32

    def rep(shape):                                   # grid-invariant parameters
        return pl.BlockSpec(shape, lambda n: (0,) * len(shape))

    return pl.pallas_call(
        bottleneck_kernel,
        out_shape=jax.ShapeDtypeStruct((N, H, W, Cout), jnp.float32),
        grid=(N,),
        in_specs=[
            pl.BlockSpec((None, H, W, Cin), lambda n: (n, 0, 0, 0)),    # one image
            rep((Cin, P)), rep((1, P)),                                 # conv1 / bn1
            rep((3, 3, P, P)), rep((1, P)),                             # conv2 / bn2
            rep((P, Cout)), rep((1, Cout)),                             # conv3 / bn3
        ],
        out_specs=pl.BlockSpec((None, H, W, Cout), lambda n: (n, 0, 0, 0)),
        scratch_shapes=[pltpu.VMEM(((H + 2) * W, P), jnp.bfloat16)],
        compiler_params=pltpu.CompilerParams(
            dimension_semantics=("parallel",),
            vmem_limit_bytes=48 * 1024 * 1024),
    )(x_nhwc, w1, b1, w2, b2, w3, b3)


def make_params(key, inplanes, planes):
    """Deterministic synthetic parameters; BN running stats folded to scale/shift."""
    ks = jax.random.split(key, 15)

    def bn_fold(kg, kb, km, kv, c):
        gamma = 1.0 + 0.1 * jax.random.normal(kg, (c,), jnp.float32)
        beta = 0.1 * jax.random.normal(kb, (c,), jnp.float32)
        mean = 0.1 * jax.random.normal(km, (c,), jnp.float32)
        var = jnp.abs(jax.random.normal(kv, (c,), jnp.float32)) + 0.5
        scale = gamma / jnp.sqrt(var + 1e-5)
        shift = beta - mean * scale
        return scale.reshape(1, c), shift.reshape(1, c)

    P, Cout = planes, planes * 4
    w1 = 0.1 * jax.random.normal(ks[0], (inplanes, P), jnp.float32)      # 1x1: (Cin, P)
    w2 = 0.1 * jax.random.normal(ks[1], (3, 3, P, P), jnp.float32)       # 3x3: HWIO
    w3 = 0.1 * jax.random.normal(ks[2], (P, Cout), jnp.float32)          # 1x1: (P, 4P)
    s1, b1 = bn_fold(ks[3], ks[4], ks[5], ks[6], P)
    s2, b2 = bn_fold(ks[7], ks[8], ks[9], ks[10], P)
    s3, b3 = bn_fold(ks[11], ks[12], ks[13], ks[14], Cout)
    return dict(w1=w1, s1=s1, b1=b1, w2=w2, s2=s2, b2=b2, w3=w3, s3=s3, b3=b3)


def bottleneck_ref(x_nhwc, p):
    """Plain-JAX reference (NHWC), inference-mode BN, f32."""
    hp = jax.lax.Precision.HIGHEST
    h1 = jnp.einsum('nhwc,cp->nhwp', x_nhwc, p["w1"], precision=hp)
    h1 = jnp.maximum(h1 * p["s1"][0] + p["b1"][0], 0.0)
    h2 = jax.lax.conv_general_dilated(
        h1, p["w2"], window_strides=(1, 1), padding=((1, 1), (1, 1)),
        dimension_numbers=('NHWC', 'HWIO', 'NHWC'), precision=hp)
    h2 = jnp.maximum(h2 * p["s2"][0] + p["b2"][0], 0.0)
    h3 = jnp.einsum('nhwp,pq->nhwq', h2, p["w3"], precision=hp)
    h3 = h3 * p["s3"][0] + p["b3"][0]
    return jnp.maximum(h3 + x_nhwc, 0.0)


if __name__ == "__main__":
    # Small shapes consistent with the module: planes=32, inplanes=planes*4=128
    # (128 channels keeps the residual/output writes lane-dense on the 128-lane axis).
    N, H, W = 2, 16, 16
    planes = 32
    inplanes = planes * 4

    key = jax.random.PRNGKey(0)
    kx, kp = jax.random.split(key)
    x_nchw = jax.random.normal(kx, (N, inplanes, H, W), jnp.float32)   # PyTorch layout
    params = make_params(kp, inplanes, planes)

    x_nhwc = jnp.transpose(x_nchw, (0, 2, 3, 1))                       # NCHW -> NHWC
    out_nhwc = jax.block_until_ready(bottleneck_pallas(x_nhwc, params))
    out_nchw = jnp.transpose(out_nhwc, (0, 3, 1, 2))                   # back to NCHW

    ref = bottleneck_ref(x_nhwc, params)
    max_diff = float(jnp.max(jnp.abs(out_nhwc - ref)))
    assert out_nchw.shape == (N, inplanes, H, W)
    # bf16 matmul operands with f32 accumulation vs an f32 reference
    assert max_diff < 5e-2, f"mismatch vs reference: {max_diff}"
    print("KERNEL_OK")
</pallas_src>

<mosaic_0001>
module attributes {stable_mosaic.version = 11 : i64} {
  func.func @bottleneck_kernel(%arg0: i32, %arg1: memref<1x16x16x128xf32, #tpu.memory_space<vmem>>, %arg2: memref<128x32xbf16, #tpu.memory_space<vmem>>, %arg3: memref<1x32xf32, #tpu.memory_space<vmem>>, %arg4: memref<3x3x32x32xbf16, #tpu.memory_space<vmem>>, %arg5: memref<1x32xf32, #tpu.memory_space<vmem>>, %arg6: memref<32x128xbf16, #tpu.memory_space<vmem>>, %arg7: memref<1x128xf32, #tpu.memory_space<vmem>>, %arg8: memref<1x16x16x128xf32, #tpu.memory_space<vmem>>, %arg9: memref<288x32xbf16, #tpu.memory_space<vmem>>) attributes {dimension_semantics = [#tpu.dimension_semantics<parallel>], iteration_bounds = array<i64: 2>, scalar_prefetch = 0 : i64, scratch_operands = 1 : i64, tpu.core_type = #tpu.core_type<tc>, window_params = [{transform_indices = @transform_0, window_bounds = array<i64: 1, 16, 16, 128>}, {pipeline_mode = #tpu.pipeline_mode<synchronous>, transform_indices = @transform_1, window_bounds = array<i64: 128, 32>}, {pipeline_mode = #tpu.pipeline_mode<synchronous>, transform_indices = @transform_2, window_bounds = array<i64: 1, 32>}, {pipeline_mode = #tpu.pipeline_mode<synchronous>, transform_indices = @transform_3, window_bounds = array<i64: 3, 3, 32, 32>}, {pipeline_mode = #tpu.pipeline_mode<synchronous>, transform_indices = @transform_4, window_bounds = array<i64: 1, 32>}, {pipeline_mode = #tpu.pipeline_mode<synchronous>, transform_indices = @transform_5, window_bounds = array<i64: 32, 128>}, {pipeline_mode = #tpu.pipeline_mode<synchronous>, transform_indices = @transform_6, window_bounds = array<i64: 1, 128>}, {transform_indices = @transform_7, window_bounds = array<i64: 1, 16, 16, 128>}]} {
    %c0_i32 = arith.constant 0 : i32
    %0 = arith.cmpi eq, %arg0, %c0_i32 : i32
    %1 = arith.extui %0 : i1 to i32
    %c0_i32_0 = arith.constant 0 : i32
    %2 = arith.cmpi ne, %1, %c0_i32_0 : i32
    scf.if %2 {
      %cst_77 = arith.constant 0.000000e+00 : bf16
      %103 = vector.broadcast %cst_77 : bf16 to vector<16x32xbf16>
      %c0_78 = arith.constant 0 : index
      %c0_79 = arith.constant 0 : index
      %104 = vector.load %arg9[%c0_78, %c0_79] : memref<288x32xbf16, #tpu.memory_space<vmem>>, vector<16x32xbf16>
      tpu.vector_store %arg9[%c0_78, %c0_79], %103 {strides = array<i32>} : memref<288x32xbf16, #tpu.memory_space<vmem>>, vector<16x32xbf16>,
      %c272 = arith.constant 272 : index
      %c0_80 = arith.constant 0 : index
      %105 = vector.load %arg9[%c272, %c0_80] : memref<288x32xbf16, #tpu.memory_space<vmem>>, vector<16x32xbf16>
      tpu.vector_store %arg9[%c272, %c0_80], %103 {strides = array<i32>} : memref<288x32xbf16, #tpu.memory_space<vmem>>, vector<16x32xbf16>,
    } else {
    }
    %c0 = arith.constant 0 : index
    %c0_1 = arith.constant 0 : index
    %c0_2 = arith.constant 0 : index
    %c0_3 = arith.constant 0 : index
    %3 = vector.load %arg1[%c0, %c0_1, %c0_2, %c0_3] : memref<1x16x16x128xf32, #tpu.memory_space<vmem>>, vector<1x16x16x128xf32>
    %4 = vector.shape_cast %3 : vector<1x16x16x128xf32> to vector<16x16x128xf32>
    %5 = vector.shape_cast %4 : vector<16x16x128xf32> to vector<256x128xf32>
    %6 = arith.truncf %5 : vector<256x128xf32> to vector<256x128xbf16>
    %c0_4 = arith.constant 0 : index
    %c0_5 = arith.constant 0 : index
    %7 = vector.load %arg2[%c0_4, %c0_5] : memref<128x32xbf16, #tpu.memory_space<vmem>>, vector<128x32xbf16>
    %cst = arith.constant dense<0.000000e+00> : vector<256x32xf32>
    %8 = tpu.matmul %6, %7, %cst {dimension_numbers = #tpu.dot_dimension_numbers<[1], [0], [0], [1], [0, 0, 1, 1], [], []>} : vector<256x128xbf16>, vector<128x32xbf16>, vector<256x32xf32> -> vector<256x32xf32>
    %c0_6 = arith.constant 0 : index
    %c0_7 = arith.constant 0 : index
    %9 = vector.load %arg3[%c0_6, %c0_7] : memref<1x32xf32, #tpu.memory_space<vmem>>, vector<1x32xf32>
    %10 = vector.broadcast %9 : vector<1x32xf32> to vector<256x32xf32>
    %11 = arith.addf %8, %10 : vector<256x32xf32>
    %cst_8 = arith.constant 0.000000e+00 : f32
    %12 = vector.broadcast %cst_8 : f32 to vector<256x32xf32>
    %13 = arith.maximumf %11, %12 : vector<256x32xf32>
    %14 = arith.truncf %13 : vector<256x32xf32> to vector<256x32xbf16>
    %c16 = arith.constant 16 : index
    %c0_9 = arith.constant 0 : index
    %15 = vector.load %arg9[%c16, %c0_9] : memref<288x32xbf16, #tpu.memory_space<vmem>>, vector<256x32xbf16>
    tpu.vector_store %arg9[%c16, %c0_9], %14 {strides = array<i32>} : memref<288x32xbf16, #tpu.memory_space<vmem>>, vector<256x32xbf16>,
    %c0_10 = arith.constant 0 : index
    %c0_11 = arith.constant 0 : index
    %16 = vector.load %arg9[%c0_10, %c0_11] : memref<288x32xbf16, #tpu.memory_space<vmem>>, vector<256x32xbf16>
    %c0_12 = arith.constant 0 : index
    %c0_13 = arith.constant 0 : index
    %c0_14 = arith.constant 0 : index
    %c0_15 = arith.constant 0 : index
    %17 = vector.load %arg4[%c0_12, %c0_13, %c0_14, %c0_15] : memref<3x3x32x32xbf16, #tpu.memory_space<vmem>>, vector<1x1x32x32xbf16>
    %18 = vector.shape_cast %17 : vector<1x1x32x32xbf16> to vector<32x32xbf16>
    %cst_16 = arith.constant dense<0.000000e+00> : vector<256x32xf32>
    %19 = tpu.matmul %16, %18, %cst_16 {dimension_numbers = #tpu.dot_dimension_numbers<[1], [0], [0], [1], [0, 0, 1, 1], [], []>} : vector<256x32xbf16>, vector<32x32xbf16>, vector<256x32xf32> -> vector<256x32xf32>
    %c0_17 = arith.constant 0 : index
    %c1 = arith.constant 1 : index
    %c0_18 = arith.constant 0 : index
    %c0_19 = arith.constant 0 : index
    %20 = vector.load %arg4[%c0_17, %c1, %c0_18, %c0_19] : memref<3x3x32x32xbf16, #tpu.memory_space<vmem>>, vector<1x1x32x32xbf16>
    %21 = vector.shape_cast %20 : vector<1x1x32x32xbf16> to vector<32x32xbf16>
    %cst_20 = arith.constant dense<0.000000e+00> : vector<256x32xf32>
    %22 = tpu.matmul %16, %21, %cst_20 {dimension_numbers = #tpu.dot_dimension_numbers<[1], [0], [0], [1], [0, 0, 1, 1], [], []>} : vector<256x32xbf16>, vector<32x32xbf16>, vector<256x32xf32> -> vector<256x32xf32>
    %c0_21 = arith.constant 0 : index
    %c2 = arith.constant 2 : index
    %c0_22 = arith.constant 0 : index
    %c0_23 = arith.constant 0 : index
    %23 = vector.load %arg4[%c0_21, %c2, %c0_22, %c0_23] : memref<3x3x32x32xbf16, #tpu.memory_space<vmem>>, vector<1x1x32x32xbf16>
    %24 = vector.shape_cast %23 : vector<1x1x32x32xbf16> to vector<32x32xbf16>
    %cst_24 = arith.constant dense<0.000000e+00> : vector<256x32xf32>
    %25 = tpu.matmul %16, %24, %cst_24 {dimension_numbers = #tpu.dot_dimension_numbers<[1], [0], [0], [1], [0, 0, 1, 1], [], []>} : vector<256x32xbf16>, vector<32x32xbf16>, vector<256x32xf32> -> vector<256x32xf32>
    %c16_25 = arith.constant 16 : index
    %c0_26 = arith.constant 0 : index
    %26 = vector.load %arg9[%c16_25, %c0_26] : memref<288x32xbf16, #tpu.memory_space<vmem>>, vector<256x32xbf16>
    %c1_27 = arith.constant 1 : index
    %c0_28 = arith.constant 0 : index
    %c0_29 = arith.constant 0 : index
    %c0_30 = arith.constant 0 : index
    %27 = vector.load %arg4[%c1_27, %c0_28, %c0_29, %c0_30] : memref<3x3x32x32xbf16, #tpu.memory_space<vmem>>, vector<1x1x32x32xbf16>
    %28 = vector.shape_cast %27 : vector<1x1x32x32xbf16> to vector<32x32xbf16>
    %cst_31 = arith.constant dense<0.000000e+00> : vector<256x32xf32>
    %29 = tpu.matmul %26, %28, %cst_31 {dimension_numbers = #tpu.dot_dimension_numbers<[1], [0], [0], [1], [0, 0, 1, 1], [], []>} : vector<256x32xbf16>, vector<32x32xbf16>, vector<256x32xf32> -> vector<256x32xf32>
    %30 = arith.addf %19, %29 : vector<256x32xf32>
    %c1_32 = arith.constant 1 : index
    %c1_33 = arith.constant 1 : index
    %c0_34 = arith.constant 0 : index
    %c0_35 = arith.constant 0 : index
    %31 = vector.load %arg4[%c1_32, %c1_33, %c0_34, %c0_35] : memref<3x3x32x32xbf16, #tpu.memory_space<vmem>>, vector<1x1x32x32xbf16>
    %32 = vector.shape_cast %31 : vector<1x1x32x32xbf16> to vector<32x32xbf16>
    %cst_36 = arith.constant dense<0.000000e+00> : vector<256x32xf32>
    %33 = tpu.matmul %26, %32, %cst_36 {dimension_numbers = #tpu.dot_dimension_numbers<[1], [0], [0], [1], [0, 0, 1, 1], [], []>} : vector<256x32xbf16>, vector<32x32xbf16>, vector<256x32xf32> -> vector<256x32xf32>
    %34 = arith.addf %22, %33 : vector<256x32xf32>
    %c1_37 = arith.constant 1 : index
    %c2_38 = arith.constant 2 : index
    %c0_39 = arith.constant 0 : index
    %c0_40 = arith.constant 0 : index
    %35 = vector.load %arg4[%c1_37, %c2_38, %c0_39, %c0_40] : memref<3x3x32x32xbf16, #tpu.memory_space<vmem>>, vector<1x1x32x32xbf16>
    %36 = vector.shape_cast %35 : vector<1x1x32x32xbf16> to vector<32x32xbf16>
    %cst_41 = arith.constant dense<0.000000e+00> : vector<256x32xf32>
    %37 = tpu.matmul %26, %36, %cst_41 {dimension_numbers = #tpu.dot_dimension_numbers<[1], [0], [0], [1], [0, 0, 1, 1], [], []>} : vector<256x32xbf16>, vector<32x32xbf16>, vector<256x32xf32> -> vector<256x32xf32>
    %38 = arith.addf %25, %37 : vector<256x32xf32>
    %c32 = arith.constant 32 : index
    %c0_42 = arith.constant 0 : index
    %39 = vector.load %arg9[%c32, %c0_42] : memref<288x32xbf16, #tpu.memory_space<vmem>>, vector<256x32xbf16>
    %c2_43 = arith.constant 2 : index
    %c0_44 = arith.constant 0 : index
    %c0_45 = arith.constant 0 : index
    %c0_46 = arith.constant 0 : index
    %40 = vector.load %arg4[%c2_43, %c0_44, %c0_45, %c0_46] : memref<3x3x32x32xbf16, #tpu.memory_space<vmem>>, vector<1x1x32x32xbf16>
    %41 = vector.shape_cast %40 : vector<1x1x32x32xbf16> to vector<32x32xbf16>
    %cst_47 = arith.constant dense<0.000000e+00> : vector<256x32xf32>
    %42 = tpu.matmul %39, %41, %cst_47 {dimension_numbers = #tpu.dot_dimension_numbers<[1], [0], [0], [1], [0, 0, 1, 1], [], []>} : vector<256x32xbf16>, vector<32x32xbf16>, vector<256x32xf32> -> vector<256x32xf32>
    %43 = arith.addf %30, %42 : vector<256x32xf32>
    %c2_48 = arith.constant 2 : index
    %c1_49 = arith.constant 1 : index
    %c0_50 = arith.constant 0 : index
    %c0_51 = arith.constant 0 : index
    %44 = vector.load %arg4[%c2_48, %c1_49, %c0_50, %c0_51] : memref<3x3x32x32xbf16, #tpu.memory_space<vmem>>, vector<1x1x32x32xbf16>
    %45 = vector.shape_cast %44 : vector<1x1x32x32xbf16> to vector<32x32xbf16>
    %cst_52 = arith.constant dense<0.000000e+00> : vector<256x32xf32>
    %46 = tpu.matmul %39, %45, %cst_52 {dimension_numbers = #tpu.dot_dimension_numbers<[1], [0], [0], [1], [0, 0, 1, 1], [], []>} : vector<256x32xbf16>, vector<32x32xbf16>, vector<256x32xf32> -> vector<256x32xf32>
    %47 = arith.addf %34, %46 : vector<256x32xf32>
    %c2_53 = arith.constant 2 : index
    %c2_54 = arith.constant 2 : index
    %c0_55 = arith.constant 0 : index
    %c0_56 = arith.constant 0 : index
    %48 = vector.load %arg4[%c2_53, %c2_54, %c0_55, %c0_56] : memref<3x3x32x32xbf16, #tpu.memory_space<vmem>>, vector<1x1x32x32xbf16>
    %49 = vector.shape_cast %48 : vector<1x1x32x32xbf16> to vector<32x32xbf16>
    %cst_57 = arith.constant dense<0.000000e+00> : vector<256x32xf32>
    %50 = tpu.matmul %39, %49, %cst_57 {dimension_numbers = #tpu.dot_dimension_numbers<[1], [0], [0], [1], [0, 0, 1, 1], [], []>} : vector<256x32xbf16>, vector<32x32xbf16>, vector<256x32xf32> -> vector<256x32xf32>
    %51 = arith.addf %38, %50 : vector<256x32xf32>
    %52 = tpu.iota {dimensions = array<i32: 0>} : vector<256x1xi32>
    %c16_i32 = arith.constant 16 : i32
    %c0_i32_58 = arith.constant 0 : i32
    %53 = arith.cmpi eq, %c16_i32, %c0_i32_58 : i32
    %c1_i32 = arith.constant 1 : i32
    %54 = arith.select %53, %c1_i32, %c16_i32 : i32
    %55 = vector.broadcast %54 : i32 to vector<256x1xi32>
    %56 = arith.remsi %52, %55 : vector<256x1xi32>
    %c0_i32_59 = arith.constant 0 : i32
    %57 = vector.broadcast %c0_i32_59 : i32 to vector<256x1xi32>
    %58 = arith.cmpi ne, %56, %57 : vector<256x1xi32>
    %c0_i32_60 = arith.constant 0 : i32
    %59 = vector.broadcast %c0_i32_60 : i32 to vector<256x1xi32>
    %60 = arith.cmpi slt, %56, %59 : vector<256x1xi32>
    %c0_i32_61 = arith.constant 0 : i32
    %61 = arith.cmpi slt, %54, %c0_i32_61 : i32
    %62 = vector.broadcast %61 : i1 to vector<256x1xi1>
    %63 = vector.broadcast %62 : vector<256x1xi1> to vector<256x1xi1>
    %64 = arith.xori %60, %63 : vector<256x1xi1>
    %65 = arith.andi %64, %58 : vector<256x1xi1>
    %66 = vector.broadcast %54 : i32 to vector<256x1xi32>
    %67 = arith.addi %56, %66 : vector<256x1xi32>
    %68 = arith.select %65, %67, %56 : vector<256x1xi1>, vector<256x1xi32>
    %c0_i32_62 = arith.constant 0 : i32
    %69 = vector.broadcast %c0_i32_62 : i32 to vector<256x1xi32>
    %70 = arith.cmpi ne, %68, %69 : vector<256x1xi32>
    %71 = arith.extui %70 : vector<256x1xi1> to vector<256x1xi32>
    %72 = arith.sitofp %71 : vector<256x1xi32> to vector<256x1xf32>
    %c15_i32 = arith.constant 15 : i32
    %73 = vector.broadcast %c15_i32 : i32 to vector<256x1xi32>
    %74 = arith.cmpi ne, %68, %73 : vector<256x1xi32>
    %75 = arith.extui %74 : vector<256x1xi1> to vector<256x1xi32>
    %76 = arith.sitofp %75 : vector<256x1xi32> to vector<256x1xf32>
    %c1_i32_63 = arith.constant 1 : i32
    %77 = tpu.dynamic_rotate %43 by %c1_i32_63 dim 0 : vector<256x32xf32>, i32 -> vector<256x32xf32>
    %78 = vector.broadcast %72 : vector<256x1xf32> to vector<256x32xf32>
    %79 = arith.mulf %78, %77 : vector<256x32xf32>
    %80 = arith.addf %47, %79 : vector<256x32xf32>
    %c255_i32 = arith.constant 255 : i32
    %81 = tpu.dynamic_rotate %51 by %c255_i32 dim 0 : vector<256x32xf32>, i32 -> vector<256x32xf32>
    %82 = vector.broadcast %76 : vector<256x1xf32> to vector<256x32xf32>
    %83 = arith.mulf %82, %81 : vector<256x32xf32>
    %84 = arith.addf %80, %83 : vector<256x32xf32>
    %c0_64 = arith.constant 0 : index
    %c0_65 = arith.constant 0 : index
    %85 = vector.load %arg5[%c0_64, %c0_65] : memref<1x32xf32, #tpu.memory_space<vmem>>, vector<1x32xf32>
    %86 = vector.broadcast %85 : vector<1x32xf32> to vector<256x32xf32>
    %87 = arith.addf %84, %86 : vector<256x32xf32>
    %cst_66 = arith.constant 0.000000e+00 : f32
    %88 = vector.broadcast %cst_66 : f32 to vector<256x32xf32>
    %89 = arith.maximumf %87, %88 : vector<256x32xf32>
    %90 = arith.truncf %89 : vector<256x32xf32> to vector<256x32xbf16>
    %c0_67 = arith.constant 0 : index
    %c0_68 = arith.constant 0 : index
    %91 = vector.load %arg6[%c0_67, %c0_68] : memref<32x128xbf16, #tpu.memory_space<vmem>>, vector<32x128xbf16>
    %cst_69 = arith.constant dense<0.000000e+00> : vector<256x128xf32>
    %92 = tpu.matmul %90, %91, %cst_69 {dimension_numbers = #tpu.dot_dimension_numbers<[1], [0], [0], [1], [0, 0, 1, 1], [], []>} : vector<256x32xbf16>, vector<32x128xbf16>, vector<256x128xf32> -> vector<256x128xf32>
    %c0_70 = arith.constant 0 : index
    %c0_71 = arith.constant 0 : index
    %93 = vector.load %arg7[%c0_70, %c0_71] : memref<1x128xf32, #tpu.memory_space<vmem>>, vector<1x128xf32>
    %94 = vector.broadcast %93 : vector<1x128xf32> to vector<256x128xf32>
    %95 = arith.addf %92, %94 : vector<256x128xf32>
    %96 = arith.addf %95, %5 : vector<256x128xf32>
    %cst_72 = arith.constant 0.000000e+00 : f32
    %97 = vector.broadcast %cst_72 : f32 to vector<256x128xf32>
    %98 = arith.maximumf %96, %97 : vector<256x128xf32>
    %99 = vector.shape_cast %98 : vector<256x128xf32> to vector<16x16x128xf32>
    %c0_73 = arith.constant 0 : index
    %c0_74 = arith.constant 0 : index
    %c0_75 = arith.constant 0 : index
    %c0_76 = arith.constant 0 : index
    %100 = vector.load %arg8[%c0_73, %c0_74, %c0_75, %c0_76] : memref<1x16x16x128xf32, #tpu.memory_space<vmem>>, vector<1x16x16x128xf32>
    %101 = vector.shape_cast %100 : vector<1x16x16x128xf32> to vector<16x16x128xf32>
    %102 = vector.shape_cast %99 : vector<16x16x128xf32> to vector<1x16x16x128xf32>
    tpu.vector_store %arg8[%c0_73, %c0_74, %c0_75, %c0_76], %102 {strides = array<i32>} : memref<1x16x16x128xf32, #tpu.memory_space<vmem>>, vector<1x16x16x128xf32>,
    return
  }
  func.func @transform_0(%arg0: i32) -> (i32, i32, i32, i32) {
    %c0_i32 = arith.constant 0 : i32
    %c0_i32_0 = arith.constant 0 : i32
    %c0_i32_1 = arith.constant 0 : i32
    %c0_i32_2 = arith.constant 0 : i32
    return %arg0, %c0_i32, %c0_i32_0, %c0_i32_1 : i32, i32, i32, i32
  }
  func.func @transform_1(%arg0: i32) -> (i32, i32) {
    %c0_i32 = arith.constant 0 : i32
    %c0_i32_0 = arith.constant 0 : i32
    %c0_i32_1 = arith.constant 0 : i32
    return %c0_i32, %c0_i32_0 : i32, i32
  }
  func.func @transform_2(%arg0: i32) -> (i32, i32) {
    %c0_i32 = arith.constant 0 : i32
    %c0_i32_0 = arith.constant 0 : i32
    %c0_i32_1 = arith.constant 0 : i32
    return %c0_i32, %c0_i32_0 : i32, i32
  }
  func.func @transform_3(%arg0: i32) -> (i32, i32, i32, i32) {
    %c0_i32 = arith.constant 0 : i32
    %c0_i32_0 = arith.constant 0 : i32
    %c0_i32_1 = arith.constant 0 : i32
    %c0_i32_2 = arith.constant 0 : i32
    %c0_i32_3 = arith.constant 0 : i32
    return %c0_i32, %c0_i32_0, %c0_i32_1, %c0_i32_2 : i32, i32, i32, i32
  }
  func.func @transform_4(%arg0: i32) -> (i32, i32) {
    %c0_i32 = arith.constant 0 : i32
    %c0_i32_0 = arith.constant 0 : i32
    %c0_i32_1 = arith.constant 0 : i32
    return %c0_i32, %c0_i32_0 : i32, i32
  }
  func.func @transform_5(%arg0: i32) -> (i32, i32) {
    %c0_i32 = arith.constant 0 : i32
    %c0_i32_0 = arith.constant 0 : i32
    %c0_i32_1 = arith.constant 0 : i32
    return %c0_i32, %c0_i32_0 : i32, i32
  }
  func.func @transform_6(%arg0: i32) -> (i32, i32) {
    %c0_i32 = arith.constant 0 : i32
    %c0_i32_0 = arith.constant 0 : i32
    %c0_i32_1 = arith.constant 0 : i32
    return %c0_i32, %c0_i32_0 : i32, i32
  }
  func.func @transform_7(%arg0: i32) -> (i32, i32, i32, i32) {
    %c0_i32 = arith.constant 0 : i32
    %c0_i32_0 = arith.constant 0 : i32
    %c0_i32_1 = arith.constant 0 : i32
    %c0_i32_2 = arith.constant 0 : i32
    return %arg0, %c0_i32, %c0_i32_0, %c0_i32_1 : i32, i32, i32, i32
  }
}

</mosaic_0001>

<bundles_post_ra>
// kernel: tpu_custom_call.1
= control target key start
LH: loop header
LB: loop body
LE: loop exit
PB: predicated region body
PF: predicated region fallthrough
CT: control target
= control target key end

     0   :  { %s7819_s0 = inlined_call_operand.hbm [shape: f32[2,16,16,128], index: 0, kind: input, shape index: {}]   ;;  %s7820_s1 = inlined_call_operand.vmem [shape: bf16[128,32], index: 1, kind: input, shape index: {}]   ;;  %s7821_s2 = inlined_call_operand.vmem [shape: f32[1,32], index: 2, kind: input, shape index: {}]   ;;  %s7822_s3 = inlined_call_operand.hbm [shape: bf16[3,3,32,32], index: 3, kind: input, shape index: {}]   ;;  %s7823_s4 = inlined_call_operand.vmem [shape: f32[1,32], index: 4, kind: input, shape index: {}]   ;;  %s7824_s5 = inlined_call_operand.vmem [shape: bf16[32,128], index: 5, kind: input, shape index: {}]   ;;  %s7825_s6 = inlined_call_operand.vmem [shape: f32[1,128], index: 6, kind: input, shape index: {}]   ;;  %s7826_s7 = inlined_call_operand.hbm [shape: f32[2,16,16,128], index: 7, kind: output, shape index: {}]  }
   0x1   :  { %7837 = sst [smem:[#allocation153_spill]] %s7822_s3 }
   0x2   :  { %12 = vsyncpa [#allocation4], 0 }
   0x3   :  { %14 = vsyncpa [#allocation4 + $0x1], 0 }
   0x4   :  { %15 = vsyncpa [#allocation7], 0 }
   0x5   :  { %16 = vsyncpa [#allocation5], 0 }
   0x6   :  { %18 = vsyncpa [#allocation5 + $0x1], 0  ;;  %s5490_s24 = smov 0   ;;  %s5492_s25 = smov 0  }
   0x7   :  { %s5494_s26 = smov 0   ;;  %s5496_s27 = smov 0  }
   0x8 LB: > { %s5511_s28 = sadd.s32 4294967295, %s5437_s27   ;;  %s4202_s29 = sadd.s32 4294967294, %s5437_s27   ;;  %s5437_s27 = sphi %s5496_s27, %s8275_s27   ;;  %s5433_s26 = sphi %s5494_s26, %s8274_s26   ;;  %s5429_s25 = sphi %s5492_s25, %s8273_s25   ;;  %s5425_s24 = sphi %s5490_s24, %s8272_s24  }
   0x9   : > { %p44_p0 = scmp.ne.s32.totalorder %s5429_s25, %s5425_s24  ;;  %p7827_p1 = scmp.eq.s32.totalorder %s5511_s28, 0 }
   0xa   : > { %p200_p3 = scmp.eq.s32.totalorder %s4202_s29, 1  ;;  %p4203_p5 = scmp.ge.s32.totalorder %s5437_s27, 1 }
   0xb   : > { %p5520_p4 = por %p7827_p1, %p44_p0  ;;  %p207_p7 = scmp.lt.s32.totalorder %s5437_s27, 3 }
   0xc   : > { %p5525_p6 = por %p200_p3, %p44_p0  ;;  %s5439_s10 = smov [#allocation6]  }
   0xd   : > { %s7838_s30 = scalar_select %p5520_p4, 1, 0 }
   0xe   : > { %s7839_s8 = scalar_select %p5525_p6, 1, 0 }
   0xf   : > { %p5531_p9 = pnand %p4203_p5, %p207_p7  ;;  %s225_s11 = sshll.u32 %s5439_s10, 4  ;;  %s226_s11 = int_to_ptr.vmem [resolvable:$true] %s225_s11 }
  0x10   : > { %s5545_s13 = sadd.s32 1, %s5437_s27   ;;  %s31_s14 = sadd.s32 1, %s5433_s26 }
  0x11   : > { %s7840_s9 = scalar_select %p5531_p9, 1, 0 }
  0x12   : > { %p5165_p10 = pneg %p5531_p9  ;;  %s28_s15 = ssub.s32 %s5437_s27, %s5545_s13 }
  0x13   : > { %s5326_s16 = scalar_lea.vmem %s226_s11, 2304  ;;  %p5334_p7 = scmp.lt.s32.totalorder %s226_s11, %s226_s11 }
  0x14   : > { %p5540_p12 = pnand %p5165_p10, %p7827_p1  ;;  %p5327_p0 = scmp.ne.s32.totalorder %s226_s11, %s5326_s16 }
  0x15   : > { %p5335_p8 = scmp.lt.s32.totalorder %s5326_s16, %s5326_s16 }
  0x16   : > { %p5317_p13 = pneg %p5540_p12 }
  0x17   : > { %p5336_p11 = por %p5335_p8, %p5334_p7 }
  0x18   : > { %p5329_p3 = pnand %p5327_p0, %p5317_p13 }
  0x1a   : > { %p5330_p5 = pneg %p5329_p3 }
  0x1c   : > { %p5337_p2 = pnand %p5336_p11, %p5330_p5 }
  0x1e   : > { %5340 = shalt.err (!%p5337_p2)
}
  0x1f   : > { %s5440_s17 = smov 64   ;;  %s5441_s18 = smov 4  }
  0x20   : > { %s7842_s3 = sld [smem:[#allocation153_spill]]  ;;  %p29_p10 = scmp.eq.s32.totalorder %s28_s15, 0 }
  0x21   : > { %p38_p8 = scmp.ne.s32.totalorder %s5433_s26, %s5429_s25  ;;  %p39_p11 = scmp.eq.s32.totalorder %s5437_s27, 0 }
  0x22   : > { %p5178_p2 = scmp.lt.s32.totalorder %s5437_s27, 2  ;;  %p7843_p0 = scmp.eq.s32.totalorder %s5511_s28, 1 }
  0x23   : > { %s5562_s21 = scalar_select %p29_p10, %s5433_s26, %s31_s14  }
  0x24   : > { %p40_p13 = por %p39_p11, %p38_p8  ;;  %p5566_p3 = por %p7843_p0, %p38_p8 }
  0x25   : > { %s248_s23 = sand.u32 1, %s5433_s26   ;;  %s4507_s29 = sshll.u32 %s5437_s27, 12 }
  0x26   : > { %5168 = dma.hbm_to_vmem [thread:$0]  (!%p5540_p12), %s7842_s3, 2304, %s226_s11, [#allocation7], %s5440_s17, %s5440_s17, %s5441_s18  }
  0x27   : > { %s7844_s22 = scalar_select %p5566_p3, 1, 0 }
  0x28   : > { %s4206_s10 = sshll.u32 %s248_s23, 8  ;;  %s5575_s19 = scalar_lea.hbm %s7819_s0, %s4507_s29 }
  0x29   : > { %s252_s11 = scalar_lea.vmem [#allocation3], %s4206_s10  ;;  %p5577_p12 = pnand %p5178_p2, %p40_p13 }
  0x2a   : > { %s259_s14 = sshll.u32 %s252_s11, 4  ;;  %s5583_s17 = scalar_lea.sflag [#allocation4], %s248_s23  ;;  %s5581_s14 = int_to_ptr.vmem [resolvable:$true] %s259_s14 }
  0x2b   : > { %s5341_s18 = scalar_lea.hbm %s5575_s19, 4096  ;;  %p5343_p7 = pneg %p5577_p12 }
  0x2c   : > { %p5342_p5 = scmp.ne.s32.totalorder %s5575_s19, %s5341_s18  ;;  %s5346_s10 = scalar_lea.hbm %s7819_s0, 8192 }
  0x2d   : > { %p5347_p11 = scmp.lt.s32.totalorder %s5575_s19, %s7819_s0  ;;  %p5348_p2 = scmp.lt.s32.totalorder %s5346_s10, %s5341_s18 }
  0x2e   : > { %p5344_p10 = pnand %p5343_p7, %p5342_p5 }
  0x2f   : > { %p5349_p13 = por %p5348_p2, %p5347_p11 }
  0x30   : > { %p5345_p8 = pneg %p5344_p10 }
  0x32   : > { %p5350_p0 = pnand %p5349_p13, %p5345_p8 }
  0x34   : > { %5353 = shalt.err (!%p5350_p0)
}
  0x35   : > { %s5354_s23 = scalar_lea.vmem %s5581_s14, 4096  ;;  %s5442_s11 = smov [#allocation3]  }
  0x36   : > { %p5355_p1 = scmp.ne.s32.totalorder %s5581_s14, %s5354_s23  ;;  %s5359_s3 = sshll.u32 %s5442_s11, 4  ;;  %s5360_s3 = int_to_ptr.vmem [resolvable:$false] %s5359_s3 }
  0x37   : > { %s5361_s20 = scalar_lea.vmem %s5360_s3, 8192  ;;  %p5362_p10 = scmp.lt.s32.totalorder %s5581_s14, %s5360_s3 }
  0x38   : > { %p5357_p6 = pnand %p5355_p1, %p5343_p7  ;;  %p5363_p3 = scmp.lt.s32.totalorder %s5361_s20, %s5354_s23 }
  0x3a   : > { %p5358_p5 = pneg %p5357_p6  ;;  %p5364_p4 = por %p5363_p3, %p5362_p10 }
  0x3c   : > { %p5365_p9 = pnand %p5364_p4, %p5358_p5 }
  0x3e   : > { %5368 = shalt.err (!%p5365_p9)
}
  0x3f   : > { %s5443_s18 = smov 128   ;;  %s5444_s29 = smov 8  }
  0x40   : > { %5172 = dma.hbm_to_vmem [thread:$0]  (!%p5577_p12), %s5575_s19, 4096, %s5581_s14, %s5583_s17, %s5443_s18, %s5443_s18, %s5444_s29  }
  0x41   : > { %p7846_p1 = scmp.ne.s32.totalorder %s7840_s9, 0 }
  0x43   : > { %271 = sbr.rel (%p7846_p1) target bundleno = 1093 (0x445), region = 48 }
  0x48   : > { %s5607_s10 = sand.u32 1, %s5429_s25   ;;  %p7847_p4 = scmp.ne.s32.totalorder %s7838_s30, 0 }
  0x49   : > { %s4210_s3 = sshll.u32 %s5607_s10, 8  ;;  %s274_s12 = scalar_lea.sflag [#allocation4], %s5607_s10 }
  0x4a   : > { %s5611_s16 = scalar_lea.vmem [#allocation3], %s4210_s3 }
  0x4b   : > { %5412 = dma.done.wait (%p7847_p4), %s274_s12, 4096  }
  0x4c   : > { %5414 = vsyncadd (%p7847_p4), %s274_s12, 4294963200  ;;  %p7848_p6 = scmp.eq.s32.totalorder %s5511_s28, 0 }
  0x4e   : > { %5416 = dma.done.wait (%p7848_p6), [#allocation7], 2304   ;;  %p7849_p9 = pmov %p7848_p6 }
  0x4f   : > { %s5621_s9 = scalar_lea.vmem [#allocation8], %s4210_s3  ;;  %p7850_p3 = scmp.ne.s32.totalorder %s5511_s28, 0 }
  0x50   : > { %5418 = vsyncadd (%p7849_p9), [#allocation7], 4294964992 }
  0x51   : > { %316 = sbr.rel (%p7850_p3) target bundleno = 89 (0x59), region = 60 }
  0x56   : > { %vm317_vm0 = vcmask 257024   ;;  %v5445_v0 = vmov 0  }
  0x57   : > { %318 = vst.msk [vmem:[#allocation2] sm:$0xf] %vm317_vm0, %v5445_v0  ;;  %319 = vst.msk [vmem:[#allocation2 + $0x4] sm:$0xf] %vm317_vm0, %v5445_v0 }
  0x58   : > { %320 = vst.msk [vmem:[#allocation2 + $0x88] sm:$0xf] %vm317_vm0, %v5445_v0  ;;  %321 = vst.msk [vmem:[#allocation2 + $0x8c] sm:$0xf] %vm317_vm0, %v5445_v0 }
  0x59 PF: > { %v5222_v1 = vld [vmem:[%s7820_s1 + $0x38] sm:$0xff]   ;;  %v5223_v2 = vld [vmem:[%s7820_s1 + $0x30] sm:$0xff]   ;;  %v5224_v3 = vld [vmem:[%s7820_s1 + $0x28] sm:$0xff]   ;;  %vm762_vm1 = vcmask 257024   ;;  %vm940_vm2 = vcmask 261120   ;;  %s4540_s14 = sshll.u32 %s5511_s28, 12 }
  0x5a   : > { %4745 = vmatprep.subr.bf16.mxu0 %v5222_v1  ;;  %v5225_v4 = vld [vmem:[%s7820_s1 + $0x20] sm:$0xff]   ;;  %v322_v5 = vld [vmem:[%s5611_s16] sm:$0xff]  ;;  %v323_v6 = vld [vmem:[%s5611_s16 + $0x8] sm:$0xff]  ;;  %s4119_s15 = sshll.u32 %s5621_s9, 4  ;;  %s7772_s11 = scalar_lea.hbm %s7826_s7, %s4540_s14  ;;  %s7774_s15 = int_to_ptr.vmem [resolvable:$true] %s4119_s15 }
  0x5b   : > { %4746 = vmatpush3.bf16.msra.mxu0 %v5222_v1  ;;  %v354_v7 = vpack.c.bf16 %v323_v6, %v322_v5  ;;  %v5226_v8 = vld [vmem:[%s7820_s1 + $0x18] sm:$0xff]   ;;  %v5227_v9 = vld [vmem:[%s7820_s1 + $0x10] sm:$0xff]   ;;  %v5228_v10 = vld [vmem:[%s7820_s1 + $0x8] sm:$0xff]   ;;  %s4106_s20 = scalar_lea.sflag [#allocation5], %s5607_s10  ;;  %s5369_s28 = scalar_lea.vmem %s7774_s15, 4096 }
  0x5c   : > { %4747 = vmatprep.subr.bf16.mxu0 %v5223_v2  ;;  %v5229_v11 = vld [vmem:[%s7820_s1] sm:$0xff]   ;;  %v325_v13 = vld [vmem:[%s5611_s16 + $0x18] sm:$0xff]  ;;  %v326_v14 = vld [vmem:[%s5611_s16 + $0x20] sm:$0xff]  ;;  %p5370_p12 = scmp.ne.s32.totalorder %s7774_s15, %s5369_s28  ;;  %p8269_p7 = scmp.ne.s32.totalorder %s7844_s22, 0 }
  0x5d   : > { %4761 = vmatprep.mubr.bf16.mxu0 %v354_v7  ;;  %v324_v12 = vld [vmem:[%s5611_s16 + $0x10] sm:$0xff]  ;;  %v327_v15 = vld [vmem:[%s5611_s16 + $0x28] sm:$0xff]  ;;  %v329_v19 = vld [vmem:[%s5611_s16 + $0x38] sm:$0xff] }
  0x5e   : > { %v355_v16 = vpack.c.bf16 %v325_v13, %v324_v12  ;;  %v356_v17 = vpack.c.bf16 %v327_v15, %v326_v14  ;;  %v328_v18 = vld [vmem:[%s5611_s16 + $0x30] sm:$0xff]  ;;  %v330_v20 = vld [vmem:[%s5611_s16 + $0x40] sm:$0xff]  ;;  %v331_v21 = vld [vmem:[%s5611_s16 + $0x48] sm:$0xff]  ;;  %p5371_p8 = pnand %p5370_p12, %p8269_p7 }
  0x5f   : > { %4748 = vmatpush3.bf16.msra.mxu0 %v5223_v2  ;;  %v357_v22 = vpack.c.bf16 %v329_v19, %v328_v18  ;;  %v358_v23 = vpack.c.bf16 %v331_v21, %v330_v20  ;;  %v332_v24 = vld [vmem:[%s5611_s16 + $0x50] sm:$0xff]  ;;  %v333_v25 = vld [vmem:[%s5611_s16 + $0x58] sm:$0xff]  ;;  %v334_v26 = vld [vmem:[%s5611_s16 + $0x60] sm:$0xff] }
  0x60   : > { %4749 = vmatprep.subr.bf16.mxu0 %v5224_v3  ;;  %v335_v27 = vld [vmem:[%s5611_s16 + $0x68] sm:$0xff]  ;;  %v359_v28 = vpack.c.bf16 %v333_v25, %v332_v24  ;;  %v336_v30 = vld [vmem:[%s5611_s16 + $0x70] sm:$0xff]  ;;  %v337_v31 = vld [vmem:[%s5611_s16 + $0x78] sm:$0xff]  ;;  %p5372_p11 = pneg %p5371_p8 }
  0x61   : > { %v360_v29 = vpack.c.bf16 %v335_v27, %v334_v26  ;;  %v338_v32 = vld [vmem:[%s5611_s16 + $0x80] sm:$0xff]  ;;  %v339_v33 = vld [vmem:[%s5611_s16 + $0x88] sm:$0xff]  ;;  %v361_v34 = vpack.c.bf16 %v337_v31, %v336_v30  ;;  %v340_v36 = vld [vmem:[%s5611_s16 + $0x90] sm:$0xff] }
  0x62   : > { %v362_v35 = vpack.c.bf16 %v339_v33, %v338_v32  ;;  %v341_v37 = vld [vmem:[%s5611_s16 + $0x98] sm:$0xff]  ;;  %v342_v38 = vld [vmem:[%s5611_s16 + $0xa0] sm:$0xff]  ;;  %v343_v39 = vld [vmem:[%s5611_s16 + $0xa8] sm:$0xff] }
  0x63   : > { %4750 = vmatpush3.bf16.msra.mxu0 %v5224_v3  ;;  %v363_v40 = vpack.c.bf16 %v341_v37, %v340_v36  ;;  %v364_v41 = vpack.c.bf16 %v343_v39, %v342_v38  ;;  %v344_v42 = vld [vmem:[%s5611_s16 + $0xb0] sm:$0xff]  ;;  %v345_v43 = vld [vmem:[%s5611_s16 + $0xb8] sm:$0xff]  ;;  %v346_v44 = vld [vmem:[%s5611_s16 + $0xc0] sm:$0xff] }
  0x64   : > { %4751 = vmatprep.subr.bf16.mxu0 %v5225_v4  ;;  %v347_v45 = vld [vmem:[%s5611_s16 + $0xc8] sm:$0xff]  ;;  %v365_v46 = vpack.c.bf16 %v345_v43, %v344_v42  ;;  %v348_v48 = vld [vmem:[%s5611_s16 + $0xd0] sm:$0xff]  ;;  %v349_v49 = vld [vmem:[%s5611_s16 + $0xd8] sm:$0xff] }
  0x65   : > { %v366_v47 = vpack.c.bf16 %v347_v45, %v346_v44  ;;  %v350_v50 = vld [vmem:[%s5611_s16 + $0xe0] sm:$0xff]  ;;  %v351_v51 = vld [vmem:[%s5611_s16 + $0xe8] sm:$0xff]  ;;  %v367_v52 = vpack.c.bf16 %v349_v49, %v348_v48  ;;  %v352_v54 = vld [vmem:[%s5611_s16 + $0xf0] sm:$0xff] }
  0x66   : > { %v368_v53 = vpack.c.bf16 %v351_v51, %v350_v50  ;;  %v353_v55 = vld [vmem:[%s5611_s16 + $0xf8] sm:$0xff]  ;;  %v5231_v58 = vld [vmem:[#allocation6 + $0x30] sm:$0xff]   ;;  %v5681_v59 = vld [vmem:[#allocation6 + $0x48] sm:$0xff]  }
  0x67   : > { %4752 = vmatpush3.bf16.msra.mxu0 %v5225_v4  ;;  %v369_v56 = vpack.c.bf16 %v353_v55, %v352_v54  ;;  %v5230_v57 = vld [vmem:[#allocation6 + $0x38] sm:$0xff]   ;;  %v5684_v60 = vld [vmem:[#allocation6 + $0x8] sm:$0xff]   ;;  %v5690_v61 = vld [vmem:[%s7821_s2] ss:$0 sm:$0xff] }
  0x68   : > { %4753 = vmatprep.subr.bf16.mxu0 %v5226_v8  ;;  %5153 = vmatprep.subr.bf16.mxu1 %v5230_v57  ;;  %v5252_v50 = vld [vmem:[#allocation6 + $0x58] sm:$0xff]  }
  0x69   : > { %5155 = vmatpush3.bf16.msra.mxu1 %v5230_v57 }
  0x6a   : > { %5154 = vmatprep.subr.bf16.mxu1 %v5231_v58 }
  0x6b   : > { %4754 = vmatpush3.bf16.msra.mxu0 %v5226_v8 }
  0x6c   : > { %4755 = vmatprep.subr.bf16.mxu0 %v5227_v9 }
  0x6d   : > { %5156 = vmatpush3.bf16.msra.mxu1 %v5231_v58 }
  0x6e   : > { %4829 = vmatprep.subr.bf16.mxu1 %v5684_v60 }
  0x6f   : > { %4756 = vmatpush3.bf16.msra.mxu0 %v5227_v9 }
  0x70   : > { %4757 = vmatprep.subr.bf16.mxu0 %v5228_v10 }
  0x73   : > { %4758 = vmatpush3.bf16.msra.mxu0 %v5228_v10 }
  0x74   : > { %4759 = vmatprep.subr.bf16.mxu0 %v5229_v11 }
  0x77   : > { %4760 = vmatpush3.bf16.msra.mxu0 %v5229_v11 }
  0x78   : > { %4793 = vmatprep.subr.bf16.mxu0 %v5230_v57 }
  0x7a   : > { %4762 = vmatmul.mubr.bf16.vlgmr.msra.gmra.mxu0 %v355_v16 }
  0x7b   : > { %4765 = vmatprep.mubr.bf16.mxu0 %v356_v17  ;;  %4794 = vmatpush3.bf16.msra.mxu0 %v5230_v57 }
  0x7c   : > { %4795 = vmatprep.subr.bf16.mxu0 %v5231_v58 }
  0x7f   : > { %4796 = vmatpush3.bf16.msra.mxu0 %v5231_v58 }
  0x80   : > { %4865 = vmatprep.subr.bf16.mxu0 %v5681_v59 }
  0x82   : > { %4766 = vmatmul.mubr.bf16.gmra.mxu0 %v357_v22 }
  0x83   : > { %4769 = vmatprep.mubr.bf16.mxu0 %v358_v23 }
  0x8a   : > { %4770 = vmatmul.mubr.bf16.gmra.mxu0 %v359_v28 }
  0x8b   : > { %4773 = vmatprep.mubr.bf16.mxu0 %v360_v29 }
  0x92   : > { %4774 = vmatmul.mubr.bf16.gmra.mxu0 %v361_v34 }
  0x93   : > { %4777 = vmatprep.mubr.bf16.mxu0 %v362_v35 }
  0x9a   : > { %4778 = vmatmul.mubr.bf16.gmra.mxu0 %v363_v40 }
  0x9b   : > { %4781 = vmatprep.mubr.bf16.mxu0 %v364_v41  ;;  %v5237_v41 = vld [vmem:[#allocation6 + $0x40] sm:$0xff]  }
  0xa2   : > { %4782 = vmatmul.mubr.bf16.gmra.mxu0 %v365_v46 }
  0xa3   : > { %4785 = vmatprep.mubr.bf16.mxu0 %v366_v47 }
  0xaa   : > { %4786 = vmatmul.mubr.bf16.gmra.mxu0 %v367_v52 }
  0xab   : > { %4789 = vmatprep.mubr.bf16.mxu0 %v368_v53 }
  0xb2   : > { %4790 = vmatmul.mubr.bf16.gmra.mxu0 %v369_v56 }
 0x13a   : > { %v4763_v62 = vpop.f32.mrf.mxu0 }
 0x13b   : > { %v484_v63 = vadd.f32 %v4763_v62, %v5690_v61 }
 0x13c   : > { %v475_v0 = vpop.f32.mrf.mxu0 }
 0x13d   : > { %v604_v1 = vmax.f32 %v484_v63, 0.0  ;;  %v476_v2 = vadd.f32 %v5690_v61, %v475_v0 }
 0x13e   : > { %v4764_v3 = vpop.f32.mrf.mxu0 }
 0x13f   : > { %v4510_v4 = vpack.c.bf16 %v604_v1, %v604_v1  ;;  %v602_v5 = vmax.f32 %v476_v2, 0.0  ;;  %v487_v6 = vadd.f32 %v4764_v3, %v5690_v61 }
 0x140   : > { %v478_v7 = vpop.f32.mrf.mxu0 }
 0x141   : > { %765 = vst.msk [vmem:[#allocation2 + $0x10] sm:$0xf] %vm762_vm1, %v4510_v4  ;;  %v4508_v8 = vpack.c.bf16 %v602_v5, %v602_v5  ;;  %v605_v9 = vmax.f32 %v487_v6, 0.0  ;;  %v479_v10 = vadd.f32 %v5690_v61, %v478_v7 }
 0x142   : > { %v4767_v11 = vpop.f32.mrf.mxu0 }
 0x143   : > { %763 = vst.msk [vmem:[#allocation2 + $0x8] sm:$0xf] %vm762_vm1, %v4508_v8  ;;  %v4511_v12 = vpack.c.bf16 %v605_v9, %v605_v9  ;;  %v603_v13 = vmax.f32 %v479_v10, 0.0  ;;  %v500_v14 = vadd.f32 %v4767_v11, %v5690_v61 }
 0x144   : > { %v491_v15 = vpop.f32.mrf.mxu0 }
 0x145   : > { %766 = vst.msk [vmem:[#allocation2 + $0x14] sm:$0xf] %vm762_vm1, %v4511_v12  ;;  %v4509_v16 = vpack.c.bf16 %v603_v13, %v603_v13  ;;  %v608_v17 = vmax.f32 %v500_v14, 0.0  ;;  %v492_v18 = vadd.f32 %v5690_v61, %v491_v15 }
 0x146   : > { %v4768_v19 = vpop.f32.mrf.mxu0 }
 0x147   : > { %764 = vst.msk [vmem:[#allocation2 + $0xc] sm:$0xf] %vm762_vm1, %v4509_v16  ;;  %v4514_v20 = vpack.c.bf16 %v608_v17, %v608_v17  ;;  %v606_v21 = vmax.f32 %v492_v18, 0.0  ;;  %v503_v22 = vadd.f32 %v4768_v19, %v5690_v61  ;;  %v5246_v17 = vld [vmem:[#allocation6] sm:$0xff]   ;;  %v5255_v19 = vld [vmem:[#allocation6 + $0x50] sm:$0xff]  }
 0x148   : > { %v494_v23 = vpop.f32.mrf.mxu0 }
 0x149   : > { %769 = vst.msk [vmem:[#allocation2 + $0x20] sm:$0xf] %vm762_vm1, %v4514_v20  ;;  %v4512_v24 = vpack.c.bf16 %v606_v21, %v606_v21  ;;  %v609_v25 = vmax.f32 %v503_v22, 0.0  ;;  %v495_v26 = vadd.f32 %v5690_v61, %v494_v23 }
 0x14a   : > { %v4771_v27 = vpop.f32.mrf.mxu0 }
 0x14b   : > { %767 = vst.msk [vmem:[#allocation2 + $0x18] sm:$0xf] %vm762_vm1, %v4512_v24  ;;  %v4515_v28 = vpack.c.bf16 %v609_v25, %v609_v25  ;;  %v607_v29 = vmax.f32 %v495_v26, 0.0  ;;  %v516_v30 = vadd.f32 %v4771_v27, %v5690_v61  ;;  %v5763_v27 = vld [vmem:[#allocation6 + $0x18] sm:$0xff]  }
 0x14c   : > { %v507_v31 = vpop.f32.mrf.mxu0  ;;  %v5713_v40 = vld [vmem:[#allocation2 + $0x10] sm:$0xff]  }
 0x14d   : > { %770 = vst.msk [vmem:[#allocation2 + $0x24] sm:$0xf] %vm762_vm1, %v4515_v28  ;;  %v4513_v32 = vpack.c.bf16 %v607_v29, %v607_v29  ;;  %v612_v33 = vmax.f32 %v516_v30, 0.0  ;;  %v508_v34 = vadd.f32 %v5690_v61, %v507_v31  ;;  %v5765_v29 = vld [vmem:[#allocation6 + $0x68] sm:$0xff]  }
 0x14e   : > { %v4772_v35 = vpop.f32.mrf.mxu0  ;;  %v5709_v36 = vld [vmem:[#allocation2 + $0x8] sm:$0xff]  }
 0x14f   : > { %768 = vst.msk [vmem:[#allocation2 + $0x1c] sm:$0xf] %vm762_vm1, %v4513_v32  ;;  %v4518_v37 = vpack.c.bf16 %v612_v33, %v612_v33  ;;  %v610_v38 = vmax.f32 %v508_v34, 0.0  ;;  %v519_v39 = vadd.f32 %v4772_v35, %v5690_v61  ;;  %4797 = vmatprep.mubr.msk.bf16.mxu0 %vm940_vm2, %v5709_v36 }
 0x150   : > { %v510_v42 = vpop.f32.mrf.mxu0  ;;  %4798 = vmatmul.mubr.msk.bf16.vlgmr.msra.gmra.mxu0 %vm940_vm2, %v5713_v40 }
 0x151   : > { %773 = vst.msk [vmem:[#allocation2 + $0x30] sm:$0xf] %vm762_vm1, %v4518_v37  ;;  %v4516_v43 = vpack.c.bf16 %v610_v38, %v610_v38  ;;  %v613_v44 = vmax.f32 %v519_v39, 0.0  ;;  %v511_v45 = vadd.f32 %v5690_v61, %v510_v42  ;;  %4866 = vmatpush3.bf16.msra.mxu0 %v5681_v59 }
 0x152   : > { %v4775_v46 = vpop.f32.mrf.mxu0  ;;  %4867 = vmatprep.subr.bf16.mxu0 %v5237_v41 }
 0x153   : > { %771 = vst.msk [vmem:[#allocation2 + $0x28] sm:$0xf] %vm762_vm1, %v4516_v43  ;;  %v4519_v47 = vpack.c.bf16 %v613_v44, %v613_v44  ;;  %v611_v48 = vmax.f32 %v511_v45, 0.0  ;;  %v532_v49 = vadd.f32 %v4775_v46, %v5690_v61 }
 0x154   : > { %v523_v51 = vpop.f32.mrf.mxu0  ;;  %v5730_v62 = vld [vmem:[#allocation2 + $0x20] sm:$0xff]  }
 0x155   : > { %774 = vst.msk [vmem:[#allocation2 + $0x34] sm:$0xf] %vm762_vm1, %v4519_v47  ;;  %v4517_v52 = vpack.c.bf16 %v611_v48, %v611_v48  ;;  %v616_v53 = vmax.f32 %v532_v49, 0.0  ;;  %v524_v54 = vadd.f32 %v5690_v61, %v523_v51  ;;  %4868 = vmatpush3.bf16.msra.mxu0 %v5237_v41 }
 0x156   : > { %v4776_v55 = vpop.f32.mrf.mxu0  ;;  %v5726_v56 = vld [vmem:[#allocation2 + $0x18] sm:$0xff]   ;;  %4937 = vmatprep.subr.bf16.mxu0 %v5252_v50 }
 0x157   : > { %772 = vst.msk [vmem:[#allocation2 + $0x2c] sm:$0xf] %vm762_vm1, %v4517_v52  ;;  %v4522_v57 = vpack.c.bf16 %v616_v53, %v616_v53  ;;  %v614_v58 = vmax.f32 %v524_v54, 0.0  ;;  %v535_v59 = vadd.f32 %v4776_v55, %v5690_v61  ;;  %4801 = vmatprep.mubr.msk.bf16.mxu0 %vm940_vm2, %v5726_v56 }
 0x158   : > { %v526_v63 = vpop.f32.mrf.mxu0  ;;  %4802 = vmatmul.mubr.msk.bf16.gmra.mxu0 %vm940_vm2, %v5730_v62 }
 0x159   : > { %777 = vst.msk [vmem:[#allocation2 + $0x40] sm:$0xf] %vm762_vm1, %v4522_v57  ;;  %v4520_v0 = vpack.c.bf16 %v614_v58, %v614_v58  ;;  %v617_v1 = vmax.f32 %v535_v59, 0.0  ;;  %v527_v2 = vadd.f32 %v5690_v61, %v526_v63  ;;  %4869 = vmatprep.mubr.msk.bf16.mxu0 %vm940_vm2, %v5709_v36 }
 0x15a   : > { %v4779_v3 = vpop.f32.mrf.mxu0 }
 0x15b   : > { %775 = vst.msk [vmem:[#allocation2 + $0x38] sm:$0xf] %vm762_vm1, %v4520_v0  ;;  %v4523_v4 = vpack.c.bf16 %v617_v1, %v617_v1  ;;  %v615_v5 = vmax.f32 %v527_v2, 0.0  ;;  %v548_v6 = vadd.f32 %v4779_v3, %v5690_v61 }
 0x15c   : > { %v539_v7 = vpop.f32.mrf.mxu0  ;;  %v5748_v16 = vld [vmem:[#allocation2 + $0x30] sm:$0xff]  }
 0x15d   : > { %778 = vst.msk [vmem:[#allocation2 + $0x44] sm:$0xf] %vm762_vm1, %v4523_v4  ;;  %v4521_v8 = vpack.c.bf16 %v615_v5, %v615_v5  ;;  %v620_v9 = vmax.f32 %v548_v6, 0.0  ;;  %v540_v10 = vadd.f32 %v5690_v61, %v539_v7 }
 0x15e   : > { %v4780_v11 = vpop.f32.mrf.mxu0  ;;  %v5744_v12 = vld [vmem:[#allocation2 + $0x28] sm:$0xff]  }
 0x15f   : > { %776 = vst.msk [vmem:[#allocation2 + $0x3c] sm:$0xf] %vm762_vm1, %v4521_v8  ;;  %v4526_v13 = vpack.c.bf16 %v620_v9, %v620_v9  ;;  %v618_v14 = vmax.f32 %v540_v10, 0.0  ;;  %v551_v15 = vadd.f32 %v4780_v11, %v5690_v61  ;;  %4805 = vmatprep.mubr.msk.bf16.mxu1 %vm940_vm2, %v5744_v12 }
 0x160   : > { %v542_v18 = vpop.f32.mrf.mxu0  ;;  %4806 = vmatmul.mubr.msk.bf16.vlgmr.msra.gmra.mxu1 %vm940_vm2, %v5748_v16  ;;  %4870 = vmatmul.mubr.msk.bf16.vlgmr.msra.gmra.mxu0 %vm940_vm2, %v5713_v40 }
 0x161   : > { %781 = vst.msk [vmem:[#allocation2 + $0x50] sm:$0xf] %vm762_vm1, %v4526_v13  ;;  %v4524_v20 = vpack.c.bf16 %v618_v14, %v618_v14  ;;  %v621_v21 = vmax.f32 %v551_v15, 0.0  ;;  %v543_v22 = vadd.f32 %v5690_v61, %v542_v18  ;;  %4830 = vmatpush3.bf16.msra.mxu1 %v5684_v60  ;;  %4873 = vmatprep.mubr.msk.bf16.mxu0 %vm940_vm2, %v5726_v56 }
 0x162   : > { %v4783_v23 = vpop.f32.mrf.mxu0  ;;  %4831 = vmatprep.subr.bf16.mxu1 %v5246_v17  ;;  %4938 = vmatpush3.bf16.msra.mxu0 %v5252_v50 }
 0x163   : > { %779 = vst.msk [vmem:[#allocation2 + $0x48] sm:$0xf] %vm762_vm1, %v4524_v20  ;;  %v4527_v24 = vpack.c.bf16 %v621_v21, %v621_v21  ;;  %v619_v25 = vmax.f32 %v543_v22, 0.0  ;;  %v564_v26 = vadd.f32 %v4783_v23, %v5690_v61  ;;  %4939 = vmatprep.subr.bf16.mxu0 %v5255_v19 }
 0x164   : > { %v555_v28 = vpop.f32.mrf.mxu0  ;;  %v5773_v38 = vld [vmem:[#allocation2 + $0x40] sm:$0xff]  }
 0x165   : > { %782 = vst.msk [vmem:[#allocation2 + $0x54] sm:$0xf] %vm762_vm1, %v4527_v24  ;;  %v4525_v60 = vpack.c.bf16 %v619_v25, %v619_v25  ;;  %v624_v30 = vmax.f32 %v564_v26, 0.0  ;;  %v556_v31 = vadd.f32 %v5690_v61, %v555_v28  ;;  %4832 = vmatpush3.bf16.msra.mxu1 %v5246_v17  ;;  %v5842_v26 = vld [vmem:[#allocation2] sm:$0xff]  }
 0x166   : > { %v4784_v32 = vpop.f32.mrf.mxu0  ;;  %v5769_v33 = vld [vmem:[#allocation2 + $0x38] sm:$0xff]   ;;  %4901 = vmatprep.subr.bf16.mxu1 %v5763_v27  ;;  %4940 = vmatpush3.bf16.msra.mxu0 %v5255_v19 }
 0x167   : > { %780 = vst.msk [vmem:[#allocation2 + $0x4c] sm:$0xf] %vm762_vm1, %v4525_v60  ;;  %v4530_v34 = vpack.c.bf16 %v624_v30, %v624_v30  ;;  %v622_v35 = vmax.f32 %v556_v31, 0.0  ;;  %v567_v37 = vadd.f32 %v4784_v32, %v5690_v61  ;;  %4809 = vmatprep.mubr.msk.bf16.mxu1 %vm940_vm2, %v5769_v33  ;;  %5009 = vmatprep.subr.bf16.mxu0 %v5765_v29  ;;  %v5256_v30 = vld [vmem:[#allocation6 + $0x10] sm:$0xff]   ;;  %v5258_v31 = vld [vmem:[#allocation6 + $0x28] sm:$0xff]  }
 0x168   : > { %v558_v39 = vpop.f32.mrf.mxu0  ;;  %4810 = vmatmul.mubr.msk.bf16.gmra.mxu1 %vm940_vm2, %v5773_v38  ;;  %4874 = vmatmul.mubr.msk.bf16.gmra.mxu0 %vm940_vm2, %v5730_v62  ;;  %v5274_v32 = vld [vmem:[#allocation6 + $0x88] sm:$0xff]  }
 0x169   : > { %785 = vst.msk [vmem:[#allocation2 + $0x60] sm:$0xf] %vm762_vm1, %v4530_v34  ;;  %v4528_v41 = vpack.c.bf16 %v622_v35, %v622_v35  ;;  %v625_v42 = vmax.f32 %v567_v37, 0.0  ;;  %v559_v43 = vadd.f32 %v5690_v61, %v558_v39  ;;  %4877 = vmatprep.mubr.msk.bf16.mxu0 %vm940_vm2, %v5744_v12  ;;  %v5275_v34 = vld [vmem:[#allocation6 + $0x78] sm:$0xff]   ;;  %v5928_v35 = vld [vmem:[#allocation2 + $0x10] sm:$0xff]   ;;  %v5937_v37 = vld [vmem:[#allocation2 + $0x18] sm:$0xff]  }
 0x16a   : > { %v4787_v44 = vpop.f32.mrf.mxu0  ;;  %v5939_v39 = vld [vmem:[#allocation2 + $0x20] sm:$0xff]  }
 0x16b   : > { %783 = vst.msk [vmem:[#allocation2 + $0x58] sm:$0xf] %vm762_vm1, %v4528_v41  ;;  %v4531_v45 = vpack.c.bf16 %v625_v42, %v625_v42  ;;  %v623_v46 = vmax.f32 %v559_v43, 0.0  ;;  %v580_v47 = vadd.f32 %v4787_v44, %v5690_v61  ;;  %v5279_v41 = vld [vmem:[#allocation6 + $0x80] sm:$0xff]   ;;  %v5949_v42 = vld [vmem:[#allocation2 + $0x28] sm:$0xff]   ;;  %v5961_v44 = vld [vmem:[#allocation2 + $0x38] sm:$0xff]  }
 0x16c   : > { %v571_v48 = vpop.f32.mrf.mxu0  ;;  %v5795_v58 = vld [vmem:[#allocation2 + $0x50] sm:$0xff]  }
 0x16d   : > { %786 = vst.msk [vmem:[#allocation2 + $0x64] sm:$0xf] %vm762_vm1, %v4531_v45  ;;  %v4529_v49 = vpack.c.bf16 %v623_v46, %v623_v46  ;;  %v628_v50 = vmax.f32 %v580_v47, 0.0  ;;  %v572_v51 = vadd.f32 %v5690_v61, %v571_v48  ;;  %v5951_v43 = vld [vmem:[#allocation2 + $0x30] sm:$0xff]   ;;  %v5963_v45 = vld [vmem:[#allocation2 + $0x40] sm:$0xff]  }
 0x16e   : > { %v4788_v52 = vpop.f32.mrf.mxu0  ;;  %v5791_v53 = vld [vmem:[#allocation2 + $0x48] sm:$0xff]   ;;  %v5975_v47 = vld [vmem:[#allocation2 + $0x50] sm:$0xff]  }
 0x16f   : > { %784 = vst.msk [vmem:[#allocation2 + $0x5c] sm:$0xf] %vm762_vm1, %v4529_v49  ;;  %v4534_v54 = vpack.c.bf16 %v628_v50, %v628_v50  ;;  %v626_v55 = vmax.f32 %v572_v51, 0.0  ;;  %v583_v57 = vadd.f32 %v4788_v52, %v5690_v61  ;;  %4813 = vmatprep.mubr.msk.bf16.mxu1 %vm940_vm2, %v5791_v53  ;;  %v5973_v46 = vld [vmem:[#allocation2 + $0x48] sm:$0xff]  }
 0x170   : > { %v574_v59 = vpop.f32.mrf.mxu0  ;;  %4814 = vmatmul.mubr.msk.bf16.gmra.mxu1 %vm940_vm2, %v5795_v58  ;;  %4878 = vmatmul.mubr.msk.bf16.gmra.mxu0 %vm940_vm2, %v5748_v16 }
 0x171   : > { %789 = vst.msk [vmem:[#allocation2 + $0x70] sm:$0xf] %vm762_vm1, %v4534_v54  ;;  %v4532_v63 = vpack.c.bf16 %v626_v55, %v626_v55  ;;  %v629_v0 = vmax.f32 %v583_v57, 0.0  ;;  %v575_v1 = vadd.f32 %v5690_v61, %v574_v59  ;;  %4881 = vmatprep.mubr.msk.bf16.mxu0 %vm940_vm2, %v5769_v33  ;;  %v5280_v54 = vld [vmem:[#allocation6 + $0x70] sm:$0xff]  }
 0x172   : > { %v4791_v2 = vpop.f32.mrf.mxu0 }
 0x173   : > { %787 = vst.msk [vmem:[#allocation2 + $0x68] sm:$0xf] %vm762_vm1, %v4532_v63  ;;  %v4535_v3 = vpack.c.bf16 %v629_v0, %v629_v0  ;;  %v627_v4 = vmax.f32 %v575_v1, 0.0  ;;  %v596_v5 = vadd.f32 %v4791_v2, %v5690_v61  ;;  %v6027_v0 = vld [vmem:[#allocation2 + $0x88] sm:$0xff]  }
 0x174   : > { %v587_v6 = vpop.f32.mrf.mxu0  ;;  %v5815_v17 = vld [vmem:[#allocation2 + $0x60] sm:$0xff]  }
 0x175   : > { %790 = vst.msk [vmem:[#allocation2 + $0x74] sm:$0xf] %vm762_vm1, %v4535_v3  ;;  %v4533_v7 = vpack.c.bf16 %v627_v4, %v627_v4  ;;  %v632_v8 = vmax.f32 %v596_v5, 0.0  ;;  %v588_v9 = vadd.f32 %v5690_v61, %v587_v6  ;;  %v5987_v49 = vld [vmem:[#allocation2 + $0x60] sm:$0xff]  }
 0x176   : > { %v4792_v10 = vpop.f32.mrf.mxu0  ;;  %v5811_v11 = vld [vmem:[#allocation2 + $0x58] sm:$0xff]  }
 0x177   : > { %788 = vst.msk [vmem:[#allocation2 + $0x6c] sm:$0xf] %vm762_vm1, %v4533_v7  ;;  %v4538_v13 = vpack.c.bf16 %v632_v8, %v632_v8  ;;  %v630_v14 = vmax.f32 %v588_v9, 0.0  ;;  %v599_v15 = vadd.f32 %v4792_v10, %v5690_v61  ;;  %4817 = vmatprep.mubr.msk.bf16.mxu1 %vm940_vm2, %v5811_v11  ;;  %v5985_v48 = vld [vmem:[#allocation2 + $0x58] sm:$0xff]  }
 0x178   : > { %v590_v18 = vpop.f32.mrf.mxu0  ;;  %4818 = vmatmul.mubr.msk.bf16.gmra.mxu1 %vm940_vm2, %v5815_v17  ;;  %4882 = vmatmul.mubr.msk.bf16.gmra.mxu0 %vm940_vm2, %v5773_v38 }
 0x179   : > { %793 = vst.msk [vmem:[#allocation2 + $0x80] sm:$0xf] %vm762_vm1, %v4538_v13  ;;  %v4536_v19 = vpack.c.bf16 %v630_v14, %v630_v14  ;;  %v633_v20 = vmax.f32 %v599_v15, 0.0  ;;  %v591_v21 = vadd.f32 %v5690_v61, %v590_v18  ;;  %4885 = vmatprep.mubr.msk.bf16.mxu0 %vm940_vm2, %v5791_v53 }
 0x17b   : > { %791 = vst.msk [vmem:[#allocation2 + $0x78] sm:$0xf] %vm762_vm1, %v4536_v19  ;;  %v4539_v22 = vpack.c.bf16 %v633_v20, %v633_v20  ;;  %v631_v23 = vmax.f32 %v591_v21, 0.0 }
 0x17c   : > { %v5832_v61 = vld [vmem:[#allocation2 + $0x70] sm:$0xff]  }
 0x17d   : > { %794 = vst.msk [vmem:[#allocation2 + $0x84] sm:$0xf] %vm762_vm1, %v4539_v22  ;;  %v4537_v24 = vpack.c.bf16 %v631_v23, %v631_v23  ;;  %v5999_v51 = vld [vmem:[#allocation2 + $0x70] sm:$0xff]  }
 0x17e   : > { %v5829_v25 = vld [vmem:[#allocation2 + $0x68] sm:$0xff]  }
 0x17f   : > { %792 = vst.msk [vmem:[#allocation2 + $0x7c] sm:$0xf] %vm762_vm1, %v4537_v24  ;;  %4821 = vmatprep.mubr.msk.bf16.mxu1 %vm940_vm2, %v5829_v25  ;;  %v5997_v50 = vld [vmem:[#allocation2 + $0x68] sm:$0xff]  }
 0x180   : > { %4822 = vmatmul.mubr.msk.bf16.gmra.mxu1 %vm940_vm2, %v5832_v61  ;;  %4886 = vmatmul.mubr.msk.bf16.gmra.mxu0 %vm940_vm2, %v5795_v58 }
 0x181   : > { %4889 = vmatprep.mubr.msk.bf16.mxu0 %vm940_vm2, %v5811_v11 }
 0x184   : > { %v5251_v60 = vld [vmem:[#allocation2 + $0x80] sm:$0xff]  }
 0x185   : > { %v6017_v57 = vld [vmem:[#allocation2 + $0x80] sm:$0xff]  }
 0x186   : > { %v5844_v28 = vld [vmem:[#allocation2 + $0x78] sm:$0xff]  }
 0x187   : > { %4825 = vmatprep.mubr.msk.bf16.mxu1 %vm940_vm2, %v5844_v28  ;;  %v6009_v52 = vld [vmem:[#allocation2 + $0x78] sm:$0xff]  }
 0x188   : > { %4826 = vmatmul.mubr.msk.bf16.gmra.mxu1 %vm940_vm2, %v5251_v60  ;;  %4890 = vmatmul.mubr.msk.bf16.gmra.mxu0 %vm940_vm2, %v5815_v17 }
 0x189   : > { %4893 = vmatprep.mubr.msk.bf16.mxu0 %vm940_vm2, %v5829_v25  ;;  %4833 = vmatprep.mubr.msk.bf16.mxu1 %vm940_vm2, %v5842_v26 }
 0x190   : > { %4834 = vmatmul.mubr.msk.bf16.vlgmr.msra.gmra.mxu1 %vm940_vm2, %v5709_v36  ;;  %4894 = vmatmul.mubr.msk.bf16.gmra.mxu0 %vm940_vm2, %v5832_v61 }
 0x191   : > { %4902 = vmatpush3.bf16.msra.mxu1 %v5763_v27  ;;  %4837 = vmatprep.mubr.msk.bf16.mxu1 %vm940_vm2, %v5713_v40  ;;  %v5260_v27 = vld [vmem:[#allocation6 + $0x60] sm:$0xff]  }
 0x192   : > { %4897 = vmatprep.mubr.msk.bf16.mxu0 %vm940_vm2, %v5844_v28  ;;  %4903 = vmatprep.subr.bf16.mxu1 %v5256_v30 }
 0x195   : > { %4904 = vmatpush3.bf16.msra.mxu1 %v5256_v30 }
 0x196   : > { %4973 = vmatprep.subr.bf16.mxu1 %v5258_v31 }
 0x198   : > { %4838 = vmatmul.mubr.msk.bf16.gmra.mxu1 %vm940_vm2, %v5726_v56  ;;  %4898 = vmatmul.mubr.msk.bf16.gmra.mxu0 %vm940_vm2, %v5251_v60 }
 0x199   : > { %4841 = vmatprep.mubr.msk.bf16.mxu1 %vm940_vm2, %v5730_v62  ;;  %4941 = vmatprep.mubr.msk.bf16.mxu0 %vm940_vm2, %v5709_v36 }
 0x1a0   : > { %4842 = vmatmul.mubr.msk.bf16.gmra.mxu1 %vm940_vm2, %v5744_v12  ;;  %4942 = vmatmul.mubr.msk.bf16.vlgmr.msra.gmra.mxu0 %vm940_vm2, %v5713_v40 }
 0x1a1   : > { %4845 = vmatprep.mubr.msk.bf16.mxu1 %vm940_vm2, %v5748_v16  ;;  %4945 = vmatprep.mubr.msk.bf16.mxu0 %vm940_vm2, %v5726_v56 }
 0x1a2   : > { %5010 = vmatpush3.bf16.msra.mxu0 %v5765_v29  ;;  %v5265_v29 = vld [vmem:[#allocation6 + $0x20] sm:$0xff]  }
 0x1a3   : > { %5011 = vmatprep.subr.bf16.mxu0 %v5260_v27 }
 0x1a6   : > { %5012 = vmatpush3.bf16.msra.mxu0 %v5260_v27 }
 0x1a7   : > { %5081 = vmatprep.subr.bf16.mxu0 %v5274_v32 }
 0x1a8   : > { %4846 = vmatmul.mubr.msk.bf16.gmra.mxu1 %vm940_vm2, %v5769_v33  ;;  %4946 = vmatmul.mubr.msk.bf16.gmra.mxu0 %vm940_vm2, %v5730_v62 }
 0x1a9   : > { %4849 = vmatprep.mubr.msk.bf16.mxu1 %vm940_vm2, %v5773_v38  ;;  %4949 = vmatprep.mubr.msk.bf16.mxu0 %vm940_vm2, %v5744_v12 }
 0x1b0   : > { %4850 = vmatmul.mubr.msk.bf16.gmra.mxu1 %vm940_vm2, %v5791_v53  ;;  %4950 = vmatmul.mubr.msk.bf16.gmra.mxu0 %vm940_vm2, %v5748_v16 }
 0x1b1   : > { %4853 = vmatprep.mubr.msk.bf16.mxu1 %vm940_vm2, %v5795_v58  ;;  %4953 = vmatprep.mubr.msk.bf16.mxu0 %vm940_vm2, %v5769_v33 }
 0x1b8   : > { %4854 = vmatmul.mubr.msk.bf16.gmra.mxu1 %vm940_vm2, %v5811_v11  ;;  %4954 = vmatmul.mubr.msk.bf16.gmra.mxu0 %vm940_vm2, %v5773_v38 }
 0x1b9   : > { %4857 = vmatprep.mubr.msk.bf16.mxu1 %vm940_vm2, %v5815_v17  ;;  %4957 = vmatprep.mubr.msk.bf16.mxu0 %vm940_vm2, %v5791_v53 }
 0x1c0   : > { %4858 = vmatmul.mubr.msk.bf16.gmra.mxu1 %vm940_vm2, %v5829_v25  ;;  %4958 = vmatmul.mubr.msk.bf16.gmra.mxu0 %vm940_vm2, %v5795_v58 }
 0x1c1   : > { %4861 = vmatprep.mubr.msk.bf16.mxu1 %vm940_vm2, %v5832_v61  ;;  %4961 = vmatprep.mubr.msk.bf16.mxu0 %vm940_vm2, %v5811_v11 }
 0x1c8   : > { %4862 = vmatmul.mubr.msk.bf16.gmra.mxu1 %vm940_vm2, %v5844_v28  ;;  %4962 = vmatmul.mubr.msk.bf16.gmra.mxu0 %vm940_vm2, %v5815_v17 }
 0x1c9   : > { %4965 = vmatprep.mubr.msk.bf16.mxu0 %vm940_vm2, %v5829_v25  ;;  %4905 = vmatprep.mubr.msk.bf16.mxu1 %vm940_vm2, %v5842_v26 }
 0x1d0   : > { %4906 = vmatmul.mubr.msk.bf16.vlgmr.msra.gmra.mxu1 %vm940_vm2, %v5709_v36  ;;  %4966 = vmatmul.mubr.msk.bf16.gmra.mxu0 %vm940_vm2, %v5832_v61 }
 0x1d1   : > { %4974 = vmatpush3.bf16.msra.mxu1 %v5258_v31  ;;  %4909 = vmatprep.mubr.msk.bf16.mxu1 %vm940_vm2, %v5713_v40 }
 0x1d2   : > { %4969 = vmatprep.mubr.msk.bf16.mxu0 %vm940_vm2, %v5844_v28  ;;  %4975 = vmatprep.subr.bf16.mxu1 %v5265_v29 }
 0x1d5   : > { %4976 = vmatpush3.bf16.msra.mxu1 %v5265_v29 }
 0x1d6   : > { %5045 = vmatprep.subr.bf16.mxu1 %v5275_v34 }
 0x1d8   : > { %4910 = vmatmul.mubr.msk.bf16.gmra.mxu1 %vm940_vm2, %v5726_v56  ;;  %4970 = vmatmul.mubr.msk.bf16.gmra.mxu0 %vm940_vm2, %v5251_v60 }
 0x1d9   : > { %4913 = vmatprep.mubr.msk.bf16.mxu1 %vm940_vm2, %v5730_v62  ;;  %5013 = vmatprep.mubr.msk.bf16.mxu0 %vm940_vm2, %v5928_v35 }
 0x1e0   : > { %4914 = vmatmul.mubr.msk.bf16.gmra.mxu1 %vm940_vm2, %v5744_v12  ;;  %5014 = vmatmul.mubr.msk.bf16.vlgmr.msra.gmra.mxu0 %vm940_vm2, %v5937_v37 }
 0x1e1   : > { %4917 = vmatprep.mubr.msk.bf16.mxu1 %vm940_vm2, %v5748_v16  ;;  %5017 = vmatprep.mubr.msk.bf16.mxu0 %vm940_vm2, %v5939_v39 }
 0x1e2   : > { %5082 = vmatpush3.bf16.msra.mxu0 %v5274_v32 }
 0x1e3   : > { %5083 = vmatprep.subr.bf16.mxu0 %v5279_v41 }
 0x1e6   : > { %5084 = vmatpush3.bf16.msra.mxu0 %v5279_v41 }
 0x1e8   : > { %4918 = vmatmul.mubr.msk.bf16.gmra.mxu1 %vm940_vm2, %v5769_v33  ;;  %5018 = vmatmul.mubr.msk.bf16.gmra.mxu0 %vm940_vm2, %v5949_v42 }
 0x1e9   : > { %4921 = vmatprep.mubr.msk.bf16.mxu1 %vm940_vm2, %v5773_v38  ;;  %5021 = vmatprep.mubr.msk.bf16.mxu0 %vm940_vm2, %v5951_v43 }
 0x1f0   : > { %4922 = vmatmul.mubr.msk.bf16.gmra.mxu1 %vm940_vm2, %v5791_v53  ;;  %5022 = vmatmul.mubr.msk.bf16.gmra.mxu0 %vm940_vm2, %v5961_v44 }
 0x1f1   : > { %4925 = vmatprep.mubr.msk.bf16.mxu1 %vm940_vm2, %v5795_v58  ;;  %5025 = vmatprep.mubr.msk.bf16.mxu0 %vm940_vm2, %v5963_v45 }
 0x1f8   : > { %4926 = vmatmul.mubr.msk.bf16.gmra.mxu1 %vm940_vm2, %v5811_v11  ;;  %5026 = vmatmul.mubr.msk.bf16.gmra.mxu0 %vm940_vm2, %v5973_v46 }
 0x1f9   : > { %4929 = vmatprep.mubr.msk.bf16.mxu1 %vm940_vm2, %v5815_v17  ;;  %5029 = vmatprep.mubr.msk.bf16.mxu0 %vm940_vm2, %v5975_v47 }
 0x200   : > { %4930 = vmatmul.mubr.msk.bf16.gmra.mxu1 %vm940_vm2, %v5829_v25  ;;  %5030 = vmatmul.mubr.msk.bf16.gmra.mxu0 %vm940_vm2, %v5985_v48 }
 0x201   : > { %4933 = vmatprep.mubr.msk.bf16.mxu1 %vm940_vm2, %v5832_v61  ;;  %5033 = vmatprep.mubr.msk.bf16.mxu0 %vm940_vm2, %v5987_v49 }
 0x208   : > { %4934 = vmatmul.mubr.msk.bf16.gmra.mxu1 %vm940_vm2, %v5844_v28  ;;  %5034 = vmatmul.mubr.msk.bf16.gmra.mxu0 %vm940_vm2, %v5997_v50 }
 0x209   : > { %5037 = vmatprep.mubr.msk.bf16.mxu0 %vm940_vm2, %v5999_v51  ;;  %4977 = vmatprep.mubr.msk.bf16.mxu1 %vm940_vm2, %v5842_v26 }
 0x210   : > { %v6011_v55 = vpop.f32.mrf.mxu0  ;;  %4978 = vmatmul.mubr.msk.bf16.vlgmr.msra.gmra.mxu1 %vm940_vm2, %v5709_v36  ;;  %5038 = vmatmul.mubr.msk.bf16.gmra.mxu0 %vm940_vm2, %v6009_v52 }
 0x211   : > { %5046 = vmatpush3.bf16.msra.mxu1 %v5275_v34  ;;  %4981 = vmatprep.mubr.msk.bf16.mxu1 %vm940_vm2, %v5713_v40 }
 0x212   : > { %5041 = vmatprep.mubr.msk.bf16.mxu0 %vm940_vm2, %v6017_v57  ;;  %v6023_v59 = vpop.f32.mrf.mxu0  ;;  %5047 = vmatprep.subr.bf16.mxu1 %v5280_v54 }
 0x214   : > { %v6025_v63 = vpop.f32.mrf.mxu0 }
 0x215   : > { %5048 = vmatpush3.bf16.msra.mxu1 %v5280_v54 }
 0x216   : > { %v6029_v36 = vpop.f32.mrf.mxu0 }
 0x218   : > { %v6031_v1 = vpop.f32.mrf.mxu0  ;;  %4982 = vmatmul.mubr.msk.bf16.gmra.mxu1 %vm940_vm2, %v5726_v56  ;;  %5042 = vmatmul.mubr.msk.bf16.gmra.mxu0 %vm940_vm2, %v6027_v0 }
 0x219   : > { %4985 = vmatprep.mubr.msk.bf16.mxu1 %vm940_vm2, %v5730_v62  ;;  %5085 = vmatprep.mubr.msk.bf16.mxu0 %vm940_vm2, %v5928_v35 }
 0x21a   : > { %v6041_v40 = vpop.f32.mrf.mxu0 }
 0x21c   : > { %v6043_v2 = vpop.f32.mrf.mxu0 }
 0x21e   : > { %v6045_v3 = vpop.f32.mrf.mxu0 }
 0x220   : > { %v6047_v4 = vpop.f32.mrf.mxu1  ;;  %v6049_v5 = vpop.f32.mrf.mxu0  ;;  %4986 = vmatmul.mubr.msk.bf16.gmra.mxu1 %vm940_vm2, %v5744_v12  ;;  %5086 = vmatmul.mubr.msk.bf16.vlgmr.msra.gmra.mxu0 %vm940_vm2, %v5937_v37 }
 0x221   : > { %4989 = vmatprep.mubr.msk.bf16.mxu1 %vm940_vm2, %v5748_v16  ;;  %5089 = vmatprep.mubr.msk.bf16.mxu0 %vm940_vm2, %v5939_v39 }
 0x222   : > { %v6059_v56 = vpop.f32.mrf.mxu1  ;;  %v6061_v62 = vpop.f32.mrf.mxu0 }
 0x224   : > { %v6063_v6 = vpop.f32.mrf.mxu1  ;;  %v6065_v7 = vpop.f32.mrf.mxu0 }
 0x226   : > { %v6067_v8 = vpop.f32.mrf.mxu1  ;;  %v6069_v12 = vpop.f32.mrf.mxu0 }
 0x228   : > { %v6071_v9 = vpop.f32.mrf.mxu1  ;;  %v6073_v10 = vpop.f32.mrf.mxu0  ;;  %4990 = vmatmul.mubr.msk.bf16.gmra.mxu1 %vm940_vm2, %v5769_v33  ;;  %5090 = vmatmul.mubr.msk.bf16.gmra.mxu0 %vm940_vm2, %v5949_v42 }
 0x229   : > { %4993 = vmatprep.mubr.msk.bf16.mxu1 %vm940_vm2, %v5773_v38  ;;  %5093 = vmatprep.mubr.msk.bf16.mxu0 %vm940_vm2, %v5951_v43 }
 0x22a   : > { %v6083_v16 = vpop.f32.mrf.mxu1  ;;  %v6085_v13 = vpop.f32.mrf.mxu0 }
 0x22c   : > { %v6087_v14 = vpop.f32.mrf.mxu1  ;;  %v6089_v15 = vpop.f32.mrf.mxu0 }
 0x22e   : > { %v6091_v18 = vpop.f32.mrf.mxu1  ;;  %v6093_v33 = vpop.f32.mrf.mxu0 }
 0x22f   : > { %7851 = vst [vmem:[#allocation12_spill] sm:$0xff] %v6093_v33 }
 0x230   : > { %v6095_v19 = vpop.f32.mrf.mxu1  ;;  %v6097_v20 = vpop.f32.mrf.mxu0  ;;  %4994 = vmatmul.mubr.msk.bf16.gmra.mxu1 %vm940_vm2, %v5791_v53  ;;  %5094 = vmatmul.mubr.msk.bf16.gmra.mxu0 %vm940_vm2, %v5961_v44 }
 0x231   : > { %7852 = vst [vmem:[#allocation13_spill] sm:$0xff] %v6097_v20  ;;  %4997 = vmatprep.mubr.msk.bf16.mxu1 %vm940_vm2, %v5795_v58  ;;  %5097 = vmatprep.mubr.msk.bf16.mxu0 %vm940_vm2, %v5963_v45 }
 0x232   : > { %v6107_v38 = vpop.f32.mrf.mxu1  ;;  %v6109_v21 = vpop.f32.mrf.mxu0 }
 0x233   : > { %7853 = vst [vmem:[#allocation14_spill] sm:$0xff] %v6109_v21 }
 0x234   : > { %v6111_v22 = vpop.f32.mrf.mxu1  ;;  %v6113_v23 = vpop.f32.mrf.mxu0 }
 0x235   : > { %7854 = vst [vmem:[#allocation15_spill] sm:$0xff] %v6113_v23 }
 0x236   : > { %v6115_v24 = vpop.f32.mrf.mxu1  ;;  %v6117_v53 = vpop.f32.mrf.mxu0 }
 0x237   : > { %7855 = vst [vmem:[#allocation16_spill] sm:$0xff] %v6117_v53 }
 0x238   : > { %v6119_v26 = vpop.f32.mrf.mxu1  ;;  %v6121_v60 = vpop.f32.mrf.mxu0  ;;  %4998 = vmatmul.mubr.msk.bf16.gmra.mxu1 %vm940_vm2, %v5811_v11  ;;  %5098 = vmatmul.mubr.msk.bf16.gmra.mxu0 %vm940_vm2, %v5973_v46 }
 0x239   : > { %7856 = vst [vmem:[#allocation17_spill] sm:$0xff] %v6121_v60  ;;  %5001 = vmatprep.mubr.msk.bf16.mxu1 %vm940_vm2, %v5815_v17  ;;  %5101 = vmatprep.mubr.msk.bf16.mxu0 %vm940_vm2, %v5975_v47 }
 0x23a   : > { %v6131_v58 = vpop.f32.mrf.mxu1  ;;  %v6133_v30 = vpop.f32.mrf.mxu0 }
 0x23b   : > { %7857 = vst [vmem:[#allocation18_spill] sm:$0xff] %v6133_v30 }
 0x23c   : > { %v6135_v31 = vpop.f32.mrf.mxu1  ;;  %v6137_v27 = vpop.f32.mrf.mxu0 }
 0x23d   : > { %7858 = vst [vmem:[#allocation19_spill] sm:$0xff] %v6137_v27 }
 0x23e   : > { %v6139_v32 = vpop.f32.mrf.mxu1  ;;  %v6141_v11 = vpop.f32.mrf.mxu0 }
 0x23f   : > { %7859 = vst [vmem:[#allocation20_spill] sm:$0xff] %v6141_v11 }
 0x240   : > { %v6143_v29 = vpop.f32.mrf.mxu1  ;;  %v6145_v34 = vpop.f32.mrf.mxu0  ;;  %5002 = vmatmul.mubr.msk.bf16.gmra.mxu1 %vm940_vm2, %v5829_v25  ;;  %5102 = vmatmul.mubr.msk.bf16.gmra.mxu0 %vm940_vm2, %v5985_v48 }
 0x241   : > { %7860 = vst [vmem:[#allocation21_spill] sm:$0xff] %v6145_v34  ;;  %5005 = vmatprep.mubr.msk.bf16.mxu1 %vm940_vm2, %v5832_v61  ;;  %5105 = vmatprep.mubr.msk.bf16.mxu0 %vm940_vm2, %v5987_v49 }
 0x242   : > { %v6155_v17 = vpop.f32.mrf.mxu1  ;;  %v6157_v41 = vpop.f32.mrf.mxu0 }
 0x243   : > { %7861 = vst [vmem:[#allocation22_spill] sm:$0xff] %v6157_v41 }
 0x244   : > { %v6159_v54 = vpop.f32.mrf.mxu1  ;;  %v6161_v11 = vpop.f32.mrf.mxu0 }
 0x245   : > { %7862 = vst [vmem:[#allocation23_spill] sm:$0xff] %v6161_v11 }
 0x246   : > { %v6163_v34 = vpop.f32.mrf.mxu1  ;;  %v6165_v25 = vpop.f32.mrf.mxu0 }
 0x247   : > { %7863 = vst [vmem:[#allocation24_spill] sm:$0xff] %v6165_v25 }
 0x248   : > { %v6167_v27 = vpop.f32.mrf.mxu1  ;;  %v6169_v30 = vpop.f32.mrf.mxu0  ;;  %5006 = vmatmul.mubr.msk.bf16.gmra.mxu1 %vm940_vm2, %v5844_v28  ;;  %5106 = vmatmul.mubr.msk.bf16.gmra.mxu0 %vm940_vm2, %v5997_v50 }
 0x249   : > { %7864 = vst [vmem:[#allocation25_spill] sm:$0xff] %v6169_v30  ;;  %5049 = vmatprep.mubr.msk.bf16.mxu1 %vm940_vm2, %v5928_v35  ;;  %5109 = vmatprep.mubr.msk.bf16.mxu0 %vm940_vm2, %v5999_v51 }
 0x24a   : > { %v6179_v61 = vpop.f32.mrf.mxu1  ;;  %v6181_v11 = vpop.f32.mrf.mxu0 }
 0x24b   : > { %7865 = vst [vmem:[#allocation26_spill] sm:$0xff] %v6181_v11 }
 0x24c   : > { %v6183_v25 = vpop.f32.mrf.mxu1  ;;  %v6185_v41 = vpop.f32.mrf.mxu0 }
 0x24d   : > { %7866 = vst [vmem:[#allocation27_spill] sm:$0xff] %v6185_v41 }
 0x24e   : > { %v6187_v30 = vpop.f32.mrf.mxu1  ;;  %v6189_v28 = vpop.f32.mrf.mxu0 }
 0x24f   : > { %7867 = vst [vmem:[#allocation28_spill] sm:$0xff] %v6189_v28 }
 0x250   : > { %v4835_v60 = vpop.f32.mrf.mxu1  ;;  %v6191_v53 = vpop.f32.mrf.mxu0  ;;  %5050 = vmatmul.mubr.msk.bf16.vlgmr.msra.gmra.mxu1 %vm940_vm2, %v5937_v37  ;;  %5110 = vmatmul.mubr.msk.bf16.gmra.mxu0 %vm940_vm2, %v6009_v52 }
 0x251   : > { %7868 = vst [vmem:[#allocation29_spill] sm:$0xff] %v6191_v53  ;;  %v6198_v35 = vadd.f32 %v4835_v60, %v6011_v55  ;;  %5053 = vmatprep.mubr.msk.bf16.mxu1 %vm940_vm2, %v5939_v39  ;;  %5113 = vmatprep.mubr.msk.bf16.mxu0 %vm940_vm2, %v6017_v57 }
 0x252   : > { %v1204_v41 = vpop.f32.mrf.mxu1  ;;  %v6204_v28 = vpop.f32.mrf.mxu0 }
 0x253   : > { %7869 = vst [vmem:[#allocation30_spill] sm:$0xff] %v6204_v28  ;;  %v6207_v53 = vadd.f32 %v1204_v41, %v6023_v59 }
 0x254   : > { %v4836_v11 = vpop.f32.mrf.mxu1  ;;  %v6209_v37 = vpop.f32.mrf.mxu0 }
 0x255   : > { %7870 = vst [vmem:[#allocation31_spill] sm:$0xff] %v6209_v37  ;;  %v6212_v23 = vadd.f32 %v4836_v11, %v6025_v63 }
 0x256   : > { %v1207_v55 = vpop.f32.mrf.mxu1  ;;  %v6214_v60 = vpop.f32.mrf.mxu0 }
 0x257   : > { %7871 = vst [vmem:[#allocation32_spill] sm:$0xff] %v6214_v60  ;;  %v6217_v39 = vadd.f32 %v1207_v55, %v6029_v36 }
 0x258   : > { %v4839_v21 = vpop.f32.mrf.mxu1  ;;  %v6219_v20 = vpop.f32.mrf.mxu0  ;;  %5054 = vmatmul.mubr.msk.bf16.gmra.mxu1 %vm940_vm2, %v5949_v42  ;;  %5114 = vmatmul.mubr.msk.bf16.gmra.mxu0 %vm940_vm2, %v6027_v0 }
 0x259   : > { %7872 = vst [vmem:[#allocation33_spill] sm:$0xff] %v6219_v20  ;;  %v6226_v59 = vadd.f32 %v4839_v21, %v6031_v1  ;;  %5057 = vmatprep.mubr.msk.bf16.mxu1 %vm940_vm2, %v5951_v43 }
 0x25a   : > { %v1220_v63 = vpop.f32.mrf.mxu1  ;;  %v6230_v11 = vpop.f32.mrf.mxu0 }
 0x25b   : > { %7873 = vst [vmem:[#allocation34_spill] sm:$0xff] %v6230_v11  ;;  %v6233_v36 = vadd.f32 %v1220_v63, %v6041_v40 }
 0x25c   : > { %v4840_v41 = vpop.f32.mrf.mxu1  ;;  %v6235_v55 = vpop.f32.mrf.mxu0 }
 0x25d   : > { %7874 = vst [vmem:[#allocation35_spill] sm:$0xff] %v6235_v55  ;;  %v6238_v42 = vadd.f32 %v4840_v41, %v6043_v2 }
 0x25e   : > { %v1223_v20 = vpop.f32.mrf.mxu1  ;;  %v6240_v60 = vpop.f32.mrf.mxu0 }
 0x25f   : > { %7875 = vst [vmem:[#allocation36_spill] sm:$0xff] %v6240_v60  ;;  %v6243_v1 = vadd.f32 %v1223_v20, %v6045_v3 }
 0x260   : > { %v4843_v21 = vpop.f32.mrf.mxu1  ;;  %v6245_v43 = vpop.f32.mrf.mxu0  ;;  %5058 = vmatmul.mubr.msk.bf16.gmra.mxu1 %vm940_vm2, %v5961_v44  ;;  %v5281_v44 = vld [vmem:[%s7824_s5 + $0x8] sm:$0xff]  }
 0x261   : > { %7876 = vst [vmem:[#allocation37_spill] sm:$0xff] %v6245_v43  ;;  %v6250_v40 = vadd.f32 %v4843_v21, %v6047_v4  ;;  %5061 = vmatprep.mubr.msk.bf16.mxu1 %vm940_vm2, %v5963_v45  ;;  %5117 = vmatprep.subr.bf16.mxu1 %v5281_v44 }
 0x262   : > { %v1236_v2 = vpop.f32.mrf.mxu1  ;;  %v6254_v63 = vpop.f32.mrf.mxu0  ;;  %5118 = vmatpush3.bf16.msra.mxu1 %v5281_v44 }
 0x263   : > { %7877 = vst [vmem:[#allocation38_spill] sm:$0xff] %v6254_v63  ;;  %v6257_v41 = vadd.f32 %v1236_v2, %v6059_v56 }
 0x264   : > { %v4844_v3 = vpop.f32.mrf.mxu1  ;;  %v6259_v20 = vpop.f32.mrf.mxu0 }
 0x265   : > { %7878 = vst [vmem:[#allocation39_spill] sm:$0xff] %v6259_v20  ;;  %v6262_v60 = vadd.f32 %v4844_v3, %v6063_v6 }
 0x266   : > { %v1239_v4 = vpop.f32.mrf.mxu1  ;;  %v6267_v21 = vpop.f32.mrf.mxu0 }
 0x267   : > { %7879 = vst [vmem:[#allocation40_spill] sm:$0xff] %v6267_v21  ;;  %v6270_v45 = vadd.f32 %v1239_v4, %v6067_v8 }
 0x268   : > { %v4847_v63 = vpop.f32.mrf.mxu1  ;;  %v6272_v56 = vpop.f32.mrf.mxu0  ;;  %5062 = vmatmul.mubr.msk.bf16.gmra.mxu1 %vm940_vm2, %v5973_v46 }
 0x269   : > { %7880 = vst [vmem:[#allocation41_spill] sm:$0xff] %v6272_v56  ;;  %v6277_v6 = vadd.f32 %v4847_v63, %v6071_v9  ;;  %5065 = vmatprep.mubr.msk.bf16.mxu1 %vm940_vm2, %v5975_v47 }
 0x26a   : > { %v1252_v2 = vpop.f32.mrf.mxu1  ;;  %v6281_v3 = vpop.f32.mrf.mxu0 }
 0x26b   : > { %7881 = vst [vmem:[#allocation42_spill] sm:$0xff] %v6281_v3  ;;  %v6284_v8 = vadd.f32 %v1252_v2, %v6083_v16 }
 0x26c   : > { %v4848_v4 = vpop.f32.mrf.mxu1  ;;  %v6286_v20 = vpop.f32.mrf.mxu0 }
 0x26d   : > { %7882 = vst [vmem:[#allocation43_spill] sm:$0xff] %v6286_v20  ;;  %v6289_v56 = vadd.f32 %v4848_v4, %v6087_v14 }
 0x26e   : > { %v1255_v46 = vpop.f32.mrf.mxu1  ;;  %v6291_v55 = vpop.f32.mrf.mxu0 }
 0x26f   : > { %7883 = vst [vmem:[#allocation44_spill] sm:$0xff] %v6291_v55  ;;  %v6294_v9 = vadd.f32 %v1255_v46, %v6091_v18 }
 0x270   : > { %v4851_v47 = vpop.f32.mrf.mxu1  ;;  %v6296_v63 = vpop.f32.mrf.mxu0  ;;  %5066 = vmatmul.mubr.msk.bf16.gmra.mxu1 %vm940_vm2, %v5985_v48 }
 0x271   : > { %7884 = vst [vmem:[#allocation45_spill] sm:$0xff] %v6296_v63  ;;  %v6301_v16 = vadd.f32 %v4851_v47, %v6095_v19  ;;  %5069 = vmatprep.mubr.msk.bf16.mxu1 %vm940_vm2, %v5987_v49 }
 0x272   : > { %v1268_v14 = vpop.f32.mrf.mxu1  ;;  %v6305_v44 = vpop.f32.mrf.mxu0 }
 0x273   : > { %7885 = vst [vmem:[#allocation46_spill] sm:$0xff] %v6305_v44  ;;  %v6308_v2 = vadd.f32 %v1268_v14, %v6107_v38 }
 0x274   : > { %v4852_v18 = vpop.f32.mrf.mxu1  ;;  %v6310_v4 = vpop.f32.mrf.mxu0 }
 0x275   : > { %7886 = vst [vmem:[#allocation47_spill] sm:$0xff] %v6310_v4  ;;  %v6313_v46 = vadd.f32 %v4852_v18, %v6111_v22 }
 0x276   : > { %v6315_v63 = vpop.f32.mrf.mxu1  ;;  %v6317_v48 = vpop.f32.mrf.mxu0 }
 0x277   : > { %7887 = vst [vmem:[#allocation48_spill] sm:$0xff] %v6317_v48 }
 0x278   : > { %v4855_v19 = vpop.f32.mrf.mxu1  ;;  %v6319_v47 = vpop.f32.mrf.mxu0  ;;  %5070 = vmatmul.mubr.msk.bf16.gmra.mxu1 %vm940_vm2, %v5997_v50 }
 0x279   : > { %7888 = vst [vmem:[#allocation49_spill] sm:$0xff] %v6319_v47  ;;  %v6324_v49 = vadd.f32 %v4855_v19, %v6119_v26  ;;  %5073 = vmatprep.mubr.msk.bf16.mxu1 %vm940_vm2, %v5999_v51 }
 0x27a   : > { %v1284_v38 = vpop.f32.mrf.mxu1  ;;  %v6328_v14 = vpop.f32.mrf.mxu0 }
 0x27b   : > { %7889 = vst [vmem:[#allocation50_spill] sm:$0xff] %v6328_v14  ;;  %v6331_v22 = vadd.f32 %v1284_v38, %v6131_v58 }
 0x27c   : > { %v4856_v18 = vpop.f32.mrf.mxu1  ;;  %v6333_v48 = vpop.f32.mrf.mxu0 }
 0x27d   : > { %7890 = vst [vmem:[#allocation51_spill] sm:$0xff] %v6333_v48  ;;  %v6336_v47 = vadd.f32 %v4856_v18, %v6135_v31 }
 0x27e   : > { %v6338_v4 = vpop.f32.mrf.mxu1  ;;  %v6340_v50 = vpop.f32.mrf.mxu0 }
 0x27f   : > { %7891 = vst [vmem:[#allocation52_spill] sm:$0xff] %v6340_v50 }
 0x280   : > { %v4859_v26 = vpop.f32.mrf.mxu1  ;;  %v6342_v19 = vpop.f32.mrf.mxu0  ;;  %5074 = vmatmul.mubr.msk.bf16.gmra.mxu1 %vm940_vm2, %v6009_v52 }
 0x281   : > { %7892 = vst [vmem:[#allocation53_spill] sm:$0xff] %v6342_v19  ;;  %v6347_v51 = vadd.f32 %v4859_v26, %v6143_v29  ;;  %5077 = vmatprep.mubr.msk.bf16.mxu1 %vm940_vm2, %v6017_v57  ;;  %v5282_v57 = vld [vmem:[%s7824_s5] sm:$0xff]  }
 0x282   : > { %v1300_v58 = vpop.f32.mrf.mxu1  ;;  %v6351_v38 = vpop.f32.mrf.mxu0  ;;  %5119 = vmatprep.subr.bf16.mxu1 %v5282_v57 }
 0x283   : > { %7893 = vst [vmem:[#allocation54_spill] sm:$0xff] %v6351_v38  ;;  %v6354_v31 = vadd.f32 %v1300_v58, %v6155_v17  ;;  %5120 = vmatpush3.bf16.msra.mxu1 %v5282_v57 }
 0x284   : > { %v4860_v18 = vpop.f32.mrf.mxu1  ;;  %v6356_v50 = vpop.f32.mrf.mxu0 }
 0x285   : > { %7894 = vst [vmem:[#allocation55_spill] sm:$0xff] %v6356_v50  ;;  %v6359_v19 = vadd.f32 %v4860_v18, %v6159_v54 }
 0x286   : > { %v6361_v48 = vpop.f32.mrf.mxu1  ;;  %v6363_v52 = vpop.f32.mrf.mxu0 }
 0x287   : > { %7895 = vst [vmem:[#allocation56_spill] sm:$0xff] %v6363_v52 }
 0x288   : > { %v4863_v29 = vpop.f32.mrf.mxu1  ;;  %v6368_v26 = vpop.f32.mrf.mxu0  ;;  %5078 = vmatmul.mubr.msk.bf16.gmra.mxu1 %vm940_vm2, %v6027_v0 }
 0x289   : > { %7896 = vst [vmem:[#allocation57_spill] sm:$0xff] %v6368_v26  ;;  %v6373_v17 = vadd.f32 %v4863_v29, %v6167_v27 }
 0x28a   : > { %v1316_v54 = vpop.f32.mrf.mxu1  ;;  %v6375_v58 = vpop.f32.mrf.mxu0 }
 0x28b   : > { %7897 = vst [vmem:[#allocation58_spill] sm:$0xff] %v6375_v58  ;;  %v6378_v18 = vadd.f32 %v1316_v54, %v6179_v61 }
 0x28c   : > { %v4864_v52 = vpop.f32.mrf.mxu1  ;;  %v6380_v50 = vpop.f32.mrf.mxu0 }
 0x28d   : > { %7898 = vst [vmem:[#allocation59_spill] sm:$0xff] %v6380_v50  ;;  %v6383_v38 = vadd.f32 %v4864_v52, %v6183_v25 }
 0x28e   : > { %v6385_v26 = vpop.f32.mrf.mxu1  ;;  %v6387_v0 = vpop.f32.mrf.mxu0 }
 0x28f   : > { %7899 = vst [vmem:[#allocation60_spill] sm:$0xff] %v6387_v0 }
 0x290   : > { %v6389_v27 = vpop.f32.mrf.mxu1  ;;  %v6391_v29 = vpop.f32.mrf.mxu0 }
 0x291   : > { %7900 = vst [vmem:[#allocation61_spill] sm:$0xff] %v6391_v29 }
 0x292   : > { %v6393_v14 = vpop.f32.mrf.mxu1  ;;  %v6395_v57 = vpop.f32.mrf.mxu0 }
 0x293   : > { %7901 = vst [vmem:[#allocation62_spill] sm:$0xff] %v6395_v57 }
 0x294   : > { %v6397_v61 = vpop.f32.mrf.mxu1  ;;  %v6399_v54 = vpop.f32.mrf.mxu0 }
 0x295   : > { %7902 = vst [vmem:[#allocation63_spill] sm:$0xff] %v6399_v54 }
 0x296   : > { %v6401_v50 = vpop.f32.mrf.mxu1  ;;  %v6403_v25 = vpop.f32.mrf.mxu0 }
 0x297   : > { %7903 = vst [vmem:[#allocation64_spill] sm:$0xff] %v6403_v25  ;;  %v2823_v25 = vlaneseq }
 0x298   : > { %v6405_v52 = vpop.f32.mrf.mxu1  ;;  %v6407_v58 = vpop.f32.mrf.mxu0 }
 0x299   : > { %7904 = vst [vmem:[#allocation65_spill] sm:$0xff] %v6407_v58 }
 0x29a   : > { %v6409_v0 = vpop.f32.mrf.mxu1  ;;  %v6411_v44 = vpop.f32.mrf.mxu0 }
 0x29b   : > { %7905 = vst [vmem:[#allocation66_spill] sm:$0xff] %v6411_v44 }
 0x29c   : > { %v6413_v29 = vpop.f32.mrf.mxu1  ;;  %v6415_v20 = vpop.f32.mrf.mxu0 }
 0x29d   : > { %7906 = vst [vmem:[#allocation67_spill] sm:$0xff] %v6415_v20  ;;  %v6431_v20 = vshrl.u32 %v2823_v25, 7 }
 0x29e   : > { %v6417_v57 = vpop.f32.mrf.mxu1  ;;  %v6419_v55 = vpop.f32.mrf.mxu0 }
 0x29f   : > { %7907 = vst [vmem:[#allocation68_spill] sm:$0xff] %v6417_v57  ;;  %7908 = vst [vmem:[#allocation69_spill] sm:$0xff] %v6419_v55  ;;  %vm3464_vm3 = vcmp.lt.s32.totalorder %v6431_v20, 1 }
 0x2a0   : > { %v6421_v54 = vpop.f32.mrf.mxu1  ;;  %v5015_v3 = vpop.f32.mrf.mxu0 }
 0x2a1   : > { %7909 = vst [vmem:[#allocation70_spill] sm:$0xff] %v6421_v54  ;;  %v2373_v43 = vadd.f32 %v5015_v3, %v6198_v35 }
 0x2a2   : > { %v6424_v11 = vpop.f32.mrf.mxu1  ;;  %v2244_v58 = vpop.f32.mrf.mxu0 }
 0x2a3   : > { %7910 = vst [vmem:[#allocation71_spill] sm:$0xff] %v6424_v11  ;;  %v6427_v37 = vadd.f32 %v2244_v58, %v6207_v53  ;;  %v3434_v57 = vrot.slane %v2373_v43, 7 }
 0x2a4   : > { %v6429_v44 = vpop.f32.mrf.mxu1  ;;  %v5016_v21 = vpop.f32.mrf.mxu0 }
 0x2a5   : > { %7911 = vst [vmem:[#allocation72_spill] sm:$0xff] %v6429_v44  ;;  %v2374_v28 = vadd.f32 %v5016_v21, %v6212_v23  ;;  %v7831_v23 = vrot.slane %v6427_v37, 7 }
 0x2a6   : > { %v6434_v55 = vpop.f32.mrf.mxu1  ;;  %v2247_v54 = vpop.f32.mrf.mxu0 }
 0x2a7   : > { %7912 = vst [vmem:[#allocation73_spill] sm:$0xff] %v6434_v55  ;;  %v3435_v35 = vrot.slane %v2374_v28, 7  ;;  %v2372_v3 = vadd.f32 %v2247_v54, %v6217_v39 }
 0x2a8   : > { %v6438_v11 = vpop.f32.mrf.mxu1  ;;  %v5019_v53 = vpop.f32.mrf.mxu0 }
 0x2a9   : > { %7913 = vst [vmem:[#allocation74_spill] sm:$0xff] %v6438_v11  ;;  %v3433_v58 = vrot.slane %v2372_v3, 7  ;;  %v2377_v44 = vadd.f32 %v5019_v53, %v6226_v59  ;;  %v6443_v25 = vsel %vm3464_vm3, %v3434_v57, %v3435_v35 }
 0x2aa   : > { %7914 = vst [vmem:[#allocation75_spill] sm:$0xff] %v6443_v25  ;;  %v6446_v21 = vpop.f32.mrf.mxu1  ;;  %v2260_v55 = vpop.f32.mrf.mxu0 }
 0x2ab   : > { %7915 = vst [vmem:[#allocation76_spill] sm:$0xff] %v6446_v21  ;;  %v2375_v43 = vadd.f32 %v2260_v55, %v6233_v36  ;;  %v6451_v28 = vsel %vm3464_vm3, %v3433_v58, %v3434_v57  ;;  %v6459_v59 = vsel %vm3464_vm3, %v7831_v23, %v3433_v58  ;;  %v3438_v36 = vrot.slane %v2377_v44, 7 }
 0x2ac   : > { %7916 = vst [vmem:[#allocation77_spill] sm:$0xff] %v6451_v28  ;;  %v6453_v39 = vpop.f32.mrf.mxu1  ;;  %v5020_v54 = vpop.f32.mrf.mxu0  ;;  %7918 = vst [vmem:[#allocation79_spill] sm:$0xff] %v6459_v59 }
 0x2ad   : > { %7917 = vst [vmem:[#allocation78_spill] sm:$0xff] %v6453_v39  ;;  %v3436_v3 = vrot.slane %v2375_v43, 7  ;;  %v2378_v53 = vadd.f32 %v5020_v54, %v6238_v42 }
 0x2ae   : > { %v6462_v25 = vpop.f32.mrf.mxu1  ;;  %v2263_v21 = vpop.f32.mrf.mxu0 }
 0x2af   : > { %v3439_v55 = vrot.slane %v2378_v53, 7  ;;  %v2376_v57 = vadd.f32 %v2263_v21, %v6243_v1  ;;  %v6467_v39 = vsel %vm3464_vm3, %v3435_v35, %v3436_v3 }
 0x2b0   : > { %v6469_v28 = vpop.f32.mrf.mxu1  ;;  %v5023_v11 = vpop.f32.mrf.mxu0 }
 0x2b1   : > { %v3437_v33 = vrot.slane %v2376_v57, 7  ;;  %v2381_v58 = vadd.f32 %v5023_v11, %v6250_v40  ;;  %v6474_v42 = vsel %vm3464_vm3, %v3438_v36, %v3439_v55 }
 0x2b2   : > { %7919 = vst [vmem:[#allocation80_spill] sm:$0xff] %v6474_v42  ;;  %v6476_v43 = vpop.f32.mrf.mxu1  ;;  %v2276_v44 = vpop.f32.mrf.mxu0 }
 0x2b3   : > { %v2379_v54 = vadd.f32 %v2276_v44, %v6257_v41  ;;  %v6481_v1 = vsel %vm3464_vm3, %v3437_v33, %v3438_v36  ;;  %v6487_v53 = vsel %vm3464_vm3, %v3436_v3, %v3437_v33  ;;  %v3442_v42 = vrot.slane %v2381_v58, 7 }
 0x2b4   : > { %7920 = vst [vmem:[#allocation81_spill] sm:$0xff] %v6481_v1  ;;  %v6483_v35 = vpop.f32.mrf.mxu1  ;;  %v5024_v21 = vpop.f32.mrf.mxu0  ;;  %7922 = vst [vmem:[#allocation83_spill] sm:$0xff] %v6487_v53 }
 0x2b5   : > { %7921 = vst [vmem:[#allocation82_spill] sm:$0xff] %v6483_v35  ;;  %v3440_v11 = vrot.slane %v2379_v54, 7  ;;  %v2382_v40 = vadd.f32 %v5024_v21, %v6262_v60 }
 0x2b6   : > { %v6490_v57 = vpop.f32.mrf.mxu1  ;;  %v2279_v23 = vpop.f32.mrf.mxu0 }
 0x2b7   : > { %v3443_v59 = vrot.slane %v2382_v40, 7  ;;  %v2380_v41 = vadd.f32 %v2279_v23, %v6270_v45  ;;  %v6495_v36 = vsel %vm3464_vm3, %v3439_v55, %v3440_v11 }
 0x2b8   : > { %v6497_v44 = vpop.f32.mrf.mxu1  ;;  %v5027_v1 = vpop.f32.mrf.mxu0 }
 0x2b9   : > { %v3441_v35 = vrot.slane %v2380_v41, 7  ;;  %v2385_v33 = vadd.f32 %v5027_v1, %v6277_v6  ;;  %v6502_v60 = vsel %vm3464_vm3, %v3442_v42, %v3443_v59 }
 0x2ba   : > { %7923 = vst [vmem:[#allocation84_spill] sm:$0xff] %v6502_v60  ;;  %v6504_v3 = vpop.f32.mrf.mxu1  ;;  %v2292_v58 = vpop.f32.mrf.mxu0 }
 0x2bb   : > { %v2383_v54 = vadd.f32 %v2292_v58, %v6284_v8  ;;  %v6509_v45 = vsel %vm3464_vm3, %v3441_v35, %v3442_v42  ;;  %v6515_v21 = vsel %vm3464_vm3, %v3440_v11, %v3441_v35  ;;  %v3446_v60 = vrot.slane %v2385_v33, 7 }
 0x2bc   : > { %7924 = vst [vmem:[#allocation85_spill] sm:$0xff] %v6509_v45  ;;  %v6511_v23 = vpop.f32.mrf.mxu1  ;;  %v5028_v55 = vpop.f32.mrf.mxu0  ;;  %7926 = vst [vmem:[#allocation87_spill] sm:$0xff] %v6515_v21 }
 0x2bd   : > { %7925 = vst [vmem:[#allocation86_spill] sm:$0xff] %v6511_v23  ;;  %v3444_v6 = vrot.slane %v2383_v54, 7  ;;  %v2386_v1 = vadd.f32 %v5028_v55, %v6289_v56 }
 0x2be   : > { %v6518_v40 = vpop.f32.mrf.mxu1  ;;  %v2295_v41 = vpop.f32.mrf.mxu0 }
 0x2bf   : > { %v3447_v53 = vrot.slane %v2386_v1, 7  ;;  %v2384_v8 = vadd.f32 %v2295_v41, %v6294_v9  ;;  %v6523_v42 = vsel %vm3464_vm3, %v3443_v59, %v3444_v6 }
 0x2c0   : > { %v6525_v58 = vpop.f32.mrf.mxu1  ;;  %v5031_v45 = vpop.f32.mrf.mxu0 }
 0x2c1   : > { %v3445_v23 = vrot.slane %v2384_v8, 7  ;;  %v2389_v35 = vadd.f32 %v5031_v45, %v6301_v16  ;;  %v6530_v56 = vsel %vm3464_vm3, %v3446_v60, %v3447_v53  ;;  %v1272_v16 = vadd.f32 %v6315_v63, %v6115_v24 }
 0x2c2   : > { %7927 = vst [vmem:[#allocation88_spill] sm:$0xff] %v6530_v56  ;;  %v6532_v11 = vpop.f32.mrf.mxu1  ;;  %v2308_v33 = vpop.f32.mrf.mxu0 }
 0x2c3   : > { %v2387_v54 = vadd.f32 %v2308_v33, %v6308_v2  ;;  %v6537_v9 = vsel %vm3464_vm3, %v3445_v23, %v3446_v60  ;;  %v6543_v1 = vsel %vm3464_vm3, %v3444_v6, %v3445_v23  ;;  %v3450_v33 = vrot.slane %v2389_v35, 7 }
 0x2c4   : > { %7928 = vst [vmem:[#allocation89_spill] sm:$0xff] %v6537_v9  ;;  %v6539_v59 = vpop.f32.mrf.mxu1  ;;  %v5032_v55 = vpop.f32.mrf.mxu0  ;;  %7930 = vst [vmem:[#allocation91_spill] sm:$0xff] %v6543_v1  ;;  %v2826_v35 = vadd.s32 16, %v6431_v20  ;;  %v2850_v9 = vadd.s32 208, %v6431_v20 }
 0x2c5   : > { %7929 = vst [vmem:[#allocation90_spill] sm:$0xff] %v6539_v59  ;;  %v3448_v45 = vrot.slane %v2387_v54, 7  ;;  %v2390_v41 = vadd.f32 %v5032_v55, %v6313_v46 }
 0x2c6   : > { %v6548_v8 = vpop.f32.mrf.mxu1  ;;  %v2311_v2 = vpop.f32.mrf.mxu0 }
 0x2c7   : > { %7931 = vst [vmem:[#allocation92_spill] sm:$0xff] %v6548_v8  ;;  %v3451_v56 = vrot.slane %v2390_v41, 7  ;;  %v2388_v60 = vadd.f32 %v2311_v2, %v1272_v16  ;;  %v6552_v21 = vsel %vm3464_vm3, %v3447_v53, %v3448_v45  ;;  %v1288_v41 = vadd.f32 %v6338_v4, %v6139_v32 }
 0x2c8   : > { %7932 = vst [vmem:[#allocation93_spill] sm:$0xff] %v6552_v21  ;;  %v6554_v59 = vpop.f32.mrf.mxu1  ;;  %v5035_v23 = vpop.f32.mrf.mxu0  ;;  %v2830_v32 = vadd.s32 48, %v6431_v20 }
 0x2c9   : > { %7933 = vst [vmem:[#allocation94_spill] sm:$0xff] %v6554_v59  ;;  %v3449_v6 = vrot.slane %v2388_v60, 7  ;;  %v2393_v1 = vadd.f32 %v5035_v23, %v6324_v49  ;;  %v6559_v24 = vsel %vm3464_vm3, %v3450_v33, %v3451_v56  ;;  %v2828_v23 = vadd.s32 32, %v6431_v20 }
 0x2ca   : > { %7934 = vst [vmem:[#allocation95_spill] sm:$0xff] %v6559_v24  ;;  %v6561_v63 = vpop.f32.mrf.mxu1  ;;  %v2324_v46 = vpop.f32.mrf.mxu0 }
 0x2cb   : > { %7935 = vst [vmem:[#allocation96_spill] sm:$0xff] %v6561_v63  ;;  %v2391_v54 = vadd.f32 %v2324_v46, %v6331_v22  ;;  %v6567_v53 = vsel %vm3464_vm3, %v3449_v6, %v3450_v33  ;;  %v6573_v49 = vsel %vm3464_vm3, %v3448_v45, %v3449_v6  ;;  %v2874_v33 = vand.u32 15, %v2826_v35 }
 0x2cc   : > { %7936 = vst [vmem:[#allocation97_spill] sm:$0xff] %v6567_v53  ;;  %v6569_v55 = vpop.f32.mrf.mxu1  ;;  %v5036_v16 = vpop.f32.mrf.mxu0  ;;  %7938 = vst [vmem:[#allocation99_spill] sm:$0xff] %v6573_v49  ;;  %v3454_v24 = vrot.slane %v2393_v1, 7  ;;  %v7832_v49 = vmov 0.0  }
 0x2cd   : > { %7937 = vst [vmem:[#allocation98_spill] sm:$0xff] %v6569_v55  ;;  %v3452_v2 = vrot.slane %v2391_v54, 7  ;;  %v2394_v60 = vadd.f32 %v5036_v16, %v6336_v47  ;;  %v2888_v54 = vand.u32 15, %v2828_v23  ;;  %vm3242_vm4 = vcmp.ne.s32.totalorder %v2874_v33, 0 }
 0x2ce   : > { %v6579_v22 = vpop.f32.mrf.mxu1  ;;  %v2327_v46 = vpop.f32.mrf.mxu0  ;;  %v2902_v23 = vand.u32 15, %v2830_v32  ;;  %v6615_v32 = vsel %vm3242_vm4, 1.0, %v7832_v49 }
 0x2cf   : > { %7939 = vst [vmem:[#allocation100_spill] sm:$0xff] %v6579_v22  ;;  %v3455_v53 = vrot.slane %v2394_v60, 7  ;;  %v2392_v55 = vadd.f32 %v2327_v46, %v1288_v41  ;;  %v6583_v63 = vsel %vm3464_vm3, %v3451_v56, %v3452_v2  ;;  %v2832_v41 = vadd.s32 64, %v6431_v20 }
 0x2d0   : > { %7940 = vst [vmem:[#allocation101_spill] sm:$0xff] %v6583_v63  ;;  %v6585_v45 = vpop.f32.mrf.mxu1  ;;  %v5039_v6 = vpop.f32.mrf.mxu0  ;;  %v2834_v46 = vadd.s32 80, %v6431_v20  ;;  %vm3244_vm5 = vcmp.ne.s32.totalorder %v2888_v54, 0  ;;  %vm3246_vm6 = vcmp.ne.s32.totalorder %v2902_v23, 0  ;;  %v2840_v23 = vadd.s32 128, %v6431_v20 }
 0x2d1   : > { %7941 = vst [vmem:[#allocation102_spill] sm:$0xff] %v6585_v45  ;;  %v3453_v4 = vrot.slane %v2392_v55, 7  ;;  %v2397_v47 = vadd.f32 %v5039_v6, %v6347_v51  ;;  %v6591_v16 = vsel %vm3464_vm3, %v3454_v24, %v3455_v53  ;;  %v2836_v6 = vadd.s32 96, %v6431_v20 }
 0x2d2   : > { %7942 = vst [vmem:[#allocation103_spill] sm:$0xff] %v6591_v16  ;;  %v6593_v1 = vpop.f32.mrf.mxu1  ;;  %v2340_v35 = vpop.f32.mrf.mxu0 }
 0x2d3   : > { %7943 = vst [vmem:[#allocation104_spill] sm:$0xff] %v6593_v1  ;;  %v2395_v56 = vadd.f32 %v2340_v35, %v6354_v31  ;;  %v6599_v60 = vsel %vm3464_vm3, %v3453_v4, %v3454_v24  ;;  %v6607_v22 = vsel %vm3464_vm3, %v3452_v2, %v3453_v4  ;;  %v1304_v31 = vadd.f32 %v6361_v48, %v6163_v34 }
 0x2d4   : > { %7944 = vst [vmem:[#allocation105_spill] sm:$0xff] %v6599_v60  ;;  %v6601_v55 = vpop.f32.mrf.mxu1  ;;  %v5040_v51 = vpop.f32.mrf.mxu0  ;;  %7946 = vst [vmem:[#allocation107_spill] sm:$0xff] %v6607_v22  ;;  %v2916_v60 = vand.u32 15, %v2832_v41  ;;  %v3458_v63 = vrot.slane %v2397_v47, 7  ;;  %v2930_v4 = vand.u32 15, %v2834_v46  ;;  %v2944_v54 = vand.u32 15, %v2836_v6 }
 0x2d5   : > { %7945 = vst [vmem:[#allocation106_spill] sm:$0xff] %v6601_v55  ;;  %v3456_v33 = vrot.slane %v2395_v56, 7  ;;  %v2398_v35 = vadd.f32 %v5040_v51, %v6359_v19  ;;  %v6624_v19 = vsel %vm3244_vm5, 1.0, %v7832_v49  ;;  %v2838_v47 = vadd.s32 112, %v6431_v20 }
 0x2d6   : > { %v6612_v24 = vpop.f32.mrf.mxu1  ;;  %v2343_v16 = vpop.f32.mrf.mxu0  ;;  %v2844_v46 = vadd.s32 160, %v6431_v20  ;;  %vm6642_vm7 = vcmp.ne.s32.totalorder %v2916_v60, 0  ;;  %vm6652_vm8 = vcmp.ne.s32.totalorder %v2930_v4, 0  ;;  %vm6656_vm9 = vcmp.ne.s32.totalorder %v2944_v54, 0 }
 0x2d7   : > { %v3459_v55 = vrot.slane %v2398_v35, 7  ;;  %v2396_v1 = vadd.f32 %v2343_v16, %v1304_v31  ;;  %v6619_v2 = vsel %vm3464_vm3, %v3455_v53, %v3456_v33  ;;  %v2842_v31 = vadd.s32 144, %v6431_v20 }
 0x2d8   : > { %7947 = vst [vmem:[#allocation108_spill] sm:$0xff] %v6619_v2  ;;  %v6621_v34 = vpop.f32.mrf.mxu1  ;;  %v5043_v48 = vpop.f32.mrf.mxu0  ;;  %v2846_v35 = vadd.s32 176, %v6431_v20  ;;  %v2848_v60 = vadd.s32 192, %v6431_v20  ;;  %v2958_v4 = vand.u32 15, %v2838_v47  ;;  %v3000_v21 = vand.u32 15, %v2844_v46 }
 0x2d9   : > { %7948 = vst [vmem:[#allocation109_spill] sm:$0xff] %v6621_v34  ;;  %v3457_v56 = vrot.slane %v2396_v1, 7  ;;  %v2401_v51 = vadd.f32 %v5043_v48, %v6373_v17  ;;  %v6630_v16 = vsel %vm3464_vm3, %v3458_v63, %v3459_v55  ;;  %v6640_v17 = vsel %vm3246_vm6, 1.0, %v7832_v49 }
 0x2da   : > { %7949 = vst [vmem:[#allocation110_spill] sm:$0xff] %v6630_v16  ;;  %v6632_v53 = vpop.f32.mrf.mxu1  ;;  %v2356_v41 = vpop.f32.mrf.mxu0  ;;  %v2986_v54 = vand.u32 15, %v2842_v31  ;;  %v3014_v45 = vand.u32 15, %v2846_v35  ;;  %v3028_v47 = vand.u32 15, %v2848_v60  ;;  %v2852_v2 = vadd.s32 224, %v6431_v20 }
 0x2db   : > { %7950 = vst [vmem:[#allocation111_spill] sm:$0xff] %v6632_v53  ;;  %v2399_v1 = vadd.f32 %v2356_v41, %v6378_v18  ;;  %v6648_v48 = vsel %vm3464_vm3, %v3457_v56, %v3458_v63  ;;  %v6663_v41 = vsel %vm3464_vm3, %v3456_v33, %v3457_v56  ;;  %v1320_v63 = vadd.f32 %v6385_v26, %v6187_v30 }
 0x2dc   : > { %7953 = vst [vmem:[#allocation112_spill] sm:$0xff] %v6648_v48  ;;  %v6650_v16 = vpop.f32.mrf.mxu1  ;;  %v5044_v22 = vpop.f32.mrf.mxu0  ;;  %7959 = vst [vmem:[#allocation114_spill] sm:$0xff] %v6663_v41  ;;  %v2972_v53 = vand.u32 15, %v2840_v23  ;;  %v3462_v30 = vrot.slane %v2401_v51, 7  ;;  %vm3254_vm10 = vcmp.ne.s32.totalorder %v2958_v4, 0  ;;  %vm6705_vm11 = vcmp.ne.s32.totalorder %v2986_v54, 0 }
 0x2dd   : > { %7954 = vst [vmem:[#allocation113_spill] sm:$0xff] %v6650_v16  ;;  %v3460_v49 = vrot.slane %v2399_v1, 7  ;;  %v2402_v48 = vadd.f32 %v5044_v22, %v6383_v38  ;;  %v7962_v22 = vmov 0.0   ;;  %vm6713_vm13 = vcmp.ne.s32.totalorder %v3014_v45, 0 }
 0x2de   : > { %v6668_v16 = vpop.f32.mrf.mxu1  ;;  %v2359_v34 = vpop.f32.mrf.mxu0  ;;  %v6682_v56 = vsel %vm6652_vm8, 1.0, %v7962_v22  ;;  %v6698_v23 = vsel %vm6656_vm9, 1.0, %v7962_v22  ;;  %vm3256_vm12 = vcmp.ne.s32.totalorder %v2972_v53, 0  ;;  %vm6717_vm14 = vcmp.ne.s32.totalorder %v3000_v21, 0 }
 0x2df   : > { %v3463_v59 = vrot.slane %v2402_v48, 7  ;;  %v2400_v8 = vadd.f32 %v2359_v34, %v1320_v63  ;;  %v6673_v33 = vsel %vm3464_vm3, %v3459_v55, %v3460_v49  ;;  %v6687_v34 = vsel %vm6642_vm7, 1.0, %v7962_v22 }
 0x2e0   : > { %7960 = vst [vmem:[#allocation115_spill] sm:$0xff] %v6673_v33  ;;  %v6675_v26 = vpop.f32.mrf.mxu1  ;;  %v6677_v38 = vpop.f32.mrf.mxu0  ;;  %v7963_v55 = vrot.slane %v6427_v37, 7  ;;  %v3042_v48 = vand.u32 15, %v2850_v9  ;;  %v2825_v45 = vadd.s32 8, %v6431_v20  ;;  %vm3264_vm15 = vcmp.ne.s32.totalorder %v3028_v47, 0 }
 0x2e1   : > { %7961 = vst [vmem:[#allocation116_spill] sm:$0xff] %v6675_v26  ;;  %v3461_v31 = vrot.slane %v2400_v8, 7  ;;  %v6711_v37 = vsel %vm3464_vm3, %v3462_v30, %v3463_v59  ;;  %v6736_v63 = vsel %vm3254_vm10, 1.0, %v7962_v22  ;;  %v6739_v9 = vsel %vm3256_vm12, 1.0, %v7962_v22 }
 0x2e2   : > { %v6693_v51 = vsel %vm3464_vm3, %v3463_v59, %v7963_v55  ;;  %v6701_v35 = vpop.f32.mrf.mxu1  ;;  %v6703_v46 = vpop.f32.mrf.mxu0  ;;  %7969 = vst [vmem:[#allocation120_spill] sm:$0xff] %v6711_v37  ;;  %v2860_v59 = vand.u32 15, %v6431_v20  ;;  %v2854_v4 = vadd.s32 240, %v6431_v20  ;;  %v3056_v54 = vand.u32 15, %v2852_v2 }
 0x2e3   : > { %7964 = vst [vmem:[#allocation117_spill] sm:$0xff] %v6693_v51  ;;  %7965 = vst [vmem:[#allocation118_spill] sm:$0xff] %v6701_v35  ;;  %v6723_v18 = vsel %vm3464_vm3, %v3461_v31, %v3462_v30  ;;  %v6733_v21 = vsel %vm3464_vm3, %v3460_v49, %v3461_v31  ;;  %v2827_v37 = vadd.s32 24, %v6431_v20  ;;  %v2831_v47 = vadd.s32 56, %v6431_v20 }
 0x2e4   : > { %7966 = vst [vmem:[#allocation119_spill] sm:$0xff] %v6703_v46  ;;  %7974 = vst [vmem:[#allocation121_spill] sm:$0xff] %v6723_v18  ;;  %v6725_v60 = vpop.f32.mrf.mxu1  ;;  %v6727_v53 = vpop.f32.mrf.mxu0  ;;  %v2829_v49 = vadd.s32 40, %v6431_v20  ;;  %v6752_v31 = vsel %vm6705_vm11, 1.0, %v7962_v22  ;;  %v6762_v2 = vsel %vm6717_vm14, 1.0, %v7962_v22  ;;  %vm6764_vm0 = vcmp.ne.s32.totalorder %v3042_v48, 0 }
 0x2e5   : > { %7975 = vst [vmem:[#allocation122_spill] sm:$0xff] %v6725_v60  ;;  %7976 = vst [vmem:[#allocation123_spill] sm:$0xff] %v6727_v53  ;;  %v6769_v18 = vsel %vm3264_vm15, 1.0, %v7962_v22  ;;  %vm3240_vm1 = vcmp.ne.s32.totalorder %v2860_v59, 0  ;;  %v2867_v1 = vand.u32 15, %v2825_v45  ;;  %v2835_v60 = vadd.s32 88, %v6431_v20 }
 0x2e6   : > { %7977 = vst [vmem:[#allocation124_spill] sm:$0xff] %v6733_v21  ;;  %v6742_v30 = vpop.f32.mrf.mxu1  ;;  %v6744_v55 = vpop.f32.mrf.mxu0  ;;  %v6757_v21 = vsel %vm6713_vm13, 1.0, %v7962_v22  ;;  %7980 = vst [vmem:[#allocation127_spill] sm:$0xff] %v6762_v2  ;;  %v2833_v51 = vadd.s32 72, %v6431_v20  ;;  %v2839_v6 = vadd.s32 120, %v6431_v20  ;;  %v2837_v48 = vadd.s32 104, %v6431_v20 }
 0x2e7   : > { %7978 = vst [vmem:[#allocation125_spill] sm:$0xff] %v6742_v30  ;;  %7979 = vst [vmem:[#allocation126_spill] sm:$0xff] %v6757_v21  ;;  %v3070_v26 = vand.u32 15, %v2854_v4  ;;  %vm6779_vm3 = vcmp.ne.s32.totalorder %v3056_v54, 0  ;;  %v2909_v59 = vand.u32 15, %v2831_v47  ;;  %v2895_v45 = vand.u32 15, %v2829_v49 }
 0x2e8   : > { %7983 = vst [vmem:[#allocation128_spill] sm:$0xff] %v6769_v18  ;;  %v6771_v8 = vpop.f32.mrf.mxu1  ;;  %v6773_v30 = vpop.f32.mrf.mxu0  ;;  %v2841_v21 = vadd.s32 136, %v6431_v20  ;;  %v6789_v35 = vsel %vm3240_vm1, 1.0, %v7962_v22  ;;  %v2843_v53 = vadd.s32 152, %v6431_v20  ;;  %v2845_v4 = vadd.s32 168, %v6431_v20 }
 0x2e9   : > { %7984 = vst [vmem:[#allocation129_spill] sm:$0xff] %v6771_v8  ;;  %7985 = vst [vmem:[#allocation130_spill] sm:$0xff] %v6773_v30  ;;  %v2881_v30 = vand.u32 15, %v2827_v37  ;;  %v6796_v54 = vsel %vm6764_vm0, 1.0, %v7962_v22  ;;  %vm6802_vm4 = vcmp.ne.s32.totalorder %v2867_v1, 15  ;;  %v2937_v47 = vand.u32 15, %v2835_v60 }
 0x2ea   : > { %v6783_v18 = vpop.f32.mrf.mxu1  ;;  %v6785_v8 = vpop.f32.mrf.mxu0  ;;  %7990 = vst [vmem:[#allocation133_spill] sm:$0xff] %v6789_v35  ;;  %7991 = vst [vmem:[#allocation134_spill] sm:$0xff] %v6796_v54  ;;  %v2923_v49 = vand.u32 15, %v2833_v51  ;;  %v6809_v35 = vsel %vm6779_vm3, 1.0, %v7962_v22  ;;  %v2965_v2 = vand.u32 15, %v2839_v6  ;;  %v2847_v41 = vadd.s32 184, %v6431_v20 }
 0x2eb   : > { %7988 = vst [vmem:[#allocation131_spill] sm:$0xff] %v6783_v18  ;;  %7989 = vst [vmem:[#allocation132_spill] sm:$0xff] %v6785_v8  ;;  %v2951_v8 = vand.u32 15, %v2837_v48  ;;  %vm6812_vm5 = vcmp.ne.s32.totalorder %v3070_v26, 0  ;;  %vm6820_vm6 = vcmp.ne.s32.totalorder %v2881_v30, 15  ;;  %vm6824_vm7 = vcmp.ne.s32.totalorder %v2909_v59, 15 }
 0x2ec   : > { %v6798_v18 = vpop.f32.mrf.mxu1  ;;  %v6800_v46 = vpop.f32.mrf.mxu0  ;;  %7996 = vst [vmem:[#allocation137_spill] sm:$0xff] %v6809_v35  ;;  %vm6828_vm8 = vcmp.ne.s32.totalorder %v2895_v45, 15  ;;  %v2979_v26 = vand.u32 15, %v2841_v21  ;;  %v2993_v6 = vand.u32 15, %v2843_v53  ;;  %v3007_v48 = vand.u32 15, %v2845_v4  ;;  %v8049_v45 = vld [vmem:[#allocation72_spill] sm:$0xff] }
 0x2ed   : > { %7992 = vst [vmem:[#allocation135_spill] sm:$0xff] %v6798_v18  ;;  %7993 = vst [vmem:[#allocation136_spill] sm:$0xff] %v6800_v46  ;;  %v2851_v35 = vadd.s32 216, %v6431_v20  ;;  %v6841_v59 = vsel %vm6802_vm4, 1.0, %v7962_v22  ;;  %vm6843_vm9 = vcmp.ne.s32.totalorder %v2937_v47, 15  ;;  %vm6847_vm10 = vcmp.ne.s32.totalorder %v2923_v49, 15 }
 0x2ee   : > { %v6816_v18 = vpop.f32.mrf.mxu1  ;;  %v6818_v1 = vpop.f32.mrf.mxu0  ;;  %8007 = vst [vmem:[#allocation140_spill] sm:$0xff] %v6841_v59  ;;  %v6854_v21 = vsel %vm6812_vm5, 1.0, %v7962_v22  ;;  %vm6856_vm11 = vcmp.ne.s32.totalorder %v2965_v2, 15  ;;  %vm6860_vm12 = vcmp.ne.s32.totalorder %v2951_v8, 15  ;;  %v3021_v47 = vand.u32 15, %v2847_v41 }
 0x2ef   : > { %7999 = vst [vmem:[#allocation138_spill] sm:$0xff] %v6816_v18  ;;  %v2849_v18 = vadd.s32 200, %v6431_v20  ;;  %8012 = vst [vmem:[#allocation141_spill] sm:$0xff] %v6854_v21  ;;  %v6872_v54 = vsel %vm6820_vm6, 1.0, %v7962_v22  ;;  %v6877_v2 = vsel %vm6824_vm7, 1.0, %v7962_v22  ;;  %v6882_v8 = vsel %vm6828_vm8, 1.0, %v7962_v22 }
 0x2f0   : > { %v6834_v46 = vpop.f32.mrf.mxu1  ;;  %v6836_v30 = vpop.f32.mrf.mxu0  ;;  %8018 = vst [vmem:[#allocation143_spill] sm:$0xff] %v6872_v54  ;;  %vm3353_vm13 = vcmp.ne.s32.totalorder %v2979_v26, 15  ;;  %vm6884_vm14 = vcmp.ne.s32.totalorder %v2993_v6, 15  ;;  %vm6888_vm15 = vcmp.ne.s32.totalorder %v3007_v48, 15  ;;  %v3049_v60 = vand.u32 15, %v2851_v35 }
 0x2f1   : > { %8006 = vst [vmem:[#allocation139_spill] sm:$0xff] %v6834_v46  ;;  %v2855_v46 = vadd.s32 248, %v6431_v20  ;;  %v6899_v51 = vsel %vm6843_vm9, 1.0, %v7962_v22  ;;  %v6904_v26 = vsel %vm6847_vm10, 1.0, %v7962_v22  ;;  %v6909_v6 = vsel %vm6856_vm11, 1.0, %v7962_v22 }
 0x2f2   : > { %v6865_v49 = vpop.f32.mrf.mxu1  ;;  %v6867_v59 = vpop.f32.mrf.mxu0  ;;  %8023 = vst [vmem:[#allocation144_spill] sm:$0xff] %v6909_v6  ;;  %v6914_v35 = vsel %vm6860_vm12, 1.0, %v7962_v22  ;;  %v6921_v48 = vsel %vm3353_vm13, 1.0, %v7962_v22  ;;  %vm6923_vm0 = vcmp.ne.s32.totalorder %v3021_v47, 15  ;;  %v6929_v4 = vadd.f32 %v6393_v14, %v6061_v62  ;;  %v8066_v14 = vld [vmem:[#allocation20_spill] sm:$0xff] }
 0x2f3   : > { %8017 = vst [vmem:[#allocation142_spill] sm:$0xff] %v6865_v49  ;;  %v3035_v49 = vand.u32 15, %v2849_v18  ;;  %8024 = vst [vmem:[#allocation145_spill] sm:$0xff] %v6914_v35  ;;  %v6918_v18 = vadd.f32 %v6389_v27, %v6049_v5  ;;  %v3077_v53 = vand.u32 15, %v2855_v46  ;;  %v6933_v37 = vadd.f32 %v6397_v61, %v6065_v7  ;;  %v8048_v35 = vld [vmem:[#allocation15_spill] sm:$0xff] }
 0x2f4   : > { %v6892_v54 = vpop.f32.mrf.mxu1  ;;  %v6894_v33 = vpop.f32.mrf.mxu0  ;;  %8025 = vst [vmem:[#allocation146_spill] sm:$0xff] %v6921_v48  ;;  %v6942_v27 = vsel %vm6884_vm14, 1.0, %v7962_v22  ;;  %v6947_v46 = vsel %vm6888_vm15, 1.0, %v7962_v22  ;;  %v6951_v62 = vadd.f32 %v6401_v50, %v6069_v12  ;;  %vm6953_vm1 = vcmp.ne.s32.totalorder %v3049_v60, 15  ;;  %v8038_v60 = vld [vmem:[#allocation12_spill] sm:$0xff] }
 0x2f5   : > { %8028 = vst [vmem:[#allocation147_spill] sm:$0xff] %v6942_v27  ;;  %8029 = vst [vmem:[#allocation148_spill] sm:$0xff] %v6947_v46  ;;  %vm6957_vm3 = vcmp.ne.s32.totalorder %v3035_v49, 15  ;;  %v6962_v61 = vadd.s32 232, %v6431_v20  ;;  %v6966_v21 = vadd.f32 %v6405_v52, %v6073_v10  ;;  %v6970_v47 = vadd.f32 %v6409_v0, %v6085_v13  ;;  %v8039_v10 = vld [vmem:[#allocation68_spill] sm:$0xff]  ;;  %v8040_v46 = vld [vmem:[#allocation13_spill] sm:$0xff] }
 0x2f6   : > { %v6935_v6 = vpop.f32.mrf.mxu1  ;;  %v6937_v5 = vpop.f32.mrf.mxu0  ;;  %v6974_v12 = vadd.f32 %v6413_v29, %v6089_v15  ;;  %v6983_v41 = vsel %vm6923_vm0, 1.0, %v7962_v22  ;;  %v6987_v52 = vadd.f32 %v8039_v10, %v8038_v60  ;;  %v8041_v13 = vld [vmem:[#allocation70_spill] sm:$0xff]  ;;  %v8044_v15 = vld [vmem:[#allocation71_spill] sm:$0xff]  ;;  %vm6997_vm4 = vcmp.ne.s32.totalorder %v3077_v53, 15 }
 0x2f7   : > { %8034 = vst [vmem:[#allocation149_spill] sm:$0xff] %v6962_v61  ;;  %8035 = vst [vmem:[#allocation150_spill] sm:$0xff] %v6970_v47  ;;  %v6991_v0 = vadd.f32 %v8041_v13, %v8040_v46  ;;  %v8043_v27 = vld [vmem:[#allocation14_spill] sm:$0xff]  ;;  %v8052_v47 = vld [vmem:[#allocation73_spill] sm:$0xff]  ;;  %v7021_v53 = vsel %vm6957_vm3, 1.0, %v7962_v22  ;;  %vm3593_vm5 = vcmp.lt.s32.totalorder %v6431_v20, 7 }
 0x2f8   : > { %8036 = vst [vmem:[#allocation151_spill] sm:$0xff] %v6974_v12  ;;  %v6976_v50 = vpop.f32.mrf.mxu1  ;;  %v6978_v49 = vpop.f32.mrf.mxu0  ;;  %8037 = vst [vmem:[#allocation152_spill] sm:$0xff] %v6983_v41  ;;  %v6995_v29 = vadd.f32 %v8044_v15, %v8043_v27  ;;  %v7003_v12 = vadd.f32 %v8049_v45, %v8048_v35  ;;  %v8051_v41 = vld [vmem:[#allocation16_spill] sm:$0xff]  ;;  %v7016_v27 = vsel %vm6953_vm1, 1.0, %v7962_v22  ;;  %v8056_v35 = vld [vmem:[#allocation17_spill] sm:$0xff] }
 0x2f9   : > { %8042 = vst [vmem:[#allocation12_spill] sm:$0xff] %v6991_v0  ;;  %v7007_v60 = vadd.f32 %v8052_v47, %v8051_v41  ;;  %8054 = vst [vmem:[#allocation14_spill] sm:$0xff] %v7016_v27  ;;  %v8057_v13 = vld [vmem:[#allocation74_spill] sm:$0xff]  ;;  %v8060_v41 = vld [vmem:[#allocation76_spill] sm:$0xff] }
 0x2fa   : > { %8045 = vst [vmem:[#allocation68_spill] sm:$0xff] %v6995_v29  ;;  %8050 = vst [vmem:[#allocation13_spill] sm:$0xff] %v7003_v12  ;;  %v7009_v10 = vpop.f32.mrf.mxu1  ;;  %v7011_v46 = vpop.f32.mrf.mxu0  ;;  %v7025_v15 = vadd.f32 %v8057_v13, %v8056_v35  ;;  %v8059_v47 = vld [vmem:[#allocation18_spill] sm:$0xff]  ;;  %v8063_v27 = vld [vmem:[#allocation19_spill] sm:$0xff] }
 0x2fb   : > { %8053 = vst [vmem:[#allocation70_spill] sm:$0xff] %v7007_v60  ;;  %8055 = vst [vmem:[#allocation71_spill] sm:$0xff] %v7021_v53  ;;  %v7029_v45 = vadd.f32 %v8060_v41, %v8059_v47  ;;  %v8062_v60 = vld [vmem:[#allocation77_spill] sm:$0xff]  ;;  %v8064_v29 = vld [vmem:[#allocation78_spill] sm:$0xff]  ;;  %v7042_v53 = vadd.f32 %v6462_v25, %v8066_v14  ;;  %v7050_v47 = vmul.f32 %v6624_v19, %v6467_v39 }
 0x2fc   : > { %8058 = vst [vmem:[#allocation15_spill] sm:$0xff] %v7025_v15  ;;  %v7033_v12 = vmul.f32 %v6615_v32, %v8062_v60  ;;  %v7038_v0 = vadd.f32 %v8064_v29, %v8063_v27  ;;  %v7044_v35 = vpop.f32.mrf.mxu1  ;;  %v7046_v13 = vpop.f32.mrf.mxu0  ;;  %v7055_v32 = vsel %vm6997_vm4, 1.0, %v7962_v22  ;;  %v8069_v60 = vld [vmem:[#allocation21_spill] sm:$0xff]  ;;  %v8071_v27 = vld [vmem:[#allocation22_spill] sm:$0xff]  ;;  %v8073_v41 = vld [vmem:[#allocation23_spill] sm:$0xff] }
 0x2fd   : > { %8061 = vst [vmem:[#allocation72_spill] sm:$0xff] %v7029_v45  ;;  %8067 = vst [vmem:[#allocation73_spill] sm:$0xff] %v7042_v53  ;;  %v7059_v29 = vadd.f32 %v6469_v28, %v8069_v60  ;;  %v7063_v25 = vadd.f32 %v6476_v43, %v8071_v27  ;;  %v8074_v14 = vld [vmem:[#allocation82_spill] sm:$0xff]  ;;  %v8076_v61 = vld [vmem:[#allocation81_spill] sm:$0xff] }
 0x2fe   : > { %8065 = vst [vmem:[#allocation16_spill] sm:$0xff] %v7038_v0  ;;  %8068 = vst [vmem:[#allocation17_spill] sm:$0xff] %v7055_v32  ;;  %v7067_v7 = vadd.f32 %v8074_v14, %v8073_v41  ;;  %v7071_v39 = vmul.f32 %v6640_v17, %v8076_v61  ;;  %v8077_v19 = vld [vmem:[#allocation24_spill] sm:$0xff]  ;;  %v8079_v32 = vld [vmem:[#allocation25_spill] sm:$0xff]  ;;  %v7085_v27 = vpop.f32.mrf.mxu1  ;;  %v7089_v41 = vmul.f32 %v6687_v34, %v6495_v36 }
 0x2ff   : > { %8070 = vst [vmem:[#allocation74_spill] sm:$0xff] %v7059_v29  ;;  %8072 = vst [vmem:[#allocation18_spill] sm:$0xff] %v7063_v25  ;;  %v7075_v48 = vadd.f32 %v6490_v57, %v8077_v19  ;;  %v7079_v28 = vadd.f32 %v6497_v44, %v8079_v32  ;;  %v8081_v60 = vld [vmem:[#allocation26_spill] sm:$0xff]  ;;  %v8084_v17 = vld [vmem:[#allocation27_spill] sm:$0xff] }
 0x300   : > { %8075 = vst [vmem:[#allocation76_spill] sm:$0xff] %v7067_v7  ;;  %v7083_v43 = vadd.f32 %v6504_v3, %v8081_v60  ;;  %8083 = vst [vmem:[#allocation20_spill] sm:$0xff] %v7089_v41  ;;  %v8085_v61 = vld [vmem:[#allocation86_spill] sm:$0xff]  ;;  %v8087_v57 = vld [vmem:[#allocation28_spill] sm:$0xff]  ;;  %v7105_v3 = vmul.f32 %v6698_v23, %v6523_v42  ;;  %v7119_v22 = vpop.f32.mrf.mxu1 }
 0x301   : > { %8078 = vst [vmem:[#allocation77_spill] sm:$0xff] %v7075_v48  ;;  %8080 = vst [vmem:[#allocation19_spill] sm:$0xff] %v7079_v28  ;;  %v7093_v14 = vadd.f32 %v8085_v61, %v8084_v17  ;;  %v7097_v19 = vadd.f32 %v6518_v40, %v8087_v57  ;;  %v8089_v44 = vld [vmem:[#allocation85_spill] sm:$0xff]  ;;  %v8093_v34 = vld [vmem:[#allocation30_spill] sm:$0xff]  ;;  %v7117_v57 = vpop.f32.mrf.mxu0 }
 0x302   : > { %8082 = vst [vmem:[#allocation78_spill] sm:$0xff] %v7083_v43  ;;  %v7101_v32 = vmul.f32 %v6682_v56, %v8089_v44  ;;  %8090 = vst [vmem:[#allocation23_spill] sm:$0xff] %v7105_v3  ;;  %v8091_v60 = vld [vmem:[#allocation29_spill] sm:$0xff]  ;;  %v7113_v17 = vadd.f32 %v6532_v11, %v8093_v34  ;;  %v8095_v61 = vld [vmem:[#allocation40_spill] sm:$0xff] }
 0x303   : > { %8086 = vst [vmem:[#allocation21_spill] sm:$0xff] %v7093_v14  ;;  %8088 = vst [vmem:[#allocation22_spill] sm:$0xff] %v7097_v19  ;;  %v7109_v36 = vadd.f32 %v6525_v58, %v8091_v60  ;;  %v1910_v40 = vadd.f32 %v6612_v24, %v8095_v61  ;;  %v8096_v56 = vld [vmem:[#allocation89_spill] sm:$0xff]  ;;  %v8098_v42 = vld [vmem:[#allocation31_spill] sm:$0xff] }
 0x304   : > { %8094 = vst [vmem:[#allocation81_spill] sm:$0xff] %v7113_v17  ;;  %v7123_v44 = vmul.f32 %v6736_v63, %v8096_v56  ;;  %v8099_v23 = vld [vmem:[#allocation90_spill] sm:$0xff]  ;;  %v8101_v58 = vld [vmem:[#allocation32_spill] sm:$0xff]  ;;  %v8104_v11 = vld [vmem:[#allocation33_spill] sm:$0xff] }
 0x305   : > { %8092 = vst [vmem:[#allocation82_spill] sm:$0xff] %v7109_v36  ;;  %v7127_v19 = vadd.f32 %v8099_v23, %v8098_v42  ;;  %v8102_v60 = vld [vmem:[#allocation92_spill] sm:$0xff]  ;;  %v8105_v34 = vld [vmem:[#allocation94_spill] sm:$0xff]  ;;  %v8107_v24 = vld [vmem:[#allocation93_spill] sm:$0xff] }
 0x306   : > { %8097 = vst [vmem:[#allocation24_spill] sm:$0xff] %v7123_v44  ;;  %v7131_v36 = vadd.f32 %v8102_v60, %v8101_v58  ;;  %v7135_v17 = vadd.f32 %v8105_v34, %v8104_v11  ;;  %v7140_v61 = vmul.f32 %v6739_v9, %v8107_v24  ;;  %v8109_v63 = vld [vmem:[#allocation34_spill] sm:$0xff]  ;;  %v8110_v56 = vld [vmem:[#allocation96_spill] sm:$0xff]  ;;  %v8112_v42 = vld [vmem:[#allocation37_spill] sm:$0xff]  ;;  %v7151_v11 = vpop.f32.mrf.mxu1 }
 0x307   : > { %8100 = vst [vmem:[#allocation25_spill] sm:$0xff] %v7127_v19  ;;  %v7144_v14 = vadd.f32 %v8110_v56, %v8109_v63  ;;  %v8113_v23 = vld [vmem:[#allocation102_spill] sm:$0xff]  ;;  %v8115_v58 = vld [vmem:[#allocation111_spill] sm:$0xff]  ;;  %v8120_v24 = vld [vmem:[#allocation104_spill] sm:$0xff] }
 0x308   : > { %8103 = vst [vmem:[#allocation26_spill] sm:$0xff] %v7131_v36  ;;  %8106 = vst [vmem:[#allocation27_spill] sm:$0xff] %v7135_v17  ;;  %v1915_v19 = vadd.f32 %v8113_v23, %v8112_v42  ;;  %v8114_v43 = vld [vmem:[#allocation42_spill] sm:$0xff]  ;;  %v2792_v36 = vadd.f32 %v6744_v55, %v1910_v40  ;;  %v8116_v34 = vld [vmem:[#allocation35_spill] sm:$0xff] }
 0x309   : > { %8108 = vst [vmem:[#allocation86_spill] sm:$0xff] %v7140_v61  ;;  %8111 = vst [vmem:[#allocation28_spill] sm:$0xff] %v7144_v14  ;;  %v1923_v60 = vadd.f32 %v8115_v58, %v8114_v43  ;;  %v8117_v17 = vld [vmem:[#allocation98_spill] sm:$0xff]  ;;  %v8121_v7 = vld [vmem:[#allocation39_spill] sm:$0xff] }
 0x30a   : > { %v7155_v28 = vadd.f32 %v8117_v17, %v8116_v34  ;;  %v8119_v9 = vld [vmem:[#allocation38_spill] sm:$0xff]  ;;  %v8123_v14 = vld [vmem:[#allocation97_spill] sm:$0xff]  ;;  %v8125_v23 = vld [vmem:[#allocation44_spill] sm:$0xff]  ;;  %v2793_v55 = vadd.f32 %v6677_v38, %v1915_v19  ;;  %v7171_v17 = vpop.f32.mrf.mxu0  ;;  %v7173_v34 = vpop.f32.mrf.mxu1  ;;  %v3562_v29 = vrot.slane %v2792_v36, 1 }
 0x30b   : > { %v1907_v48 = vadd.f32 %v8120_v24, %v8119_v9  ;;  %v8122_v63 = vld [vmem:[#allocation106_spill] sm:$0xff]  ;;  %v7163_v42 = vmul.f32 %v6752_v31, %v8123_v14  ;;  %v1926_v43 = vadd.f32 %v6668_v16, %v8125_v23  ;;  %v8126_v40 = vld [vmem:[#allocation132_spill] sm:$0xff]  ;;  %v8127_v9 = vld [vmem:[#allocation101_spill] sm:$0xff] }
 0x30c   : > { %8118 = vst [vmem:[#allocation85_spill] sm:$0xff] %v7155_v28  ;;  %v1918_v56 = vadd.f32 %v8122_v63, %v8121_v7  ;;  %v7169_v58 = vadd.f32 %v8126_v40, %v1923_v60  ;;  %v8128_v24 = vld [vmem:[#allocation127_spill] sm:$0xff]  ;;  %v8130_v7 = vld [vmem:[#allocation41_spill] sm:$0xff]  ;;  %v8137_v60 = vld [vmem:[#allocation46_spill] sm:$0xff]  ;;  %v7190_v3 = vpop.f32.mrf.mxu1  ;;  %v3563_v36 = vrot.slane %v2793_v55, 1 }
 0x30d   : > { %8124 = vst [vmem:[#allocation29_spill] sm:$0xff] %v7163_v42  ;;  %v7177_v28 = vmul.f32 %v8128_v24, %v8127_v9  ;;  %v8131_v63 = vld [vmem:[#allocation109_spill] sm:$0xff]  ;;  %v8132_v14 = vld [vmem:[#allocation43_spill] sm:$0xff]  ;;  %v8138_v40 = vld [vmem:[#allocation118_spill] sm:$0xff]  ;;  %v2796_v53 = vadd.f32 %v6818_v1, %v1926_v43 }
 0x30e   : > { %v1931_v31 = vadd.f32 %v8131_v63, %v8130_v7  ;;  %v8133_v61 = vld [vmem:[#allocation113_spill] sm:$0xff]  ;;  %v8134_v16 = vld [vmem:[#allocation119_spill] sm:$0xff]  ;;  %v1939_v42 = vadd.f32 %v8138_v40, %v8137_v60  ;;  %v8140_v24 = vld [vmem:[#allocation126_spill] sm:$0xff]  ;;  %v3565_v1 = vrot.slane %v7169_v58, 1  ;;  %v7210_v40 = vpop.f32.mrf.mxu0  ;;  %v3623_v44 = vsel %vm3593_vm5, %v3562_v29, %v3563_v36 }
 0x30f   : > { %8129 = vst [vmem:[#allocation30_spill] sm:$0xff] %v7177_v28  ;;  %v1934_v25 = vadd.f32 %v8133_v61, %v8132_v14  ;;  %v7184_v23 = vadd.f32 %v8134_v16, %v1907_v48  ;;  %v8136_v38 = vld [vmem:[#allocation123_spill] sm:$0xff]  ;;  %v8139_v9 = vld [vmem:[#allocation105_spill] sm:$0xff]  ;;  %v8142_v7 = vld [vmem:[#allocation130_spill] sm:$0xff] }
 0x310   : > { %v2794_v19 = vadd.f32 %v8136_v38, %v1918_v56  ;;  %v7194_v28 = vmul.f32 %v8140_v24, %v8139_v9  ;;  %v2797_v63 = vadd.f32 %v8142_v7, %v1931_v31  ;;  %v8143_v61 = vld [vmem:[#allocation136_spill] sm:$0xff]  ;;  %v8145_v16 = vld [vmem:[#allocation134_spill] sm:$0xff]  ;;  %v7208_v43 = vadd.f32 %v6867_v59, %v1939_v42  ;;  %v7212_v9 = vpop.f32.mrf.mxu1  ;;  %v8151_v31 = vld [vmem:[#allocation115_spill] sm:$0xff] }
 0x311   : > { %8135 = vst [vmem:[#allocation40_spill] sm:$0xff] %v7184_v23  ;;  %v2798_v14 = vadd.f32 %v8143_v61, %v1934_v25  ;;  %v8144_v48 = vld [vmem:[#allocation112_spill] sm:$0xff]  ;;  %8150 = vst [vmem:[#allocation32_spill] sm:$0xff] %v7212_v9  ;;  %v8152_v25 = vld [vmem:[#allocation137_spill] sm:$0xff] }
 0x312   : > { %8141 = vst [vmem:[#allocation89_spill] sm:$0xff] %v7194_v28  ;;  %v7200_v0 = vmul.f32 %v8145_v16, %v8144_v48  ;;  %v8147_v56 = vld [vmem:[#allocation108_spill] sm:$0xff]  ;;  %v7216_v24 = vmul.f32 %v8152_v25, %v8151_v31  ;;  %v8154_v7 = vld [vmem:[#allocation45_spill] sm:$0xff]  ;;  %v8159_v59 = vld [vmem:[#allocation122_spill] sm:$0xff]  ;;  %v3566_v31 = vrot.slane %v2796_v53, 1  ;;  %v7229_v25 = vpop.f32.mrf.mxu1 }
 0x313   : > { %v8148_v38 = vld [vmem:[#allocation128_spill] sm:$0xff]  ;;  %v8156_v55 = vld [vmem:[#allocation117_spill] sm:$0xff]  ;;  %8162 = vst [vmem:[#allocation33_spill] sm:$0xff] %v7229_v25  ;;  %v8178_v9 = vld [vmem:[#allocation54_spill] sm:$0xff] }
 0x314   : > { %8146 = vst [vmem:[#allocation31_spill] sm:$0xff] %v7200_v0  ;;  %v7204_v60 = vmul.f32 %v8148_v38, %v8147_v56  ;;  %8153 = vst [vmem:[#allocation92_spill] sm:$0xff] %v7216_v24  ;;  %v8155_v61 = vld [vmem:[#allocation116_spill] sm:$0xff]  ;;  %v3564_v56 = vrot.slane %v2794_v19, 1  ;;  %v8157_v38 = vld [vmem:[#allocation133_spill] sm:$0xff]  ;;  %v3567_v24 = vrot.slane %v2797_v63, 1  ;;  %v7241_v53 = vpop.f32.mrf.mxu1 }
 0x315   : > { %v1947_v48 = vadd.f32 %v8155_v61, %v8154_v7  ;;  %v3497_v58 = vmul.f32 %v8157_v38, %v8156_v55  ;;  %v8160_v0 = vld [vmem:[#allocation48_spill] sm:$0xff]  ;;  %v8161_v28 = vld [vmem:[#allocation125_spill] sm:$0xff]  ;;  %v8163_v7 = vld [vmem:[#allocation50_spill] sm:$0xff]  ;;  %v3568_v19 = vrot.slane %v2798_v14, 1  ;;  %v7239_v38 = vpop.f32.mrf.mxu0  ;;  %8165 = vst [vmem:[#allocation94_spill] sm:$0xff] %v7241_v53 }
 0x316   : > { %8149 = vst [vmem:[#allocation90_spill] sm:$0xff] %v7204_v60  ;;  %v8158_v60 = vld [vmem:[#allocation47_spill] sm:$0xff]  ;;  %v1942_v45 = vadd.f32 %v8161_v28, %v8160_v0  ;;  %v3621_v55 = vsel %vm3593_vm5, %v3564_v56, %v3565_v1  ;;  %v8166_v63 = vld [vmem:[#allocation49_spill] sm:$0xff]  ;;  %v3622_v14 = vsel %vm3593_vm5, %v3563_v36, %v3564_v56  ;;  %v7263_v36 = vpop.f32.mrf.mxu1  ;;  %v8179_v41 = vld [vmem:[#allocation142_spill] sm:$0xff] }
 0x317   : > { %v1950_v42 = vadd.f32 %v8159_v59, %v8158_v60  ;;  %v8164_v61 = vld [vmem:[#allocation131_spill] sm:$0xff]  ;;  %v2801_v15 = vadd.f32 %v6836_v30, %v1947_v48  ;;  %v3569_v60 = vrot.slane %v7208_v43, 1  ;;  %v8167_v59 = vld [vmem:[#allocation129_spill] sm:$0xff]  ;;  %v8168_v30 = vrot.slane %v7184_v23, 1  ;;  %v8169_v43 = vld [vmem:[#allocation140_spill] sm:$0xff]  ;;  %8174 = vst [vmem:[#allocation93_spill] sm:$0xff] %v7263_v36 }
 0x318   : > { %v1955_v16 = vadd.f32 %v8164_v61, %v8163_v7  ;;  %v2800_v28 = vadd.f32 %v6937_v5, %v1942_v45  ;;  %v1963_v25 = vadd.f32 %v8167_v59, %v8166_v63  ;;  %v7252_v7 = vmul.f32 %v8169_v43, %v3623_v44  ;;  %v8171_v5 = vld [vmem:[#allocation135_spill] sm:$0xff]  ;;  %v8173_v61 = vld [vmem:[#allocation138_spill] sm:$0xff]  ;;  %v8175_v56 = vld [vmem:[#allocation53_spill] sm:$0xff]  ;;  %v5051_v36 = vpop.f32.mrf.mxu1 }
 0x319   : > { %v2802_v0 = vadd.f32 %v6894_v33, %v1950_v42  ;;  %v3624_v48 = vsel %vm3593_vm5, %v8168_v30, %v3562_v29  ;;  %v8170_v33 = vld [vmem:[#allocation51_spill] sm:$0xff]  ;;  %v8172_v42 = vld [vmem:[#allocation52_spill] sm:$0xff]  ;;  %v3619_v63 = vsel %vm3593_vm5, %v3566_v31, %v3567_v24  ;;  %v3571_v30 = vrot.slane %v2801_v15, 1 }
 0x31a   : > { %v1966_v45 = vadd.f32 %v8171_v5, %v8170_v33  ;;  %v1958_v53 = vadd.f32 %v8173_v61, %v8172_v42  ;;  %v7261_v59 = vadd.f32 %v7011_v46, %v1955_v16  ;;  %v8176_v23 = vld [vmem:[#allocation139_spill] sm:$0xff]  ;;  %v7270_v33 = vsel %vm3593_vm5, %v3567_v24, %v3568_v19  ;;  %v7275_v16 = vpop.f32.mrf.mxu0 }
 0x31b   : > { %v1979_v29 = vadd.f32 %v8176_v23, %v8175_v56  ;;  %v8177_v44 = vld [vmem:[#allocation143_spill] sm:$0xff]  ;;  %v3617_v5 = vsel %vm3593_vm5, %v3568_v19, %v3569_v60  ;;  %v3572_v42 = vrot.slane %v2802_v0, 1  ;;  %v3570_v61 = vrot.slane %v2800_v28, 1 }
 0x31c   : > { %v3629_v43 = vmul.f32 %v8177_v44, %v3621_v55  ;;  %v2805_v46 = vadd.f32 %v6978_v49, %v1963_v25  ;;  %v1971_v23 = vadd.f32 %v8179_v41, %v8178_v9  ;;  %v2583_v15 = vadd.f32 %v5051_v36, %v6918_v18  ;;  %v8180_v19 = vld [vmem:[#allocation55_spill] sm:$0xff]  ;;  %v2454_v41 = vpop.f32.mrf.mxu1  ;;  %v8181_v9 = vld [vmem:[#allocation56_spill] sm:$0xff] }
 0x31d   : > { %v7282_v55 = vsel %vm3593_vm5, %v3565_v1, %v3566_v31  ;;  %v7285_v24 = vmul.f32 %v6882_v8, %v3619_v63  ;;  %v1982_v0 = vadd.f32 %v6892_v54, %v8180_v19  ;;  %v3573_v49 = vrot.slane %v7261_v59, 1  ;;  %v8182_v63 = vld [vmem:[#allocation57_spill] sm:$0xff]  ;;  %v7320_v59 = vld [vmem:[%s7823_s4] ss:$0 sm:$0xff] }
 0x31e   : > { %v7291_v25 = vadd.f32 %v7046_v13, %v1966_v45  ;;  %v2804_v28 = vadd.f32 %v7117_v57, %v1958_v53  ;;  %v1974_v18 = vadd.f32 %v6935_v6, %v8181_v9  ;;  %v3531_v1 = vadd.f32 %v7033_v12, %v2583_v15  ;;  %v7307_v57 = vpop.f32.mrf.mxu0  ;;  %v5052_v53 = vpop.f32.mrf.mxu1  ;;  %v8183_v12 = vld [vmem:[#allocation58_spill] sm:$0xff]  ;;  %v8184_v15 = vld [vmem:[#allocation75_spill] sm:$0xff] }
 0x31f   : > { %v2581_v31 = vadd.f32 %v2454_v41, %v6929_v4  ;;  %v7299_v8 = vmul.f32 %v6877_v2, %v3617_v5  ;;  %v3615_v54 = vsel %vm3593_vm5, %v3570_v61, %v3571_v30  ;;  %v7305_v13 = vadd.f32 %v6976_v50, %v8182_v63 }
 0x320   : > { %v3575_v45 = vrot.slane %v2805_v46, 1  ;;  %v7311_v6 = vsel %vm3593_vm5, %v3571_v30, %v3572_v42  ;;  %v7315_v4 = vadd.f32 %v7009_v10, %v8183_v12  ;;  %v3660_v2 = vadd.f32 %v3622_v14, %v3531_v1  ;;  %v2457_v5 = vpop.f32.mrf.mxu1  ;;  %v8188_v1 = vld [vmem:[#allocation79_spill] sm:$0xff] }
 0x321   : > { %v3529_v50 = vadd.f32 %v3497_v58, %v2581_v31  ;;  %v2584_v36 = vadd.f32 %v5052_v53, %v6933_v37  ;;  %v3613_v56 = vsel %vm3593_vm5, %v3572_v42, %v3573_v49  ;;  %v3576_v44 = vrot.slane %v7291_v25, 1  ;;  %v8185_v37 = vld [vmem:[#allocation59_spill] sm:$0xff] }
 0x322   : > { %v3574_v30 = vrot.slane %v2804_v28, 1  ;;  %v7328_v10 = vsel %vm3593_vm5, %v3569_v60, %v3570_v61  ;;  %v7331_v14 = vadd.f32 %v7210_v40, %v1971_v23  ;;  %v7335_v58 = vmul.f32 %v6904_v26, %v3615_v54  ;;  %v7344_v28 = vpop.f32.mrf.mxu0  ;;  %v5055_v61 = vpop.f32.mrf.mxu1  ;;  %v8189_v54 = vld [vmem:[#allocation150_spill] sm:$0xff] }
 0x323   : > { %v3658_v46 = vadd.f32 %v3624_v48, %v3529_v50  ;;  %v3532_v19 = vadd.f32 %v8184_v15, %v2584_v36  ;;  %v7339_v42 = vadd.f32 %v7044_v35, %v8185_v37  ;;  %v7342_v25 = vadd.f32 %v7171_v17, %v1979_v29  ;;  %v8186_v48 = vld [vmem:[#allocation60_spill] sm:$0xff]  ;;  %v8187_v29 = vld [vmem:[#allocation61_spill] sm:$0xff]  ;;  %v8190_v15 = vld [vmem:[#allocation151_spill] sm:$0xff] }
 0x324   : > { %v3699_v60 = vadd.f32 %v7320_v59, %v3660_v2  ;;  %v2582_v40 = vadd.f32 %v2457_v5, %v6951_v62  ;;  %v7350_v23 = vadd.f32 %v7085_v27, %v8186_v48  ;;  %v2587_v41 = vadd.f32 %v5055_v61, %v6966_v21  ;;  %v2470_v31 = vpop.f32.mrf.mxu1  ;;  %v7372_v12 = vpop.f32.mrf.mxu0  ;;  %v8192_v61 = vld [vmem:[#allocation80_spill] sm:$0xff] }
 0x325   : > { %v3661_v26 = vadd.f32 %v3629_v43, %v3532_v19  ;;  %v7354_v35 = vmul.f32 %v6899_v51, %v3613_v56  ;;  %v3611_v17 = vsel %vm3593_vm5, %v3574_v30, %v3575_v45  ;;  %v7360_v9 = vadd.f32 %v7119_v22, %v8187_v29  ;;  %v8193_v29 = vld [vmem:[#allocation63_spill] sm:$0xff] }
 0x326   : > { %v3530_v62 = vadd.f32 %v8188_v1, %v2582_v40  ;;  %v7365_v27 = vsel %vm3593_vm5, %v3575_v45, %v3576_v44  ;;  %v3577_v43 = vrot.slane %v7331_v14, 1  ;;  %v3535_v51 = vadd.f32 %v7071_v39, %v2587_v41  ;;  %v5056_v36 = vpop.f32.mrf.mxu1  ;;  %v8191_v39 = vld [vmem:[#allocation62_spill] sm:$0xff]  ;;  %v8213_v14 = vld [vmem:[#allocation23_spill] sm:$0xff] }
 0x327   : > { %v3700_v21 = vadd.f32 %v7320_v59, %v3661_v26  ;;  %v2585_v63 = vadd.f32 %v2470_v31, %v8189_v54  ;;  %v3579_v53 = vrot.slane %v7342_v25, 1  ;;  %v3731_v22 = vmax.f32 %v3699_v60, 0.0  ;;  %v8196_v54 = vld [vmem:[#allocation12_spill] sm:$0xff] }
 0x328   : > { %v3697_v2 = vadd.f32 %v7320_v59, %v3658_v46  ;;  %v3659_v50 = vadd.f32 %v7252_v7, %v3530_v62  ;;  %v3664_v56 = vadd.f32 %v7270_v33, %v3535_v51  ;;  %v2588_v19 = vadd.f32 %v5056_v36, %v8190_v15  ;;  %v2473_v46 = vpop.f32.mrf.mxu1 }
 0x329   : > { %v3732_v45 = vmax.f32 %v3700_v21, 0.0  ;;  %v3533_v5 = vadd.f32 %v7050_v47, %v2585_v63  ;;  %v7381_v37 = vadd.f32 %v7151_v11, %v8191_v39  ;;  %v7384_v40 = vadd.f32 %v7239_v38, %v1982_v0  ;;  %v7399_v38 = vpop.f32.mrf.mxu0  ;;  %v8195_v21 = vld [vmem:[#allocation83_spill] sm:$0xff] }
 0x32a   : > { %v3698_v60 = vadd.f32 %v7320_v59, %v3659_v50  ;;  %v7389_v7 = vsel %vm3593_vm5, %v3573_v49, %v3574_v30  ;;  %v3609_v47 = vsel %vm3593_vm5, %v3576_v44, %v3577_v43  ;;  %v7396_v33 = vadd.f32 %v7275_v16, %v1974_v18  ;;  %v5059_v30 = vpop.f32.mrf.mxu1  ;;  %v8194_v18 = vld [vmem:[#allocation145_spill] sm:$0xff]  ;;  %v8198_v50 = vld [vmem:[#allocation68_spill] sm:$0xff] }
 0x32b   : > { %v3762_v11 = vpack.c.bf16 %v3732_v45, %v3731_v22  ;;  %v3536_v48 = vadd.f32 %v8192_v61, %v2588_v19  ;;  %v3729_v0 = vmax.f32 %v3697_v2, 0.0  ;;  %v3662_v41 = vadd.f32 %v7282_v55, %v3533_v5  ;;  %v8197_v22 = vld [vmem:[#allocation64_spill] sm:$0xff] }
 0x32c   : > { %v3730_v26 = vmax.f32 %v3698_v60, 0.0  ;;  %v2586_v49 = vadd.f32 %v2473_v46, %v6987_v52  ;;  %v7405_v1 = vadd.f32 %v7173_v34, %v8193_v29  ;;  %v3703_v44 = vadd.f32 %v7320_v59, %v3664_v56  ;;  %v2486_v63 = vpop.f32.mrf.mxu1  ;;  %v7425_v56 = vpop.f32.mrf.mxu0  ;;  %v8200_v46 = vld [vmem:[#allocation20_spill] sm:$0xff] }
 0x32d   : > { %v3665_v16 = vadd.f32 %v7299_v8, %v3536_v48  ;;  %v7410_v62 = vmul.f32 %v8194_v18, %v3611_v17  ;;  %v3580_v31 = vrot.slane %v7384_v40, 1  ;;  %v2591_v55 = vadd.f32 %v5059_v30, %v8196_v54  ;;  %v8199_v8 = vld [vmem:[#allocation144_spill] sm:$0xff]  ;;  %v8201_v48 = vld [vmem:[#allocation13_spill] sm:$0xff]  ;;  %v8205_v18 = vld [vmem:[#allocation70_spill] sm:$0xff] }
 0x32e   : > { %v3534_v51 = vadd.f32 %v8195_v21, %v2586_v49  ;;  %v3761_v52 = vpack.c.bf16 %v3730_v26, %v3729_v0  ;;  %v7417_v2 = vadd.f32 %v7190_v3, %v8197_v22  ;;  %v2589_v36 = vadd.f32 %v2486_v63, %v8198_v50  ;;  %v5060_v3 = vpop.f32.mrf.mxu1  ;;  %v8203_v0 = vld [vmem:[#allocation32_spill] sm:$0xff]  ;;  %v8206_v63 = vld [vmem:[#allocation87_spill] sm:$0xff]  ;;  %v8208_v50 = vld [vmem:[#allocation66_spill] sm:$0xff] }
 0x32f   : > { %v3704_v34 = vadd.f32 %v7320_v59, %v3665_v16  ;;  %v7422_v45 = vmul.f32 %v8199_v8, %v3609_v47  ;;  %v3578_v17 = vrot.slane %v7396_v33, 1  ;;  %v3701_v5 = vadd.f32 %v7320_v59, %v3662_v41  ;;  %v8202_v33 = vld [vmem:[#allocation65_spill] sm:$0xff]  ;;  %v8207_v22 = vld [vmem:[#allocation15_spill] sm:$0xff] }
 0x330   : > { %v3663_v15 = vadd.f32 %v7285_v24, %v3534_v51  ;;  %v3539_v19 = vadd.f32 %v7101_v32, %v2591_v55  ;;  %5121 = vmatprep.mubr.msk.bf16.mxu1 %vm940_vm2, %v3761_v52  ;;  %v3735_v39 = vmax.f32 %v3703_v44, 0.0  ;;  %v3537_v61 = vadd.f32 %v8200_v46, %v2589_v36  ;;  %v2489_v49 = vpop.f32.mrf.mxu1  ;;  %v8204_v44 = vld [vmem:[#allocation84_spill] sm:$0xff]  ;;  %v2760_v51 = vpop.f32.mrf.mxu0 }
 0x331   : > { %v3736_v60 = vmax.f32 %v3704_v34, 0.0  ;;  %v2592_v47 = vadd.f32 %v5060_v3, %v8201_v48  ;;  %5122 = vmatmul.mubr.msk.bf16.vlgmr.msra.gmra.mxu1 %vm940_vm2, %v3762_v11  ;;  %v7436_v26 = vadd.f32 %v8203_v0, %v8202_v33  ;;  %v7440_v24 = vadd.f32 %v7307_v57, %v7305_v13 }
 0x332   : > { %v3702_v32 = vadd.f32 %v7320_v59, %v3663_v15  ;;  %v3668_v41 = vadd.f32 %v7311_v6, %v3539_v19  ;;  %v3666_v29 = vadd.f32 %v7328_v10, %v3537_v61  ;;  %v2590_v11 = vadd.f32 %v2489_v49, %v8205_v18  ;;  %v5063_v55 = vpop.f32.mrf.mxu1  ;;  %v7475_v46 = vpop.f32.mrf.mxu0  ;;  %v8211_v61 = vld [vmem:[#allocation72_spill] sm:$0xff] }
 0x333   : > { %v3764_v30 = vpack.c.bf16 %v3736_v60, %v3735_v39  ;;  %v3540_v16 = vadd.f32 %v8204_v44, %v2592_v47  ;;  %v7449_v21 = vadd.f32 %v7344_v28, %v7315_v4  ;;  %v3733_v54 = vmax.f32 %v3701_v5, 0.0  ;;  %v8210_v39 = vld [vmem:[#allocation24_spill] sm:$0xff] }
 0x334   : > { %v3734_v13 = vmax.f32 %v3702_v32, 0.0  ;;  %v3707_v57 = vadd.f32 %v7320_v59, %v3668_v41  ;;  %v3538_v52 = vadd.f32 %v8206_v63, %v2590_v11  ;;  %v2595_v10 = vadd.f32 %v5063_v55, %v8207_v22  ;;  %v2502_v8 = vpop.f32.mrf.mxu1  ;;  %v8212_v41 = vld [vmem:[#allocation16_spill] sm:$0xff]  ;;  %v8216_v55 = vld [vmem:[#allocation67_spill] sm:$0xff] }
 0x335   : > { %v3669_v6 = vadd.f32 %v7354_v35, %v3540_v16  ;;  %v3606_v4 = vsel %vm3593_vm5, %v3579_v53, %v3580_v31  ;;  %v3607_v28 = vsel %vm3593_vm5, %v3578_v17, %v3579_v53  ;;  %v3583_v34 = vrot.slane %v7440_v24, 1  ;;  %v8209_v35 = vld [vmem:[#allocation33_spill] sm:$0xff] }
 0x336   : > { %v7468_v36 = vadd.f32 %v8209_v35, %v8208_v50  ;;  %v3763_v5 = vpack.c.bf16 %v3734_v13, %v3733_v54  ;;  %v3705_v15 = vadd.f32 %v7320_v59, %v3666_v29  ;;  %v3667_v3 = vadd.f32 %v7335_v58, %v3538_v52  ;;  %v5064_v47 = vpop.f32.mrf.mxu1  ;;  %v8215_v13 = vld [vmem:[#allocation88_spill] sm:$0xff] }
 0x337   : > { %v3708_v19 = vadd.f32 %v7320_v59, %v3669_v6  ;;  %v3543_v60 = vadd.f32 %v8210_v39, %v2595_v10  ;;  %v3581_v25 = vrot.slane %v7449_v21, 1  ;;  %v3739_v53 = vmax.f32 %v3707_v57, 0.0  ;;  %v8236_v21 = vld [vmem:[#allocation152_spill] sm:$0xff] }
 0x338   : > { %v2593_v48 = vadd.f32 %v2502_v8, %v8211_v61  ;;  %5125 = vmatprep.mubr.msk.bf16.mxu1 %vm940_vm2, %v3763_v5  ;;  %v3608_v33 = vsel %vm3593_vm5, %v3577_v43, %v3578_v17  ;;  %v3706_v58 = vadd.f32 %v7320_v59, %v3667_v3  ;;  %v2596_v49 = vadd.f32 %v5064_v47, %v8212_v41  ;;  %v2505_v18 = vpop.f32.mrf.mxu1  ;;  %v8214_v43 = vld [vmem:[#allocation146_spill] sm:$0xff]  ;;  %v8223_v61 = vld [vmem:[#allocation69_spill] sm:$0xff] }
 0x339   : > { %v3740_v0 = vmax.f32 %v3708_v19, 0.0  ;;  %v3672_v32 = vadd.f32 %v7365_v27, %v3543_v60  ;;  %5126 = vmatmul.mubr.msk.bf16.gmra.mxu1 %vm940_vm2, %v3764_v30  ;;  %v2814_v29 = vadd.f32 %v7372_v12, %v7339_v42  ;;  %v7491_v44 = vadd.f32 %v7399_v38, %v7350_v23  ;;  %v8217_v30 = vld [vmem:[#allocation94_spill] sm:$0xff]  ;;  %v2763_v42 = vpop.f32.mrf.mxu0  ;;  %v8218_v38 = vld [vmem:[#allocation73_spill] sm:$0xff] }
 0x33a   : > { %v3541_v16 = vadd.f32 %v8213_v14, %v2593_v48  ;;  %v7495_v17 = vmul.f32 %v8214_v43, %v3607_v28  ;;  %v3737_v11 = vmax.f32 %v3705_v15, 0.0  ;;  %v3738_v27 = vmax.f32 %v3706_v58, 0.0  ;;  %v5067_v52 = vpop.f32.mrf.mxu1  ;;  %v8219_v28 = vld [vmem:[#allocation74_spill] sm:$0xff]  ;;  %v8220_v15 = vld [vmem:[#allocation91_spill] sm:$0xff]  ;;  %v8221_v60 = vld [vmem:[#allocation29_spill] sm:$0xff] }
 0x33b   : > { %v3766_v54 = vpack.c.bf16 %v3740_v0, %v3739_v53  ;;  %v3544_v57 = vadd.f32 %v8215_v13, %v2596_v49  ;;  %v7500_v6 = vadd.f32 %v8217_v30, %v8216_v55  ;;  %v3711_v12 = vadd.f32 %v7320_v59, %v3672_v32  ;;  %v8222_v53 = vld [vmem:[#allocation18_spill] sm:$0xff]  ;;  %v8224_v48 = vld [vmem:[#allocation93_spill] sm:$0xff]  ;;  %v8226_v14 = vld [vmem:[#allocation76_spill] sm:$0xff] }
 0x33c   : > { %v3670_v23 = vadd.f32 %v7389_v7, %v3541_v16  ;;  %v2594_v63 = vadd.f32 %v2505_v18, %v8218_v38  ;;  %v3605_v22 = vsel %vm3593_vm5, %v3580_v31, %v3581_v25  ;;  %v2599_v50 = vadd.f32 %v5067_v52, %v8219_v28  ;;  %v2518_v3 = vpop.f32.mrf.mxu1  ;;  %v8229_v38 = vld [vmem:[#allocation77_spill] sm:$0xff]  ;;  %v8230_v28 = vld [vmem:[#allocation19_spill] sm:$0xff] }
 0x33d   : > { %v3673_v10 = vadd.f32 %v7422_v45, %v3544_v57  ;;  %v3765_v35 = vpack.c.bf16 %v3738_v27, %v3737_v11  ;;  %v3584_v8 = vrot.slane %v2814_v29, 1  ;;  %v3582_v5 = vrot.slane %v7491_v44, 1  ;;  %v8225_v29 = vld [vmem:[#allocation86_spill] sm:$0xff] }
 0x33e   : > { %v7515_v7 = vadd.f32 %v2760_v51, %v7381_v37  ;;  %v3542_v19 = vadd.f32 %v8220_v15, %v2594_v63  ;;  %v3709_v39 = vadd.f32 %v7320_v59, %v3670_v23  ;;  %v3547_v31 = vadd.f32 %v8221_v60, %v2599_v50  ;;  %v7531_v51 = vpop.f32.mrf.mxu0  ;;  %v5068_v32 = vpop.f32.mrf.mxu1  ;;  %v8233_v60 = vld [vmem:[#allocation78_spill] sm:$0xff] }
 0x33f   : > { %v3712_v40 = vadd.f32 %v7320_v59, %v3673_v10  ;;  %v2597_v45 = vadd.f32 %v2518_v3, %v8222_v53  ;;  %5129 = vmatprep.mubr.msk.bf16.mxu1 %vm940_vm2, %v3765_v35  ;;  %v7525_v47 = vadd.f32 %v8224_v48, %v8223_v61  ;;  %v7529_v37 = vadd.f32 %v7425_v56, %v7360_v9  ;;  %v8227_v9 = vld [vmem:[#allocation147_spill] sm:$0xff]  ;;  %v8234_v48 = vld [vmem:[#allocation30_spill] sm:$0xff] }
 0x340   : > { %v3743_v0 = vmax.f32 %v3711_v12, 0.0  ;;  %v3671_v58 = vadd.f32 %v7410_v62, %v3542_v19  ;;  %v3676_v49 = vadd.f32 %v3606_v4, %v3547_v31  ;;  %v2600_v16 = vadd.f32 %v5068_v32, %v8226_v14  ;;  %v2521_v11 = vpop.f32.mrf.mxu1  ;;  %v2776_v55 = vpop.f32.mrf.mxu0 }
 0x341   : > { %v3744_v41 = vmax.f32 %v3712_v40, 0.0  ;;  %v3545_v44 = vadd.f32 %v8225_v29, %v2597_v45  ;;  %5130 = vmatmul.mubr.msk.bf16.gmra.mxu1 %vm940_vm2, %v3766_v54  ;;  %v3585_v18 = vrot.slane %v7515_v7, 1  ;;  %v3645_v56 = vmul.f32 %v8227_v9, %v3605_v22  ;;  %v8228_v54 = vld [vmem:[#allocation95_spill] sm:$0xff] }
 0x342   : > { %v3710_v43 = vadd.f32 %v7320_v59, %v3671_v58  ;;  %v3602_v62 = vsel %vm3593_vm5, %v3583_v34, %v3584_v8  ;;  %v3603_v4 = vsel %vm3593_vm5, %v3582_v5, %v3583_v34  ;;  %v3741_v27 = vmax.f32 %v3709_v39, 0.0  ;;  %v5071_v52 = vpop.f32.mrf.mxu1 }
 0x343   : > { %v3768_v13 = vpack.c.bf16 %v3744_v41, %v3743_v0  ;;  %v3548_v57 = vadd.f32 %v8228_v54, %v2600_v16  ;;  %v3715_v12 = vadd.f32 %v7320_v59, %v3676_v49  ;;  %v3674_v23 = vadd.f32 %v3608_v33, %v3545_v44  ;;  %v8231_v33 = vld [vmem:[#allocation99_spill] sm:$0xff]  ;;  %v8235_v0 = vld [vmem:[#allocation21_spill] sm:$0xff] }
 0x344   : > { %v3742_v30 = vmax.f32 %v3710_v43, 0.0  ;;  %v2598_v63 = vadd.f32 %v2521_v11, %v8229_v38  ;;  %v3587_v22 = vrot.slane %v7529_v37, 1  ;;  %v2818_v24 = vadd.f32 %v7475_v46, %v7405_v1  ;;  %v2534_v19 = vpop.f32.mrf.mxu1  ;;  %v8232_v46 = vld [vmem:[#allocation89_spill] sm:$0xff]  ;;  %v8237_v16 = vld [vmem:[#allocation103_spill] sm:$0xff] }
 0x345   : > { %v3677_v10 = vadd.f32 %v3645_v56, %v3548_v57  ;;  %v2603_v34 = vadd.f32 %v5071_v52, %v8230_v28  ;;  %v3601_v50 = vsel %vm3593_vm5, %v3584_v8, %v3585_v18  ;;  %v7560_v35 = vadd.f32 %v2763_v42, %v7417_v2  ;;  %v8241_v52 = vld [vmem:[#allocation107_spill] sm:$0xff] }
 0x346   : > { %v3546_v15 = vadd.f32 %v8231_v33, %v2598_v63  ;;  %v3767_v3 = vpack.c.bf16 %v3742_v30, %v3741_v27  ;;  %v7564_v39 = vadd.f32 %v2776_v55, %v7468_v36  ;;  %v2601_v31 = vadd.f32 %v2534_v19, %v8233_v60  ;;  %v5072_v36 = vpop.f32.mrf.mxu1  ;;  %v8239_v55 = vld [vmem:[#allocation148_spill] sm:$0xff]  ;;  %v8243_v33 = vld [vmem:[#allocation81_spill] sm:$0xff] }
 0x347   : > { %v3716_v1 = vadd.f32 %v7320_v59, %v3677_v10  ;;  %v3551_v40 = vadd.f32 %v8232_v46, %v2603_v34  ;;  %v3747_v53 = vmax.f32 %v3715_v12, 0.0  ;;  %v3713_v45 = vadd.f32 %v7320_v59, %v3674_v23  ;;  %v8240_v12 = vld [vmem:[#allocation82_spill] sm:$0xff] }
 0x348   : > { %v3675_v8 = vadd.f32 %v7495_v17, %v3546_v15  ;;  %v3604_v2 = vsel %vm3593_vm5, %v3581_v25, %v3582_v5  ;;  %5133 = vmatprep.mubr.msk.bf16.mxu1 %vm940_vm2, %v3767_v3  ;;  %v3549_v37 = vadd.f32 %v8234_v48, %v2601_v31  ;;  %v2604_v58 = vadd.f32 %v5072_v36, %v8235_v0  ;;  %v2537_v29 = vpop.f32.mrf.mxu1  ;;  %v5116_v5 = vpop.f32.mrf.mxu0  ;;  %v8244_v15 = vld [vmem:[#allocation149_spill] sm:$0xff] }
 0x349   : > { %v3748_v42 = vmax.f32 %v3716_v1, 0.0  ;;  %v3680_v61 = vadd.f32 %v3602_v62, %v3551_v40  ;;  %5134 = vmatmul.mubr.msk.bf16.gmra.mxu1 %vm940_vm2, %v3768_v13  ;;  %v3588_v32 = vrot.slane %v2818_v24, 1  ;;  %v3586_v41 = vrot.slane %v7560_v35, 1  ;;  %v8238_v62 = vld [vmem:[#allocation22_spill] sm:$0xff] }
 0x34a   : > { %v3714_v17 = vadd.f32 %v7320_v59, %v3675_v8  ;;  %v3649_v49 = vmul.f32 %v8236_v21, %v3601_v50  ;;  %v3589_v25 = vrot.slane %v7564_v39, 1  ;;  %v3678_v14 = vadd.f32 %v3604_v2, %v3549_v37  ;;  %v5075_v13 = vpop.f32.mrf.mxu1  ;;  %v2779_v34 = vpop.f32.mrf.mxu0  ;;  %v8249_v2 = vld [vmem:[#allocation25_spill] sm:$0xff]  ;;  %v8251_v21 = vld [vmem:[#allocation14_spill] sm:$0xff] }
 0x34b   : > { %v3770_v44 = vpack.c.bf16 %v3748_v42, %v3747_v53  ;;  %v3552_v43 = vadd.f32 %v8237_v16, %v2604_v58  ;;  %v3745_v9 = vmax.f32 %v3713_v45, 0.0  ;;  %v3719_v11 = vadd.f32 %v7320_v59, %v3680_v61  ;;  %v8248_v45 = vld [vmem:[#allocation90_spill] sm:$0xff] }
 0x34c   : > { %v3746_v56 = vmax.f32 %v3714_v17, 0.0  ;;  %v2602_v27 = vadd.f32 %v2537_v29, %v8238_v62  ;;  %v7588_v54 = vadd.f32 %v7531_v51, %v7436_v26  ;;  %v3647_v30 = vmul.f32 %v8239_v55, %v3603_v4  ;;  %v2550_v10 = vpop.f32.mrf.mxu1  ;;  %v8242_v51 = vld [vmem:[#allocation31_spill] sm:$0xff] }
 0x34d   : > { %v3681_v57 = vadd.f32 %v3649_v49, %v3552_v43  ;;  %v2607_v23 = vadd.f32 %v5075_v13, %v8240_v12  ;;  %v3599_v38 = vsel %vm3593_vm5, %v3586_v41, %v3587_v22  ;;  %v2822_v63 = vadd.f32 %v5116_v5, %v7500_v6 }
 0x34e   : > { %v3550_v24 = vadd.f32 %v8241_v52, %v2602_v27  ;;  %v3769_v28 = vpack.c.bf16 %v3746_v56, %v3745_v9  ;;  %v3717_v50 = vadd.f32 %v7320_v59, %v3678_v14  ;;  %v2605_v4 = vadd.f32 %v2550_v10, %v8243_v33  ;;  %v5076_v60 = vpop.f32.mrf.mxu1  ;;  %v8252_v14 = vld [vmem:[#allocation26_spill] sm:$0xff]  ;;  %v8253_v9 = vld [vmem:[#allocation27_spill] sm:$0xff]  ;;  %v8260_v10 = vld [vmem:[#allocation28_spill] sm:$0xff] }
 0x34f   : > { %v3720_v26 = vadd.f32 %v7320_v59, %v3681_v57  ;;  %v3555_v35 = vadd.f32 %v8242_v51, %v2607_v23  ;;  %v8245_v19 = vand.u32 15, %v8244_v15  ;;  %v3597_v6 = vsel %vm3593_vm5, %v3588_v32, %v3589_v25  ;;  %v8256_v27 = vld [vmem:[#allocation114_spill] sm:$0xff]  ;;  %v8257_v57 = vld [vmem:[#allocation71_spill] sm:$0xff]  ;;  %v8258_v23 = vld [vmem:[#allocation40_spill] sm:$0xff] }
 0x350   : > { %v3751_v1 = vmax.f32 %v3719_v11, 0.0  ;;  %v3679_v46 = vadd.f32 %v3647_v30, %v3550_v24  ;;  %v3598_v40 = vsel %vm3593_vm5, %v3587_v22, %v3588_v32  ;;  %5137 = vmatprep.mubr.msk.bf16.mxu1 %vm940_vm2, %v3769_v28  ;;  %v3553_v8 = vadd.f32 %v8248_v45, %v2605_v4  ;;  %v2553_v37 = vpop.f32.mrf.mxu1  ;;  %v8250_v32 = vld [vmem:[#allocation110_spill] sm:$0xff]  ;;  %v8261_v4 = vld [vmem:[#allocation92_spill] sm:$0xff] }
 0x351   : > { %vm7602_vm6 = vcmp.ne.s32.totalorder %v8245_v19, 15  ;;  %v3752_v31 = vmax.f32 %v3720_v26, 0.0  ;;  %v3684_v53 = vadd.f32 %v3598_v40, %v3555_v35  ;;  %v2608_v36 = vadd.f32 %v5076_v60, %v8249_v2  ;;  %5138 = vmatmul.mubr.msk.bf16.gmra.mxu1 %vm940_vm2, %v3770_v44  ;;  %v8262_v19 = vld [vmem:[#allocation85_spill] sm:$0xff] }
 0x352   : > { %v3592_v42 = vrot.slane %v2822_v63, 1  ;;  %v2820_v61 = vadd.f32 %v2779_v34, %v7525_v47  ;;  %v3718_v48 = vadd.f32 %v7320_v59, %v3679_v46  ;;  %v3600_v22 = vsel %vm3593_vm5, %v3585_v18, %v3586_v41  ;;  %v5079_v16 = vpop.f32.mrf.mxu1  ;;  %v8254_v18 = vld [vmem:[#allocation121_spill] sm:$0xff]  ;;  %v8264_v46 = vld [vmem:[#allocation100_spill] sm:$0xff] }
 0x353   : > { %v3749_v0 = vmax.f32 %v3717_v50, 0.0  ;;  %v3772_v58 = vpack.c.bf16 %v3752_v31, %v3751_v1  ;;  %v3556_v17 = vadd.f32 %v8250_v32, %v2608_v36  ;;  %v3653_v49 = vmul.f32 %v8251_v21, %v3597_v6  ;;  %v8255_v41 = vld [vmem:[#allocation141_spill] sm:$0xff]  ;;  %v8263_v1 = vld [vmem:[#allocation36_spill] sm:$0xff] }
 0x354   : > { %v3750_v29 = vmax.f32 %v3718_v48, 0.0  ;;  %v3723_v5 = vadd.f32 %v7320_v59, %v3684_v53  ;;  %v3682_v44 = vadd.f32 %v3600_v22, %v3553_v8  ;;  %v2606_v47 = vadd.f32 %v2553_v37, %v8252_v14  ;;  %v2566_v30 = vpop.f32.mrf.mxu1  ;;  %v8267_v48 = vld [vmem:[#allocation17_spill] sm:$0xff] }
 0x355   : > { %v3591_v43 = vrot.slane %v7588_v54, 1  ;;  %v3685_v7 = vadd.f32 %v3653_v49, %v3556_v17  ;;  %v2611_v56 = vadd.f32 %v5079_v16, %v8253_v9  ;;  %v3527_v11 = vmul.f32 %v8255_v41, %v8254_v18  ;;  %v8268_v49 = vld [vmem:[#allocation124_spill] sm:$0xff] }
 0x356   : > { %v3590_v62 = vrot.slane %v2820_v61, 1  ;;  %v3554_v13 = vadd.f32 %v8256_v27, %v2606_v47  ;;  %v3651_v55 = vmul.f32 %v8257_v57, %v3599_v38  ;;  %v3771_v12 = vpack.c.bf16 %v3750_v29, %v3749_v0  ;;  %v5080_v38 = vpop.f32.mrf.mxu1 }
 0x357   : > { %v8259_v63 = vrot.slane %v8258_v23, 1  ;;  %v3724_v54 = vadd.f32 %v7320_v59, %v3685_v7  ;;  %v3559_v24 = vadd.f32 %v3527_v11, %v2611_v56  ;;  %v2609_v28 = vadd.f32 %v2566_v30, %v8260_v10  ;;  %v7671_v56 = vld [vmem:[%s7825_s6] ss:$0 sm:$0xff] }
 0x358   : > { %v3755_v34 = vmax.f32 %v3723_v5, 0.0  ;;  %v3721_v50 = vadd.f32 %v7320_v59, %v3682_v44  ;;  %v3683_v26 = vadd.f32 %v3651_v55, %v3554_v13  ;;  %v3594_v51 = vsel %vm3593_vm5, %v3591_v43, %v3592_v42  ;;  %5141 = vmatprep.mubr.msk.bf16.mxu1 %vm940_vm2, %v3771_v12  ;;  %v2569_v53 = vpop.f32.mrf.mxu1  ;;  %v5283_v11 = vld [vmem:[%s5611_s16 + $0x10] sm:$0xff]  ;;  %v5284_v55 = vld [vmem:[%s5611_s16] sm:$0xff] }
 0x359   : > { %v3625_v52 = vsel %vm3593_vm5, %v3592_v42, %v8259_v63  ;;  %v3756_v35 = vmax.f32 %v3724_v54, 0.0  ;;  %v3688_v33 = vadd.f32 %v3594_v51, %v3559_v24  ;;  %v3557_v15 = vadd.f32 %v8261_v4, %v2609_v28  ;;  %5142 = vmatmul.mubr.msk.bf16.gmra.mxu1 %vm940_vm2, %v3772_v58  ;;  %v8266_v42 = vld [vmem:[#allocation120_spill] sm:$0xff] }
 0x35a   : > { %v2612_v6 = vadd.f32 %v5080_v38, %v8262_v19  ;;  %v1671_v40 = vadd.f32 %v8264_v46, %v8263_v1  ;;  %v3595_v60 = vsel %vm3593_vm5, %v3590_v62, %v3591_v43  ;;  %v3722_v31 = vadd.f32 %v7320_v59, %v3683_v26 }
 0x35b   : > { %v8265_v45 = vmov 0.0   ;;  %v3774_v2 = vpack.c.bf16 %v3756_v35, %v3755_v34  ;;  %v3596_v36 = vsel %vm3593_vm5, %v3589_v25, %v3590_v62  ;;  %v3657_v22 = vmul.f32 %v8267_v48, %v3625_v52  ;;  %v5285_v52 = vld [vmem:[%s5611_s16 + $0x18] sm:$0xff]  ;;  %v5286_v34 = vld [vmem:[%s5611_s16 + $0x8] sm:$0xff]  ;;  %v5287_v35 = vld [vmem:[%s5611_s16 + $0x30] sm:$0xff] }
 0x35c   : > { %v4480_v8 = vsel %vm7602_vm6, 1.0, %v8265_v45  ;;  %v3560_v61 = vadd.f32 %v8266_v42, %v2612_v6  ;;  %v3753_v37 = vmax.f32 %v3721_v50, 0.0  ;;  %v3754_v0 = vmax.f32 %v3722_v31, 0.0  ;;  %v5288_v6 = vld [vmem:[%s5611_s16 + $0x20] sm:$0xff]  ;;  %v5289_v31 = vld [vmem:[%s5611_s16 + $0x38] sm:$0xff] }
 0x35d   : > { %v3686_v58 = vadd.f32 %v3596_v36, %v3557_v15  ;;  %v2610_v32 = vadd.f32 %v2569_v53, %v1671_v40  ;;  %v3727_v17 = vadd.f32 %v7320_v59, %v3688_v33  ;;  %v3655_v29 = vmul.f32 %v4480_v8, %v3595_v60  ;;  %v5290_v36 = vld [vmem:[%s5611_s16 + $0x28] sm:$0xff] }
 0x35e   : > { %v3689_v21 = vadd.f32 %v3657_v22, %v3560_v61  ;;  %v3773_v5 = vpack.c.bf16 %v3754_v0, %v3753_v37  ;;  %v5291_v37 = vld [vmem:[%s5611_s16 + $0x50] sm:$0xff] }
 0x35f   : > { %v3558_v3 = vadd.f32 %v8268_v49, %v2610_v32  ;;  %v3725_v20 = vadd.f32 %v7320_v59, %v3686_v58  ;;  %v3759_v44 = vmax.f32 %v3727_v17, 0.0 }
 0x360   : > { %v3728_v39 = vadd.f32 %v7320_v59, %v3689_v21  ;;  %5145 = vmatprep.mubr.msk.bf16.mxu1 %vm940_vm2, %v3773_v5  ;;  %v5292_v21 = vld [vmem:[%s5611_s16 + $0x40] sm:$0xff] }
 0x361   : > { %v3687_v25 = vadd.f32 %v3655_v29, %v3558_v3  ;;  %5146 = vmatmul.mubr.msk.bf16.gmra.mxu1 %vm940_vm2, %v3774_v2  ;;  %v3757_v43 = vmax.f32 %v3725_v20, 0.0 }
 0x362   : > { %v3760_v14 = vmax.f32 %v3728_v39, 0.0  ;;  %v5293_v39 = vld [vmem:[%s5611_s16 + $0x58] sm:$0xff] }
 0x363   : > { %v3726_v47 = vadd.f32 %v7320_v59, %v3687_v25 }
 0x364   : > { %v3776_v16 = vpack.c.bf16 %v3760_v14, %v3759_v44 }
 0x365   : > { %v3758_v7 = vmax.f32 %v3726_v47, 0.0  ;;  %v5294_v47 = vld [vmem:[%s5611_s16 + $0x48] sm:$0xff] }
 0x367   : > { %v3775_v9 = vpack.c.bf16 %v3758_v7, %v3757_v43 }
 0x369   : > { %5149 = vmatprep.mubr.msk.bf16.mxu1 %vm940_vm2, %v3775_v9 }
 0x36a   : > { %5150 = vmatmul.mubr.msk.bf16.gmra.mxu1 %vm940_vm2, %v3776_v16 }
 0x3f1   : > { %v5123_v18 = vpop.f32.mrf.mxu1 }
 0x3f2   : > { %v3891_v41 = vadd.f32 %v5123_v18, %v7671_v56  ;;  %v5295_v18 = vld [vmem:[%s5611_s16 + $0x70] sm:$0xff] }
 0x3f3   : > { %v3882_v59 = vpop.f32.mrf.mxu1 }
 0x3f4   : > { %v4011_v62 = vadd.f32 %v5283_v11, %v3891_v41  ;;  %v3883_v27 = vadd.f32 %v7671_v56, %v3882_v59 }
 0x3f5   : > { %v5124_v13 = vpop.f32.mrf.mxu1 }
 0x3f6   : > { %v4043_v57 = vmax.f32 %v4011_v62, 0.0  ;;  %v4009_v30 = vadd.f32 %v5284_v55, %v3883_v27  ;;  %v3894_v12 = vadd.f32 %v5124_v13, %v7671_v56  ;;  %v5296_v27 = vld [vmem:[%s5611_s16 + $0x60] sm:$0xff] }
 0x3f7   : > { %v3885_v23 = vpop.f32.mrf.mxu1 }
 0x3f8   : > { %4075 = vst [vmem:[%s5621_s9 + $0x10] sm:$0xff] %v4043_v57  ;;  %v4041_v63 = vmax.f32 %v4009_v30, 0.0  ;;  %v4012_v54 = vadd.f32 %v5285_v52, %v3894_v12  ;;  %v3886_v24 = vadd.f32 %v7671_v56, %v3885_v23  ;;  %v5297_v12 = vld [vmem:[%s5611_s16 + $0x78] sm:$0xff] }
 0x3f9   : > { %v5127_v10 = vpop.f32.mrf.mxu1 }
 0x3fa   : > { %4073 = vst [vmem:[%s5621_s9] sm:$0xff] %v4041_v63  ;;  %v4044_v28 = vmax.f32 %v4012_v54, 0.0  ;;  %v4010_v50 = vadd.f32 %v5286_v34, %v3886_v24  ;;  %v3907_v26 = vadd.f32 %v5127_v10, %v7671_v56  ;;  %v5298_v24 = vld [vmem:[%s5611_s16 + $0x68] sm:$0xff] }
 0x3fb   : > { %v3898_v51 = vpop.f32.mrf.mxu1 }
 0x3fc   : > { %4076 = vst [vmem:[%s5621_s9 + $0x18] sm:$0xff] %v4044_v28  ;;  %v4042_v38 = vmax.f32 %v4010_v50, 0.0  ;;  %v4015_v33 = vadd.f32 %v5287_v35, %v3907_v26  ;;  %v3899_v4 = vadd.f32 %v7671_v56, %v3898_v51  ;;  %v5299_v26 = vld [vmem:[%s5611_s16 + $0x90] sm:$0xff] }
 0x3fd   : > { %v5128_v15 = vpop.f32.mrf.mxu1 }
 0x3fe   : > { %4074 = vst [vmem:[%s5621_s9 + $0x8] sm:$0xff] %v4042_v38  ;;  %v4047_v19 = vmax.f32 %v4015_v33, 0.0  ;;  %v4013_v1 = vadd.f32 %v5288_v6, %v3899_v4  ;;  %v3910_v46 = vadd.f32 %v5128_v15, %v7671_v56  ;;  %v5300_v4 = vld [vmem:[%s5611_s16 + $0x80] sm:$0xff] }
 0x3ff   : > { %v3901_v40 = vpop.f32.mrf.mxu1 }
 0x400   : > { %4079 = vst [vmem:[%s5621_s9 + $0x30] sm:$0xff] %v4047_v19  ;;  %v4045_v60 = vmax.f32 %v4013_v1, 0.0  ;;  %v4016_v53 = vadd.f32 %v5289_v31, %v3910_v46  ;;  %v3902_v45 = vadd.f32 %v7671_v56, %v3901_v40  ;;  %v5301_v46 = vld [vmem:[%s5611_s16 + $0x98] sm:$0xff] }
 0x401   : > { %v5131_v8 = vpop.f32.mrf.mxu1 }
 0x402   : > { %4077 = vst [vmem:[%s5621_s9 + $0x20] sm:$0xff] %v4045_v60  ;;  %v4048_v2 = vmax.f32 %v4016_v53, 0.0  ;;  %v4014_v42 = vadd.f32 %v5290_v36, %v3902_v45  ;;  %v3923_v61 = vadd.f32 %v5131_v8, %v7671_v56  ;;  %v5302_v45 = vld [vmem:[%s5611_s16 + $0x88] sm:$0xff] }
 0x403   : > { %v3914_v48 = vpop.f32.mrf.mxu1 }
 0x404   : > { %4080 = vst [vmem:[%s5621_s9 + $0x38] sm:$0xff] %v4048_v2  ;;  %v4046_v22 = vmax.f32 %v4014_v42, 0.0  ;;  %v4019_v0 = vadd.f32 %v5291_v37, %v3923_v61  ;;  %v3915_v58 = vadd.f32 %v7671_v56, %v3914_v48  ;;  %v5303_v61 = vld [vmem:[%s5611_s16 + $0xb0] sm:$0xff] }
 0x405   : > { %v5132_v32 = vpop.f32.mrf.mxu1 }
 0x406   : > { %4078 = vst [vmem:[%s5621_s9 + $0x28] sm:$0xff] %v4046_v22  ;;  %v4051_v17 = vmax.f32 %v4019_v0, 0.0  ;;  %v4017_v49 = vadd.f32 %v5292_v21, %v3915_v58  ;;  %v3926_v3 = vadd.f32 %v5132_v32, %v7671_v56  ;;  %v5304_v58 = vld [vmem:[%s5611_s16 + $0xa0] sm:$0xff] }
 0x407   : > { %v3917_v29 = vpop.f32.mrf.mxu1 }
 0x408   : > { %4083 = vst [vmem:[%s5621_s9 + $0x50] sm:$0xff] %v4051_v17  ;;  %v4049_v5 = vmax.f32 %v4017_v49, 0.0  ;;  %v4020_v20 = vadd.f32 %v5293_v39, %v3926_v3  ;;  %v3918_v25 = vadd.f32 %v7671_v56, %v3917_v29  ;;  %v5305_v3 = vld [vmem:[%s5611_s16 + $0xb8] sm:$0xff] }
 0x409   : > { %v5135_v44 = vpop.f32.mrf.mxu1 }
 0x40a   : > { %4081 = vst [vmem:[%s5621_s9 + $0x40] sm:$0xff] %v4049_v5  ;;  %v4052_v14 = vmax.f32 %v4020_v20, 0.0  ;;  %v4018_v16 = vadd.f32 %v5294_v47, %v3918_v25  ;;  %v3939_v43 = vadd.f32 %v5135_v44, %v7671_v56  ;;  %v5306_v25 = vld [vmem:[%s5611_s16 + $0xa8] sm:$0xff] }
 0x40b   : > { %v3930_v7 = vpop.f32.mrf.mxu1 }
 0x40c   : > { %4084 = vst [vmem:[%s5621_s9 + $0x58] sm:$0xff] %v4052_v14  ;;  %v4050_v9 = vmax.f32 %v4018_v16, 0.0  ;;  %v4023_v41 = vadd.f32 %v5295_v18, %v3939_v43  ;;  %v3931_v59 = vadd.f32 %v7671_v56, %v3930_v7  ;;  %v5307_v43 = vld [vmem:[%s5611_s16 + $0xd0] sm:$0xff] }
 0x40d   : > { %v5136_v11 = vpop.f32.mrf.mxu1 }
 0x40e   : > { %4082 = vst [vmem:[%s5621_s9 + $0x48] sm:$0xff] %v4050_v9  ;;  %v4055_v62 = vmax.f32 %v4023_v41, 0.0  ;;  %v4021_v13 = vadd.f32 %v5296_v27, %v3931_v59  ;;  %v3942_v57 = vadd.f32 %v5136_v11, %v7671_v56  ;;  %v5308_v59 = vld [vmem:[%s5611_s16 + $0xc0] sm:$0xff] }
 0x40f   : > { %v3933_v55 = vpop.f32.mrf.mxu1 }
 0x410   : > { %4087 = vst [vmem:[%s5621_s9 + $0x70] sm:$0xff] %v4055_v62  ;;  %v4053_v30 = vmax.f32 %v4021_v13, 0.0  ;;  %v4024_v23 = vadd.f32 %v5297_v12, %v3942_v57  ;;  %v3934_v63 = vadd.f32 %v7671_v56, %v3933_v55  ;;  %v5309_v57 = vld [vmem:[%s5611_s16 + $0xd8] sm:$0xff] }
 0x411   : > { %v5139_v52 = vpop.f32.mrf.mxu1 }
 0x412   : > { %4085 = vst [vmem:[%s5621_s9 + $0x60] sm:$0xff] %v4053_v30  ;;  %v4056_v54 = vmax.f32 %v4024_v23, 0.0  ;;  %v4022_v10 = vadd.f32 %v5298_v24, %v3934_v63  ;;  %v3955_v28 = vadd.f32 %v5139_v52, %v7671_v56  ;;  %v5310_v63 = vld [vmem:[%s5611_s16 + $0xc8] sm:$0xff] }
 0x413   : > { %v3946_v34 = vpop.f32.mrf.mxu1 }
 0x414   : > { %4088 = vst [vmem:[%s5621_s9 + $0x78] sm:$0xff] %v4056_v54  ;;  %v4054_v50 = vmax.f32 %v4022_v10, 0.0  ;;  %v4027_v51 = vadd.f32 %v5299_v26, %v3955_v28  ;;  %v3947_v38 = vadd.f32 %v7671_v56, %v3946_v34  ;;  %v5311_v28 = vld [vmem:[%s5611_s16 + $0xf0] sm:$0xff] }
 0x415   : > { %v5140_v35 = vpop.f32.mrf.mxu1 }
 0x416   : > { %4086 = vst [vmem:[%s5621_s9 + $0x68] sm:$0xff] %v4054_v50  ;;  %v4059_v33 = vmax.f32 %v4027_v51, 0.0  ;;  %v4025_v15 = vadd.f32 %v5300_v4, %v3947_v38  ;;  %v3958_v19 = vadd.f32 %v5140_v35, %v7671_v56  ;;  %v5312_v38 = vld [vmem:[%s5611_s16 + $0xe0] sm:$0xff] }
 0x417   : > { %v3949_v6 = vpop.f32.mrf.mxu1 }
 0x418   : > { %4091 = vst [vmem:[%s5621_s9 + $0x90] sm:$0xff] %v4059_v33  ;;  %v4057_v1 = vmax.f32 %v4025_v15, 0.0  ;;  %v4028_v40 = vadd.f32 %v5301_v46, %v3958_v19  ;;  %v3950_v60 = vadd.f32 %v7671_v56, %v3949_v6  ;;  %v5313_v19 = vld [vmem:[%s5611_s16 + $0xf8] sm:$0xff] }
 0x419   : > { %v5143_v31 = vpop.f32.mrf.mxu1 }
 0x41a   : > { %4089 = vst [vmem:[%s5621_s9 + $0x80] sm:$0xff] %v4057_v1  ;;  %v4060_v53 = vmax.f32 %v4028_v40, 0.0  ;;  %v4026_v8 = vadd.f32 %v5302_v45, %v3950_v60  ;;  %v3971_v2 = vadd.f32 %v5143_v31, %v7671_v56  ;;  %v5314_v40 = vld [vmem:[%s5611_s16 + $0xe8] sm:$0xff]  ;;  %s5447_s16 = smov [#allocation8]  }
 0x41b   : > { %v3962_v36 = vpop.f32.mrf.mxu1  ;;  %s5373_s18 = sshll.u32 %s5447_s16, 4  ;;  %s5374_s18 = int_to_ptr.vmem [resolvable:$false] %s5373_s18 }
 0x41c   : > { %4092 = vst [vmem:[%s5621_s9 + $0x98] sm:$0xff] %v4060_v53  ;;  %v4058_v42 = vmax.f32 %v4026_v8, 0.0  ;;  %v4031_v48 = vadd.f32 %v5303_v61, %v3971_v2  ;;  %v3963_v22 = vadd.f32 %v7671_v56, %v3962_v36  ;;  %s5375_s29 = scalar_lea.vmem %s5374_s18, 8192  ;;  %p5376_p2 = scmp.lt.s32.totalorder %s7774_s15, %s5374_s18 }
 0x41d   : > { %v5144_v37 = vpop.f32.mrf.mxu1  ;;  %p5377_p13 = scmp.lt.s32.totalorder %s5375_s29, %s5369_s28 }
 0x41e   : > { %4090 = vst [vmem:[%s5621_s9 + $0x88] sm:$0xff] %v4058_v42  ;;  %v4063_v0 = vmax.f32 %v4031_v48, 0.0  ;;  %v4029_v32 = vadd.f32 %v5304_v58, %v3963_v22  ;;  %v3974_v17 = vadd.f32 %v5144_v37, %v7671_v56 }
 0x41f   : > { %v3965_v21 = vpop.f32.mrf.mxu1  ;;  %p5378_p0 = por %p5377_p13, %p5376_p2 }
 0x420   : > { %4095 = vst [vmem:[%s5621_s9 + $0xb0] sm:$0xff] %v4063_v0  ;;  %v4061_v49 = vmax.f32 %v4029_v32, 0.0  ;;  %v4032_v29 = vadd.f32 %v5305_v3, %v3974_v17  ;;  %v3966_v5 = vadd.f32 %v7671_v56, %v3965_v21 }
 0x421   : > { %v5147_v39 = vpop.f32.mrf.mxu1  ;;  %p5379_p5 = pnand %p5378_p0, %p5372_p11 }
 0x422   : > { %4093 = vst [vmem:[%s5621_s9 + $0xa0] sm:$0xff] %v4061_v49  ;;  %v4064_v20 = vmax.f32 %v4032_v29, 0.0  ;;  %v4030_v44 = vadd.f32 %v5306_v25, %v3966_v5  ;;  %v3987_v14 = vadd.f32 %v5147_v39, %v7671_v56 }
 0x423   : > { %v3978_v47 = vpop.f32.mrf.mxu1 }
 0x424   : > { %4096 = vst [vmem:[%s5621_s9 + $0xb8] sm:$0xff] %v4064_v20  ;;  %v4062_v16 = vmax.f32 %v4030_v44, 0.0  ;;  %v4035_v7 = vadd.f32 %v5307_v43, %v3987_v14  ;;  %v3979_v9 = vadd.f32 %v7671_v56, %v3978_v47 }
 0x425   : > { %v5148_v18 = vpop.f32.mrf.mxu1 }
 0x426   : > { %4094 = vst [vmem:[%s5621_s9 + $0xa8] sm:$0xff] %v4062_v16  ;;  %v4067_v41 = vmax.f32 %v4035_v7, 0.0  ;;  %v4033_v11 = vadd.f32 %v5308_v59, %v3979_v9  ;;  %v3990_v62 = vadd.f32 %v5148_v18, %v7671_v56 }
 0x427   : > { %v3981_v27 = vpop.f32.mrf.mxu1 }
 0x428   : > { %4099 = vst [vmem:[%s5621_s9 + $0xd0] sm:$0xff] %v4067_v41  ;;  %v4065_v13 = vmax.f32 %v4033_v11, 0.0  ;;  %v4036_v55 = vadd.f32 %v5309_v57, %v3990_v62  ;;  %v3982_v30 = vadd.f32 %v7671_v56, %v3981_v27 }
 0x42a   : > { %v5151_v12 = vpop.f32.mrf.mxu1  ;;  %4097 = vst [vmem:[%s5621_s9 + $0xc0] sm:$0xff] %v4065_v13  ;;  %v4068_v23 = vmax.f32 %v4036_v55, 0.0  ;;  %v4034_v52 = vadd.f32 %v5310_v63, %v3982_v30 }
 0x42b   : > { %v4003_v54 = vadd.f32 %v5151_v12, %v7671_v56 }
 0x42c   : > { %v3994_v24 = vpop.f32.mrf.mxu1  ;;  %4100 = vst [vmem:[%s5621_s9 + $0xd8] sm:$0xff] %v4068_v23  ;;  %v4066_v10 = vmax.f32 %v4034_v52, 0.0 }
 0x42d   : > { %v4039_v34 = vadd.f32 %v5311_v28, %v4003_v54  ;;  %v3995_v50 = vadd.f32 %v7671_v56, %v3994_v24 }
 0x42e   : > { %v5152_v26 = vpop.f32.mrf.mxu1  ;;  %4098 = vst [vmem:[%s5621_s9 + $0xc8] sm:$0xff] %v4066_v10 }
 0x42f   : > { %v4071_v51 = vmax.f32 %v4039_v34, 0.0  ;;  %v4037_v35 = vadd.f32 %v5312_v38, %v3995_v50  ;;  %v4006_v33 = vadd.f32 %v5152_v26, %v7671_v56 }
 0x430   : > { %v3997_v4 = vpop.f32.mrf.mxu1 }
 0x431   : > { %4103 = vst [vmem:[%s5621_s9 + $0xf0] sm:$0xff] %v4071_v51  ;;  %v4069_v15 = vmax.f32 %v4037_v35, 0.0  ;;  %v4040_v6 = vadd.f32 %v5313_v19, %v4006_v33  ;;  %v3998_v1 = vadd.f32 %v7671_v56, %v3997_v4 }
 0x433   : > { %4101 = vst [vmem:[%s5621_s9 + $0xe0] sm:$0xff] %v4069_v15  ;;  %v4072_v46 = vmax.f32 %v4040_v6, 0.0  ;;  %v4038_v60 = vadd.f32 %v5314_v40, %v3998_v1 }
 0x435   : > { %4104 = vst [vmem:[%s5621_s9 + $0xf8] sm:$0xff] %v4072_v46  ;;  %v4070_v31 = vmax.f32 %v4038_v60, 0.0 }
 0x437   : > { %4102 = vst [vmem:[%s5621_s9 + $0xe8] sm:$0xff] %v4070_v31 }
 0x438   : > { %5382 = shalt.err (!%p5379_p5)
}
 0x439   : > { %s5383_s9 = scalar_lea.hbm %s7772_s11, 4096  ;;  %s5387_s30 = scalar_lea.hbm %s7826_s7, 8192 }
 0x43a   : > { %p5384_p10 = scmp.ne.s32.totalorder %s7772_s11, %s5383_s9  ;;  %p5388_p6 = scmp.lt.s32.totalorder %s7772_s11, %s7826_s7 }
 0x43b   : > { %p5389_p9 = scmp.lt.s32.totalorder %s5387_s30, %s5383_s9 }
 0x43c   : > { %p5385_p1 = pnand %p5384_p10, %p8269_p7 }
 0x43d   : > { %p5390_p3 = por %p5389_p9, %p5388_p6 }
 0x43e   : > { %p5386_p4 = pneg %p5385_p1 }
 0x440   : > { %p5391_p12 = pnand %p5390_p3, %p5386_p4 }
 0x442   : > { %5394 = shalt.err (!%p5391_p12)
}
 0x443   : > { %s5448_s17 = smov 128   ;;  %s5449_s23 = smov 8  }
 0x444   : > { %5163 = dma.vmem_to_hbm [thread:$0]  (%p8269_p7), %s7774_s15, 4096, %s7772_s11, %s4106_s20, %s5448_s17, %s5448_s17, %s5449_s23  }
 0x445 PF: > { %s4134_s28 = sand.u32 1, %s5425_s24   ;;  %p8270_p8 = scmp.ne.s32.totalorder %s7839_s8, 0 }
 0x446   : > { %p8271_p11 = scmp.ge.s32.totalorder %s5437_s27, 2  ;;  %s4135_s16 = scalar_lea.sflag [#allocation5], %s4134_s28 }
 0x448   : > { %p5174_p2 = pnand %p8271_p11, %p8270_p8 }
 0x44a   : > { %p5175_p13 = pneg %p5174_p2 }
 0x44c   : > { %5420 = dma.done.wait (%p5175_p13), %s4135_s16, 4096  }
 0x44d   : > { %5422 = vsyncadd (%p5175_p13), %s4135_s16, 4294963200  ;;  %p21_p0 = scmp.ge.s32.totalorder %s5545_s13, 4   ;;  %s8272_s24 = smov %s5429_s25 }
 0x44e   : > { %s8273_s25 = smov %s5433_s26  ;;  %s8274_s26 = smov %s5562_s21 }
 0x44f   : > { %s8275_s27 = smov %s5545_s13  ;;  %23 = sbr.rel (!%p21_p0) target bundleno = 8 (0x8), region = 109 }
 0x454   :  { %4140 = vsyncpa [#allocation4], 1 }
 0x455   :  { %4142 = vsyncpa [#allocation4 + $0x1], 1 }
 0x456   :  { %4143 = vsyncpa [#allocation7], 1 }
 0x457   :  { %4144 = vsyncpa [#allocation5], 1 }
 0x458   :  { %4146 = vsyncpa [#allocation5 + $0x1], 1 }

</bundles_post_ra>
